<compile_context>
chip_gen: v5e
topology: v5e:2x2
jax: 0.10.0
libtpu: 0.0.40
codegen_flags: <defaults>
</compile_context>

<pallas_src>
import numpy as np
import jax
import jax.numpy as jnp
from jax.experimental import pallas as pl
from jax.experimental.pallas import tpu as pltpu


def _round_up(x, m):
    return ((x + m - 1) // m) * m


def _pick_tile_n(n_patches, hp_pad, k_pad):
    """Patches per grid step.

    Small bags: one fat step (grid=(1,)) -- no per-step overhead, no pipelining.
    Large bags: a divisor of N, preferably a multiple of 8 (aligned feats store),
    keeping the input row-slab block around 0.5-2 MiB with >= 4 grid steps so the
    input DMA actually pipelines behind compute.
    """
    row_bytes = hp_pad * k_pad * 4
    if n_patches * row_bytes <= (4 << 20):
        return n_patches
    fallback = 1
    for t in range(n_patches - 1, 0, -1):
        if n_patches % t:
            continue
        if n_patches // t < 4 or t * row_bytes > (2 << 20):
            continue
        if t % 8 == 0:
            return t
        fallback = max(fallback, t)
    return fallback


def prepare_params(params, H, W):
    """One-time host-side weight prep: banded conv weights (K padded to 128 lanes),
    GAP/pad matrix, fc1 feature-dim padding."""
    conv_w = np.asarray(params['conv_w'])          # [F, C, 3, 3]
    conv_b = np.asarray(params['conv_b'])          # [F]
    F, C = conv_w.shape[0], conv_w.shape[1]
    F_pad = _round_up(F, 128)                      # lane-dense feature dim
    WC2 = (W + 2) * C
    K_pad = _round_up(WC2, 128)                    # lane-dense contraction dim
    WF = W * F

    # Banded weights: one [K_pad, W*F] matrix per dy tap, so the 3x3 conv is
    # 3 dense slab-level MXU matmuls on [rows, K_pad] blocks.
    wdy = np.zeros((3, K_pad, WF), np.float32)
    for dy in range(3):
        for dx in range(3):
            blk = conv_w[:, :, dy, dx].T           # [C, F]
            for w in range(W):
                wdy[dy, (w + dx) * C:(w + dx + 1) * C, w * F:(w + 1) * F] = blk

    bias_row = np.tile(conv_b, W).reshape(1, WF).astype(np.float32)

    # Pooling matrix: sums the W column blocks, scales by 1/(H*W) (global average
    # pool) and zero-pads the feature dim F -> F_pad in one MXU matmul.
    pool = np.zeros((WF, F_pad), np.float32)
    pool[:, :F] = np.tile(np.eye(F, dtype=np.float32), (W, 1)) / float(H * W)

    w1 = np.asarray(params['w1'])                  # [F, L]
    w1p = np.zeros((F_pad, w1.shape[1]), np.float32)
    w1p[:F, :] = w1                                # zero rows for padded feat cols

    return dict(
        wdy=jnp.asarray(wdy),
        bias_row=jnp.asarray(bias_row),
        pool=jnp.asarray(pool),
        w1=jnp.asarray(w1p),
        b1=jnp.asarray(params['b1']).reshape(1, -1),
        wa1=jnp.asarray(params['wa1']),
        ba1=jnp.asarray(params['ba1']).reshape(1, -1),
        wa2t=jnp.asarray(params['wa2']).T,         # [D, 1]
        ba2=jnp.asarray(params['ba2']).reshape(1, 1),
        wc1=jnp.asarray(params['wc1']),
        bc1=jnp.asarray(params['bc1']).reshape(1, -1),
        wc2=jnp.asarray(params['wc2']),
        bc2=jnp.asarray(params['bc2']).reshape(1, -1),
    )


def mil_net_image_only(bag_data, prep):
    x = bag_data[0]                                # squeeze(0): [N, C, H, W]
    N, C, H, W = x.shape
    Hp = H + 2
    Hp_pad = _round_up(Hp, 8)                      # 8-sublane-aligned patch stride
    WC2 = (W + 2) * C
    K_pad = prep['wdy'].shape[1]
    WF = prep['pool'].shape[0]                     # W * F
    F_pad = prep['pool'].shape[1]
    L = prep['w1'].shape[1]
    D = prep['wa1'].shape[1]
    Hd = prep['wc1'].shape[1]
    NC = prep['wc2'].shape[1]

    tile_n = _pick_tile_n(N, Hp_pad, K_pad)
    num_tiles = N // tile_n
    R = tile_n * Hp_pad                            # rows per grid step

    # NCHW -> NHWC, zero-pad spatially (pad=1) plus Hp->Hp_pad alignment rows,
    # flatten to [N*Hp_pad, K_pad] with the contraction dim zero-padded to 128.
    # Same order of bytes as the input (+ halo) -- no 9x im2col blow-up in HBM.
    x_nhwc = jnp.transpose(x, (0, 2, 3, 1))
    xpad = jnp.pad(x_nhwc, ((0, 0), (1, 1 + Hp_pad - Hp), (1, 1), (0, 0)))
    xrows = jnp.pad(xpad.reshape(N * Hp_pad, WC2), ((0, 0), (0, K_pad - WC2)))

    # Selection matrix: sums each patch's H valid conv rows on the MXU instead of
    # per-patch XLU sublane reductions + row concatenates.
    sel_np = np.zeros((tile_n, R), np.float32)
    for p in range(tile_n):
        sel_np[p, p * Hp_pad:p * Hp_pad + H] = 1.0
    sel = jnp.asarray(sel_np)

    def kernel(x_ref, wdy_ref, bias_ref, pool_ref, sel_ref,
               w1_ref, b1_ref, wa1_ref, ba1_ref, wa2_ref, ba2_ref,
               wc1_ref, bc1_ref, wc2_ref, bc2_ref,
               res_ref, att_ref, feats_ref, conv_ref):
        i = pl.program_id(0)

        # ---- Backbone: Conv3x3(pad=1) as 3 slab-level MXU matmuls ---------------
        def shifted(dy):
            # Rows shifted up by dy (== jnp.roll(x, -dy, axis=0)).  Wrapped rows
            # land only in per-patch padding rows, which `sel` zeroes out.
            return jnp.concatenate([x_ref[dy:R, :], x_ref[0:dy, :]], axis=0)

        conv_ref[...] = jnp.dot(x_ref[...], wdy_ref[0, :, :],
                                preferred_element_type=jnp.float32)
        conv_ref[...] += jnp.dot(shifted(1), wdy_ref[1, :, :],
                                 preferred_element_type=jnp.float32)
        conv_ref[...] += jnp.dot(shifted(2), wdy_ref[2, :, :],
                                 preferred_element_type=jnp.float32)
        # Bias + ReLU applied once to the whole slab (hoisted broadcast).
        conv_ref[...] = jnp.maximum(conv_ref[...] + bias_ref[...], 0.0)

        # Global average pool on the MXU: per-patch row sum (sel), then column-block
        # sum + 1/(H*W) scale + F -> F_pad zero-pad (pool).
        pre = jnp.dot(sel_ref[...], conv_ref[...],
                      preferred_element_type=jnp.float32)            # [tile_n, WF]
        tile_feats = jnp.dot(pre, pool_ref[...],
                             preferred_element_type=jnp.float32)     # [tile_n, F_pad]
        start = i * tile_n
        if tile_n % 8 == 0:
            start = pl.multiple_of(start, 8)                         # aligned store
        feats_ref[pl.ds(start, tile_n), :] = tile_feats

        # ---- Attention aggregator + classifier (last grid step only) ------------
        @pl.when(i == pl.num_programs(0) - 1)
        def _():
            feats = feats_ref[...]                                   # [N, F_pad]
            h = jnp.dot(feats, w1_ref[...], preferred_element_type=jnp.float32)
            h = jnp.maximum(h + b1_ref[...], 0.0)                    # [N, L]
            t = jnp.tanh(jnp.dot(h, wa1_ref[...],
                                 preferred_element_type=jnp.float32) + ba1_ref[...])
            scores = jnp.dot(t, wa2_ref[...],
                             preferred_element_type=jnp.float32) + ba2_ref[...]  # [N,1]
            m = jnp.max(scores, axis=0, keepdims=True)
            e = jnp.exp(scores - m)
            attn = e / jnp.sum(e, axis=0, keepdims=True)   # exact scalar divide
            # NOTE: for large bags, this reduce should become an MXU matmul
            # ([1, N] @ [N, L]) with a lane-dense attention output; negligible at N=8.
            agg = jnp.sum(attn * h, axis=0, keepdims=True)           # [1, L]
            c = jnp.maximum(jnp.dot(agg, wc1_ref[...],
                                    preferred_element_type=jnp.float32) + bc1_ref[...],
                            0.0)                                     # [1, 64]
            res_ref[...] = jnp.dot(c, wc2_ref[...],
                                   preferred_element_type=jnp.float32) + bc2_ref[...]
            att_ref[...] = attn

    def full(arr):
        nd = arr.ndim
        if num_tiles > 1:
            # Grid-invariant weights: a single VMEM buffer is enough (no double
            # buffering) -- matters for the O(W^2) banded weights on v7x (64 MiB VMEM).
            return pl.BlockSpec(arr.shape, lambda i, _nd=nd: (0,) * _nd,
                                pipeline_mode=pl.Buffered(1))
        return pl.BlockSpec(arr.shape, lambda i, _nd=nd: (0,) * _nd)

    flops = (2 * 3 * N * Hp_pad * K_pad * WF          # banded conv slab matmuls
             + 2 * N * R * WF                         # sel row-sum matmul
             + 2 * N * WF * F_pad                     # pooling matmul
             + 2 * N * F_pad * L + 2 * N * L * D + 2 * N * D
             + 2 * L * Hd + 2 * Hd * NC)
    bytes_accessed = 4 * (xrows.size + prep['wdy'].size + prep['pool'].size + sel.size
                          + prep['w1'].size + prep['wa1'].size + prep['wc1'].size
                          + N * F_pad + N + NC)
    cost = pl.CostEstimate(flops=int(flops), transcendentals=int(N * D + N),
                           bytes_accessed=int(bytes_accessed))

    result, att_col = pl.pallas_call(
        kernel,
        out_shape=(jax.ShapeDtypeStruct((1, NC), jnp.float32),
                   jax.ShapeDtypeStruct((N, 1), jnp.float32)),
        grid_spec=pltpu.PrefetchScalarGridSpec(
            num_scalar_prefetch=0,
            grid=(num_tiles,),
            in_specs=[
                pl.BlockSpec((R, K_pad), lambda i: (i, 0)),          # pipelined rows
                full(prep['wdy']), full(prep['bias_row']), full(prep['pool']), full(sel),
                full(prep['w1']), full(prep['b1']),
                full(prep['wa1']), full(prep['ba1']),
                full(prep['wa2t']), full(prep['ba2']),
                full(prep['wc1']), full(prep['bc1']),
                full(prep['wc2']), full(prep['bc2']),
            ],
            out_specs=(pl.BlockSpec((1, NC), lambda i: (0, 0)),
                       pl.BlockSpec((N, 1), lambda i: (0, 0))),
            scratch_shapes=[pltpu.VMEM((N, F_pad), jnp.float32),     # patch features
                            pltpu.VMEM((R, WF), jnp.float32)],       # conv slab acc
        ),
        compiler_params=pltpu.CompilerParams(
            # Sequential grid: feats scratch carry.  (For very large bags on v7x,
            # split patches across the 2 TensorCores with feats as an output and a
            # tiny second call for the attention tail.)
            dimension_semantics=("arbitrary",),
            vmem_limit_bytes=32 * 1024 * 1024,
        ),
        cost_estimate=cost,
    )(xrows, prep['wdy'], prep['bias_row'], prep['pool'], sel,
      prep['w1'], prep['b1'], prep['wa1'], prep['ba1'],
      prep['wa2t'], prep['ba2'], prep['wc1'], prep['bc1'],
      prep['wc2'], prep['bc2'])

    attention = jnp.transpose(att_col)               # [1, N] (K=1 attention head)
    return result, attention


# ----------------------------------------------------------------------------
# Pure-JAX reference for correctness checking
# ----------------------------------------------------------------------------
def reference(bag_data, p):
    x = bag_data[0]
    y = jax.lax.conv_general_dilated(
        x, p['conv_w'], window_strides=(1, 1), padding='SAME',
        dimension_numbers=('NCHW', 'OIHW', 'NCHW'))
    y = jax.nn.relu(y + p['conv_b'][None, :, None, None])
    feats = jnp.mean(y, axis=(2, 3))                 # [N, F]
    h = jax.nn.relu(feats @ p['w1'] + p['b1'])       # [N, L]
    t = jnp.tanh(h @ p['wa1'] + p['ba1'])            # [N, D]
    scores = t @ p['wa2'].T + p['ba2']               # [N, 1]
    att = jax.nn.softmax(scores.T, axis=1)           # [1, N]
    agg = att @ h                                    # [1, L]
    res = jax.nn.relu(agg @ p['wc1'] + p['bc1']) @ p['wc2'] + p['bc2']
    return res, att


if __name__ == "__main__":
    key = jax.random.PRNGKey(0)
    N, C, H, W = 8, 4, 16, 16          # bag of 8 patches, 4 channels, 16x16
    F, L, D, NUM_CLASSES = 32, 256, 128, 2

    ks = jax.random.split(key, 13)
    params = dict(
        conv_w=jax.random.normal(ks[0], (F, C, 3, 3), jnp.float32) * 0.1,
        conv_b=jax.random.normal(ks[1], (F,), jnp.float32) * 0.01,
        w1=jax.random.normal(ks[2], (F, L), jnp.float32) * 0.1,
        b1=jax.random.normal(ks[3], (L,), jnp.float32) * 0.01,
        wa1=jax.random.normal(ks[4], (L, D), jnp.float32) * 0.05,
        ba1=jax.random.normal(ks[5], (D,), jnp.float32) * 0.01,
        wa2=jax.random.normal(ks[6], (1, D), jnp.float32) * 0.05,
        ba2=jax.random.normal(ks[7], (1,), jnp.float32) * 0.01,
        wc1=jax.random.normal(ks[8], (L, 64), jnp.float32) * 0.05,
        bc1=jax.random.normal(ks[9], (64,), jnp.float32) * 0.01,
        wc2=jax.random.normal(ks[10], (64, NUM_CLASSES), jnp.float32) * 0.05,
        bc2=jax.random.normal(ks[11], (NUM_CLASSES,), jnp.float32) * 0.01,
    )
    bag_data = jax.random.normal(ks[12], (1, N, C, H, W), jnp.float32)

    prep = prepare_params(params, H, W)              # one-time weight preparation
    fwd = jax.jit(lambda b: mil_net_image_only(b, prep))
    result, attention = fwd(bag_data)
    jax.block_until_ready((result, attention))

    res_ref, att_ref = reference(bag_data, params)
    assert result.shape == (1, NUM_CLASSES) and attention.shape == (1, N)
    assert jnp.allclose(result, res_ref, rtol=2e-3, atol=2e-3)
    assert jnp.allclose(attention, att_ref, rtol=2e-3, atol=2e-3)
    print("KERNEL_OK")
</pallas_src>

<mosaic_0001>
module attributes {stable_mosaic.version = 11 : i64} {
  func.func @kernel(%arg0: i32, %arg1: memref<192x128xf32, #tpu.memory_space<vmem>>, %arg2: memref<3x128x512xf32, #tpu.memory_space<vmem>>, %arg3: memref<1x512xf32, #tpu.memory_space<vmem>>, %arg4: memref<512x128xf32, #tpu.memory_space<vmem>>, %arg5: memref<8x192xf32, #tpu.memory_space<vmem>>, %arg6: memref<128x256xf32, #tpu.memory_space<vmem>>, %arg7: memref<1x256xf32, #tpu.memory_space<vmem>>, %arg8: memref<256x128xf32, #tpu.memory_space<vmem>>, %arg9: memref<1x128xf32, #tpu.memory_space<vmem>>, %arg10: memref<128x1xf32, #tpu.memory_space<vmem>>, %arg11: memref<1x1xf32, #tpu.memory_space<vmem>>, %arg12: memref<256x64xf32, #tpu.memory_space<vmem>>, %arg13: memref<1x64xf32, #tpu.memory_space<vmem>>, %arg14: memref<64x2xf32, #tpu.memory_space<vmem>>, %arg15: memref<1x2xf32, #tpu.memory_space<vmem>>, %arg16: memref<1x2xf32, #tpu.memory_space<vmem>>, %arg17: memref<8x1xf32, #tpu.memory_space<vmem>>, %arg18: memref<8x128xf32, #tpu.memory_space<vmem>>, %arg19: memref<192x512xf32, #tpu.memory_space<vmem>>) attributes {dimension_semantics = [#tpu.dimension_semantics<arbitrary>], iteration_bounds = array<i64: 1>, scalar_prefetch = 0 : i64, scratch_operands = 2 : i64, tpu.core_type = #tpu.core_type<tc>, window_params = [{transform_indices = @transform_0, window_bounds = array<i64: 192, 128>}, {pipeline_mode = #tpu.pipeline_mode<synchronous>, transform_indices = @transform_1, window_bounds = array<i64: 3, 128, 512>}, {pipeline_mode = #tpu.pipeline_mode<synchronous>, transform_indices = @transform_2, window_bounds = array<i64: 1, 512>}, {pipeline_mode = #tpu.pipeline_mode<synchronous>, transform_indices = @transform_3, window_bounds = array<i64: 512, 128>}, {pipeline_mode = #tpu.pipeline_mode<synchronous>, transform_indices = @transform_4, window_bounds = array<i64: 8, 192>}, {pipeline_mode = #tpu.pipeline_mode<synchronous>, transform_indices = @transform_5, window_bounds = array<i64: 128, 256>}, {pipeline_mode = #tpu.pipeline_mode<synchronous>, transform_indices = @transform_6, window_bounds = array<i64: 1, 256>}, {pipeline_mode = #tpu.pipeline_mode<synchronous>, transform_indices = @transform_7, window_bounds = array<i64: 256, 128>}, {pipeline_mode = #tpu.pipeline_mode<synchronous>, transform_indices = @transform_8, window_bounds = array<i64: 1, 128>}, {pipeline_mode = #tpu.pipeline_mode<synchronous>, transform_indices = @transform_9, window_bounds = array<i64: 128, 1>}, {pipeline_mode = #tpu.pipeline_mode<synchronous>, transform_indices = @transform_10, window_bounds = array<i64: 1, 1>}, {pipeline_mode = #tpu.pipeline_mode<synchronous>, transform_indices = @transform_11, window_bounds = array<i64: 256, 64>}, {pipeline_mode = #tpu.pipeline_mode<synchronous>, transform_indices = @transform_12, window_bounds = array<i64: 1, 64>}, {pipeline_mode = #tpu.pipeline_mode<synchronous>, transform_indices = @transform_13, window_bounds = array<i64: 64, 2>}, {pipeline_mode = #tpu.pipeline_mode<synchronous>, transform_indices = @transform_14, window_bounds = array<i64: 1, 2>}, {pipeline_mode = #tpu.pipeline_mode<synchronous>, transform_indices = @transform_15, window_bounds = array<i64: 1, 2>}, {pipeline_mode = #tpu.pipeline_mode<synchronous>, transform_indices = @transform_16, window_bounds = array<i64: 8, 1>}]} {
    %c0 = arith.constant 0 : index
    %c0_0 = arith.constant 0 : index
    %0 = vector.load %arg1[%c0, %c0_0] : memref<192x128xf32, #tpu.memory_space<vmem>>, vector<192x128xf32>
    %c0_1 = arith.constant 0 : index
    %c0_2 = arith.constant 0 : index
    %c0_3 = arith.constant 0 : index
    %1 = vector.load %arg2[%c0_1, %c0_2, %c0_3] : memref<3x128x512xf32, #tpu.memory_space<vmem>>, vector<1x128x512xf32>
    %2 = vector.shape_cast %1 : vector<1x128x512xf32> to vector<128x512xf32>
    %cst = arith.constant dense<0.000000e+00> : vector<192x512xf32>
    %3 = tpu.matmul %0, %2, %cst {dimension_numbers = #tpu.dot_dimension_numbers<[1], [0], [0], [1], [0, 0, 1, 1], [], []>} : vector<192x128xf32>, vector<128x512xf32>, vector<192x512xf32> -> vector<192x512xf32>
    %c0_4 = arith.constant 0 : index
    %c0_5 = arith.constant 0 : index
    %4 = vector.load %arg19[%c0_4, %c0_5] : memref<192x512xf32, #tpu.memory_space<vmem>>, vector<192x512xf32>
    tpu.vector_store %arg19[%c0_4, %c0_5], %3 {strides = array<i32>} : memref<192x512xf32, #tpu.memory_space<vmem>>, vector<192x512xf32>,
    %c0_6 = arith.constant 0 : index
    %c0_7 = arith.constant 0 : index
    %5 = vector.load %arg19[%c0_6, %c0_7] : memref<192x512xf32, #tpu.memory_space<vmem>>, vector<192x512xf32>
    %c1 = arith.constant 1 : index
    %c0_8 = arith.constant 0 : index
    %6 = vector.load %arg1[%c1, %c0_8] : memref<192x128xf32, #tpu.memory_space<vmem>>, vector<191x128xf32>
    %c0_9 = arith.constant 0 : index
    %c0_10 = arith.constant 0 : index
    %7 = vector.load %arg1[%c0_9, %c0_10] : memref<192x128xf32, #tpu.memory_space<vmem>>, vector<1x128xf32>
    %8 = tpu.concatenate %6, %7 in 0 : vector<191x128xf32>, vector<1x128xf32> -> vector<192x128xf32>
    %c1_11 = arith.constant 1 : index
    %c0_12 = arith.constant 0 : index
    %c0_13 = arith.constant 0 : index
    %9 = vector.load %arg2[%c1_11, %c0_12, %c0_13] : memref<3x128x512xf32, #tpu.memory_space<vmem>>, vector<1x128x512xf32>
    %10 = vector.shape_cast %9 : vector<1x128x512xf32> to vector<128x512xf32>
    %cst_14 = arith.constant dense<0.000000e+00> : vector<192x512xf32>
    %11 = tpu.matmul %8, %10, %cst_14 {dimension_numbers = #tpu.dot_dimension_numbers<[1], [0], [0], [1], [0, 0, 1, 1], [], []>} : vector<192x128xf32>, vector<128x512xf32>, vector<192x512xf32> -> vector<192x512xf32>
    %12 = arith.addf %5, %11 : vector<192x512xf32>
    %c0_15 = arith.constant 0 : index
    %c0_16 = arith.constant 0 : index
    %13 = vector.load %arg19[%c0_15, %c0_16] : memref<192x512xf32, #tpu.memory_space<vmem>>, vector<192x512xf32>
    tpu.vector_store %arg19[%c0_15, %c0_16], %12 {strides = array<i32>} : memref<192x512xf32, #tpu.memory_space<vmem>>, vector<192x512xf32>,
    %c0_17 = arith.constant 0 : index
    %c0_18 = arith.constant 0 : index
    %14 = vector.load %arg19[%c0_17, %c0_18] : memref<192x512xf32, #tpu.memory_space<vmem>>, vector<192x512xf32>
    %c2 = arith.constant 2 : index
    %c0_19 = arith.constant 0 : index
    %15 = vector.load %arg1[%c2, %c0_19] : memref<192x128xf32, #tpu.memory_space<vmem>>, vector<190x128xf32>
    %c0_20 = arith.constant 0 : index
    %c0_21 = arith.constant 0 : index
    %16 = vector.load %arg1[%c0_20, %c0_21] : memref<192x128xf32, #tpu.memory_space<vmem>>, vector<2x128xf32>
    %17 = tpu.concatenate %15, %16 in 0 : vector<190x128xf32>, vector<2x128xf32> -> vector<192x128xf32>
    %c2_22 = arith.constant 2 : index
    %c0_23 = arith.constant 0 : index
    %c0_24 = arith.constant 0 : index
    %18 = vector.load %arg2[%c2_22, %c0_23, %c0_24] : memref<3x128x512xf32, #tpu.memory_space<vmem>>, vector<1x128x512xf32>
    %19 = vector.shape_cast %18 : vector<1x128x512xf32> to vector<128x512xf32>
    %cst_25 = arith.constant dense<0.000000e+00> : vector<192x512xf32>
    %20 = tpu.matmul %17, %19, %cst_25 {dimension_numbers = #tpu.dot_dimension_numbers<[1], [0], [0], [1], [0, 0, 1, 1], [], []>} : vector<192x128xf32>, vector<128x512xf32>, vector<192x512xf32> -> vector<192x512xf32>
    %21 = arith.addf %14, %20 : vector<192x512xf32>
    %c0_26 = arith.constant 0 : index
    %c0_27 = arith.constant 0 : index
    %22 = vector.load %arg19[%c0_26, %c0_27] : memref<192x512xf32, #tpu.memory_space<vmem>>, vector<192x512xf32>
    tpu.vector_store %arg19[%c0_26, %c0_27], %21 {strides = array<i32>} : memref<192x512xf32, #tpu.memory_space<vmem>>, vector<192x512xf32>,
    %c0_28 = arith.constant 0 : index
    %c0_29 = arith.constant 0 : index
    %23 = vector.load %arg19[%c0_28, %c0_29] : memref<192x512xf32, #tpu.memory_space<vmem>>, vector<192x512xf32>
    %c0_30 = arith.constant 0 : index
    %c0_31 = arith.constant 0 : index
    %24 = vector.load %arg3[%c0_30, %c0_31] : memref<1x512xf32, #tpu.memory_space<vmem>>, vector<1x512xf32>
    %25 = vector.broadcast %24 : vector<1x512xf32> to vector<192x512xf32>
    %26 = arith.addf %23, %25 : vector<192x512xf32>
    %cst_32 = arith.constant 0.000000e+00 : f32
    %27 = vector.broadcast %cst_32 : f32 to vector<192x512xf32>
    %28 = arith.maximumf %26, %27 : vector<192x512xf32>
    %c0_33 = arith.constant 0 : index
    %c0_34 = arith.constant 0 : index
    %29 = vector.load %arg19[%c0_33, %c0_34] : memref<192x512xf32, #tpu.memory_space<vmem>>, vector<192x512xf32>
    tpu.vector_store %arg19[%c0_33, %c0_34], %28 {strides = array<i32>} : memref<192x512xf32, #tpu.memory_space<vmem>>, vector<192x512xf32>,
    %c0_35 = arith.constant 0 : index
    %c0_36 = arith.constant 0 : index
    %30 = vector.load %arg5[%c0_35, %c0_36] : memref<8x192xf32, #tpu.memory_space<vmem>>, vector<8x192xf32>
    %c0_37 = arith.constant 0 : index
    %c0_38 = arith.constant 0 : index
    %31 = vector.load %arg19[%c0_37, %c0_38] : memref<192x512xf32, #tpu.memory_space<vmem>>, vector<192x512xf32>
    %cst_39 = arith.constant dense<0.000000e+00> : vector<8x512xf32>
    %32 = tpu.matmul %30, %31, %cst_39 {dimension_numbers = #tpu.dot_dimension_numbers<[1], [0], [0], [1], [0, 0, 1, 1], [], []>} : vector<8x192xf32>, vector<192x512xf32>, vector<8x512xf32> -> vector<8x512xf32>
    %c0_40 = arith.constant 0 : index
    %c0_41 = arith.constant 0 : index
    %33 = vector.load %arg4[%c0_40, %c0_41] : memref<512x128xf32, #tpu.memory_space<vmem>>, vector<512x128xf32>
    %cst_42 = arith.constant dense<0.000000e+00> : vector<8x128xf32>
    %34 = tpu.matmul %32, %33, %cst_42 {dimension_numbers = #tpu.dot_dimension_numbers<[1], [0], [0], [1], [0, 0, 1, 1], [], []>} : vector<8x512xf32>, vector<512x128xf32>, vector<8x128xf32> -> vector<8x128xf32>
    %c8_i32 = arith.constant 8 : i32
    %35 = arith.muli %arg0, %c8_i32 : i32
    %36 = tpu.assume_multiple %35, 8 : i32
    %37 = arith.index_cast %36 : i32 to index
    %c0_43 = arith.constant 0 : index
    %38 = vector.load %arg18[%37, %c0_43] : memref<8x128xf32, #tpu.memory_space<vmem>>, vector<8x128xf32>
    tpu.vector_store %arg18[%37, %c0_43], %34 {strides = array<i32>} : memref<8x128xf32, #tpu.memory_space<vmem>>, vector<8x128xf32>,
    %c0_i32 = arith.constant 0 : i32
    %39 = arith.cmpi eq, %arg0, %c0_i32 : i32
    %40 = arith.extui %39 : i1 to i32
    %c0_i32_44 = arith.constant 0 : i32
    %41 = arith.cmpi ne, %40, %c0_i32_44 : i32
    scf.if %41 {
      %c0_45 = arith.constant 0 : index
      %c0_46 = arith.constant 0 : index
      %42 = vector.load %arg18[%c0_45, %c0_46] : memref<8x128xf32, #tpu.memory_space<vmem>>, vector<8x128xf32>
      %c0_47 = arith.constant 0 : index
      %c0_48 = arith.constant 0 : index
      %43 = vector.load %arg6[%c0_47, %c0_48] : memref<128x256xf32, #tpu.memory_space<vmem>>, vector<128x256xf32>
      %cst_49 = arith.constant dense<0.000000e+00> : vector<8x256xf32>
      %44 = tpu.matmul %42, %43, %cst_49 {dimension_numbers = #tpu.dot_dimension_numbers<[1], [0], [0], [1], [0, 0, 1, 1], [], []>} : vector<8x128xf32>, vector<128x256xf32>, vector<8x256xf32> -> vector<8x256xf32>
      %c0_50 = arith.constant 0 : index
      %c0_51 = arith.constant 0 : index
      %45 = vector.load %arg7[%c0_50, %c0_51] : memref<1x256xf32, #tpu.memory_space<vmem>>, vector<1x256xf32>
      %46 = vector.broadcast %45 : vector<1x256xf32> to vector<8x256xf32>
      %47 = arith.addf %44, %46 : vector<8x256xf32>
      %cst_52 = arith.constant 0.000000e+00 : f32
      %48 = vector.broadcast %cst_52 : f32 to vector<8x256xf32>
      %49 = arith.maximumf %47, %48 : vector<8x256xf32>
      %c0_53 = arith.constant 0 : index
      %c0_54 = arith.constant 0 : index
      %50 = vector.load %arg8[%c0_53, %c0_54] : memref<256x128xf32, #tpu.memory_space<vmem>>, vector<256x128xf32>
      %cst_55 = arith.constant dense<0.000000e+00> : vector<8x128xf32>
      %51 = tpu.matmul %49, %50, %cst_55 {dimension_numbers = #tpu.dot_dimension_numbers<[1], [0], [0], [1], [0, 0, 1, 1], [], []>} : vector<8x256xf32>, vector<256x128xf32>, vector<8x128xf32> -> vector<8x128xf32>
      %c0_56 = arith.constant 0 : index
      %c0_57 = arith.constant 0 : index
      %52 = vector.load %arg9[%c0_56, %c0_57] : memref<1x128xf32, #tpu.memory_space<vmem>>, vector<1x128xf32>
      %53 = vector.broadcast %52 : vector<1x128xf32> to vector<8x128xf32>
      %54 = arith.addf %51, %53 : vector<8x128xf32>
      %55 = math.tanh %54 : vector<8x128xf32>
      %c0_58 = arith.constant 0 : index
      %c0_59 = arith.constant 0 : index
      %56 = vector.load %arg10[%c0_58, %c0_59] : memref<128x1xf32, #tpu.memory_space<vmem>>, vector<128x1xf32>
      %cst_60 = arith.constant dense<0.000000e+00> : vector<8x1xf32>
      %57 = tpu.matmul %55, %56, %cst_60 {dimension_numbers = #tpu.dot_dimension_numbers<[1], [0], [0], [1], [0, 0, 1, 1], [], []>} : vector<8x128xf32>, vector<128x1xf32>, vector<8x1xf32> -> vector<8x1xf32>
      %c0_61 = arith.constant 0 : index
      %c0_62 = arith.constant 0 : index
      %58 = vector.load %arg11[%c0_61, %c0_62] : memref<1x1xf32, #tpu.memory_space<vmem>>, vector<1x1xf32>
      %59 = vector.broadcast %58 : vector<1x1xf32> to vector<8x1xf32>
      %60 = arith.addf %57, %59 : vector<8x1xf32>
      %cst_63 = arith.constant dense<0xFF800000> : vector<1xf32>
      %61 = vector.multi_reduction <maximumf>, %60, %cst_63 [0] : vector<8x1xf32> to vector<1xf32>
      %62 = vector.shape_cast %61 : vector<1xf32> to vector<1x1xf32>
      %63 = vector.broadcast %62 : vector<1x1xf32> to vector<8x1xf32>
      %64 = arith.subf %60, %63 : vector<8x1xf32>
      %65 = math.exp %64 : vector<8x1xf32>
      %cst_64 = arith.constant dense<0.000000e+00> : vector<1xf32>
      %66 = vector.multi_reduction <add>, %65, %cst_64 [0] : vector<8x1xf32> to vector<1xf32>
      %67 = vector.shape_cast %66 : vector<1xf32> to vector<1x1xf32>
      %68 = vector.broadcast %67 : vector<1x1xf32> to vector<8x1xf32>
      %69 = arith.divf %65, %68 : vector<8x1xf32>
      %70 = vector.broadcast %69 : vector<8x1xf32> to vector<8x256xf32>
      %71 = arith.mulf %70, %49 : vector<8x256xf32>
      %cst_65 = arith.constant dense<0.000000e+00> : vector<256xf32>
      %72 = vector.multi_reduction <add>, %71, %cst_65 [0] : vector<8x256xf32> to vector<256xf32>
      %73 = vector.shape_cast %72 : vector<256xf32> to vector<1x256xf32>
      %c0_66 = arith.constant 0 : index
      %c0_67 = arith.constant 0 : index
      %74 = vector.load %arg12[%c0_66, %c0_67] : memref<256x64xf32, #tpu.memory_space<vmem>>, vector<256x64xf32>
      %cst_68 = arith.constant dense<0.000000e+00> : vector<1x64xf32>
      %75 = tpu.matmul %73, %74, %cst_68 {dimension_numbers = #tpu.dot_dimension_numbers<[1], [0], [0], [1], [0, 0, 1, 1], [], []>} : vector<1x256xf32>, vector<256x64xf32>, vector<1x64xf32> -> vector<1x64xf32>
      %c0_69 = arith.constant 0 : index
      %c0_70 = arith.constant 0 : index
      %76 = vector.load %arg13[%c0_69, %c0_70] : memref<1x64xf32, #tpu.memory_space<vmem>>, vector<1x64xf32>
      %77 = arith.addf %75, %76 : vector<1x64xf32>
      %cst_71 = arith.constant 0.000000e+00 : f32
      %78 = vector.broadcast %cst_71 : f32 to vector<1x64xf32>
      %79 = arith.maximumf %77, %78 : vector<1x64xf32>
      %c0_72 = arith.constant 0 : index
      %c0_73 = arith.constant 0 : index
      %80 = vector.load %arg14[%c0_72, %c0_73] : memref<64x2xf32, #tpu.memory_space<vmem>>, vector<64x2xf32>
      %cst_74 = arith.constant dense<0.000000e+00> : vector<1x2xf32>
      %81 = tpu.matmul %79, %80, %cst_74 {dimension_numbers = #tpu.dot_dimension_numbers<[1], [0], [0], [1], [0, 0, 1, 1], [], []>} : vector<1x64xf32>, vector<64x2xf32>, vector<1x2xf32> -> vector<1x2xf32>
      %c0_75 = arith.constant 0 : index
      %c0_76 = arith.constant 0 : index
      %82 = vector.load %arg15[%c0_75, %c0_76] : memref<1x2xf32, #tpu.memory_space<vmem>>, vector<1x2xf32>
      %83 = arith.addf %81, %82 : vector<1x2xf32>
      %c0_77 = arith.constant 0 : index
      %c0_78 = arith.constant 0 : index
      %84 = vector.load %arg16[%c0_77, %c0_78] : memref<1x2xf32, #tpu.memory_space<vmem>>, vector<1x2xf32>
      tpu.vector_store %arg16[%c0_77, %c0_78], %83 {strides = array<i32>} : memref<1x2xf32, #tpu.memory_space<vmem>>, vector<1x2xf32>,
      %c0_79 = arith.constant 0 : index
      %c0_80 = arith.constant 0 : index
      %85 = vector.load %arg17[%c0_79, %c0_80] : memref<8x1xf32, #tpu.memory_space<vmem>>, vector<8x1xf32>
      tpu.vector_store %arg17[%c0_79, %c0_80], %69 {strides = array<i32>} : memref<8x1xf32, #tpu.memory_space<vmem>>, vector<8x1xf32>,
    } else {
    }
    return
  }
  func.func @transform_0(%arg0: i32) -> (i32, i32) {
    %c0_i32 = arith.constant 0 : i32
    %c0_i32_0 = arith.constant 0 : i32
    return %arg0, %c0_i32 : i32, i32
  }
  func.func @transform_1(%arg0: i32) -> (i32, i32, i32) {
    %c0_i32 = arith.constant 0 : i32
    %c0_i32_0 = arith.constant 0 : i32
    %c0_i32_1 = arith.constant 0 : i32
    %c0_i32_2 = arith.constant 0 : i32
    return %c0_i32, %c0_i32_0, %c0_i32_1 : i32, i32, i32
  }
  func.func @transform_2(%arg0: i32) -> (i32, i32) {
    %c0_i32 = arith.constant 0 : i32
    %c0_i32_0 = arith.constant 0 : i32
    %c0_i32_1 = arith.constant 0 : i32
    return %c0_i32, %c0_i32_0 : i32, i32
  }
  func.func @transform_3(%arg0: i32) -> (i32, i32) {
    %c0_i32 = arith.constant 0 : i32
    %c0_i32_0 = arith.constant 0 : i32
    %c0_i32_1 = arith.constant 0 : i32
    return %c0_i32, %c0_i32_0 : i32, i32
  }
  func.func @transform_4(%arg0: i32) -> (i32, i32) {
    %c0_i32 = arith.constant 0 : i32
    %c0_i32_0 = arith.constant 0 : i32
    %c0_i32_1 = arith.constant 0 : i32
    return %c0_i32, %c0_i32_0 : i32, i32
  }
  func.func @transform_5(%arg0: i32) -> (i32, i32) {
    %c0_i32 = arith.constant 0 : i32
    %c0_i32_0 = arith.constant 0 : i32
    %c0_i32_1 = arith.constant 0 : i32
    return %c0_i32, %c0_i32_0 : i32, i32
  }
  func.func @transform_6(%arg0: i32) -> (i32, i32) {
    %c0_i32 = arith.constant 0 : i32
    %c0_i32_0 = arith.constant 0 : i32
    %c0_i32_1 = arith.constant 0 : i32
    return %c0_i32, %c0_i32_0 : i32, i32
  }
  func.func @transform_7(%arg0: i32) -> (i32, i32) {
    %c0_i32 = arith.constant 0 : i32
    %c0_i32_0 = arith.constant 0 : i32
    %c0_i32_1 = arith.constant 0 : i32
    return %c0_i32, %c0_i32_0 : i32, i32
  }
  func.func @transform_8(%arg0: i32) -> (i32, i32) {
    %c0_i32 = arith.constant 0 : i32
    %c0_i32_0 = arith.constant 0 : i32
    %c0_i32_1 = arith.constant 0 : i32
    return %c0_i32, %c0_i32_0 : i32, i32
  }
  func.func @transform_9(%arg0: i32) -> (i32, i32) {
    %c0_i32 = arith.constant 0 : i32
    %c0_i32_0 = arith.constant 0 : i32
    %c0_i32_1 = arith.constant 0 : i32
    return %c0_i32, %c0_i32_0 : i32, i32
  }
  func.func @transform_10(%arg0: i32) -> (i32, i32) {
    %c0_i32 = arith.constant 0 : i32
    %c0_i32_0 = arith.constant 0 : i32
    %c0_i32_1 = arith.constant 0 : i32
    return %c0_i32, %c0_i32_0 : i32, i32
  }
  func.func @transform_11(%arg0: i32) -> (i32, i32) {
    %c0_i32 = arith.constant 0 : i32
    %c0_i32_0 = arith.constant 0 : i32
    %c0_i32_1 = arith.constant 0 : i32
    return %c0_i32, %c0_i32_0 : i32, i32
  }
  func.func @transform_12(%arg0: i32) -> (i32, i32) {
    %c0_i32 = arith.constant 0 : i32
    %c0_i32_0 = arith.constant 0 : i32
    %c0_i32_1 = arith.constant 0 : i32
    return %c0_i32, %c0_i32_0 : i32, i32
  }
  func.func @transform_13(%arg0: i32) -> (i32, i32) {
    %c0_i32 = arith.constant 0 : i32
    %c0_i32_0 = arith.constant 0 : i32
    %c0_i32_1 = arith.constant 0 : i32
    return %c0_i32, %c0_i32_0 : i32, i32
  }
  func.func @transform_14(%arg0: i32) -> (i32, i32) {
    %c0_i32 = arith.constant 0 : i32
    %c0_i32_0 = arith.constant 0 : i32
    %c0_i32_1 = arith.constant 0 : i32
    return %c0_i32, %c0_i32_0 : i32, i32
  }
  func.func @transform_15(%arg0: i32) -> (i32, i32) {
    %c0_i32 = arith.constant 0 : i32
    %c0_i32_0 = arith.constant 0 : i32
    %c0_i32_1 = arith.constant 0 : i32
    return %c0_i32, %c0_i32_0 : i32, i32
  }
  func.func @transform_16(%arg0: i32) -> (i32, i32) {
    %c0_i32 = arith.constant 0 : i32
    %c0_i32_0 = arith.constant 0 : i32
    %c0_i32_1 = arith.constant 0 : i32
    return %c0_i32, %c0_i32_0 : i32, i32
  }
}

</mosaic_0001>

<bundles_post_ra>
// kernel: _lambda_.1
= control target key start
LH: loop header
LB: loop body
LE: loop exit
PB: predicated region body
PF: predicated region fallthrough
CT: control target
= control target key end

     0   :  { %s5919_s0 = inlined_call_operand.vmem [shape: f32[192,128], index: 0, kind: input, shape index: {}]   ;;  %s5920_s1 = inlined_call_operand.vmem [shape: f32[3,128,512], index: 1, kind: input, shape index: {}]   ;;  %s5921_s2 = inlined_call_operand.vmem [shape: f32[1,512], index: 2, kind: input, shape index: {}]   ;;  %s5922_s3 = inlined_call_operand.vmem [shape: f32[512,128], index: 3, kind: input, shape index: {}]   ;;  %s5923_s4 = inlined_call_operand.vmem [shape: f32[8,192], index: 4, kind: input, shape index: {}]   ;;  %s5924_s5 = inlined_call_operand.vmem [shape: f32[128,256], index: 5, kind: input, shape index: {}]   ;;  %s5925_s6 = inlined_call_operand.vmem [shape: f32[1,256], index: 6, kind: input, shape index: {}]   ;;  %s5926_s7 = inlined_call_operand.vmem [shape: f32[256,128], index: 7, kind: input, shape index: {}]   ;;  %s5927_s8 = inlined_call_operand.vmem [shape: f32[1,128], index: 8, kind: input, shape index: {}]   ;;  %s5928_s9 = inlined_call_operand.vmem [shape: f32[128,1], index: 9, kind: input, shape index: {}]   ;;  %s5929_s10 = inlined_call_operand.<no memory space> [shape: f32[1,1], index: 10, kind: input, shape index: {}]   ;;  %s5930_s11 = inlined_call_operand.vmem [shape: f32[256,64], index: 11, kind: input, shape index: {}]   ;;  %s5931_s12 = inlined_call_operand.vmem [shape: f32[1,64], index: 12, kind: input, shape index: {}]   ;;  %s5932_s13 = inlined_call_operand.vmem [shape: f32[64,2], index: 13, kind: input, shape index: {}]   ;;  %s5933_s14 = inlined_call_operand.vmem [shape: f32[1,2], index: 14, kind: input, shape index: {}]   ;;  %s5934_s15 = inlined_call_operand.hbm [shape: f32[1,2], index: 15, kind: output, shape index: {0}]   ;;  %s5935_s16 = inlined_call_operand.vmem [shape: f32[8,1], index: 16, kind: output, shape index: {1}]  }
   0x1   :  { %5937 = sst [smem:[#allocation176_spill]] %s5919_s0  ;;  %v22_v0 = vstv %s5929_s10 }
   0x2   :  { %23 = vst [vmem:[#allocation4] sm:$0x1] %v22_v0 }
   0x3   :  { %v139_v1 = vld [vmem:[%s5920_s1 + $0x1e0] sm:$0xff]  ;;  %v140_v2 = vld [vmem:[%s5920_s1 + $0x1e8] sm:$0xff]  ;;  %v141_v3 = vld [vmem:[%s5920_s1 + $0x1f0] sm:$0xff] }
   0x4   :  { %143 = vmatpush.msra.mxu0 %v139_v1  ;;  %232 = vmatpush.msra.mxu1 %v140_v2  ;;  %v142_v4 = vld [vmem:[%s5920_s1 + $0x1f8] sm:$0xff]  ;;  %v135_v5 = vld [vmem:[%s5920_s1 + $0x1c0] sm:$0xff]  ;;  %v136_v6 = vld [vmem:[%s5920_s1 + $0x1c8] sm:$0xff] }
   0x5   :  { %321 = vmatpush.msra.mxu2 %v141_v3  ;;  %410 = vmatpush.msra.mxu3 %v142_v4  ;;  %v137_v7 = vld [vmem:[%s5920_s1 + $0x1d0] sm:$0xff]  ;;  %v138_v8 = vld [vmem:[%s5920_s1 + $0x1d8] sm:$0xff]  ;;  %v131_v9 = vld [vmem:[%s5920_s1 + $0x1a0] sm:$0xff] }
   0x6   :  { %144 = vmatpush.msra.mxu0 %v135_v5  ;;  %233 = vmatpush.msra.mxu1 %v136_v6  ;;  %v132_v10 = vld [vmem:[%s5920_s1 + $0x1a8] sm:$0xff]  ;;  %v133_v11 = vld [vmem:[%s5920_s1 + $0x1b0] sm:$0xff]  ;;  %v134_v12 = vld [vmem:[%s5920_s1 + $0x1b8] sm:$0xff] }
   0x7   :  { %322 = vmatpush.msra.mxu2 %v137_v7  ;;  %411 = vmatpush.msra.mxu3 %v138_v8  ;;  %v127_v13 = vld [vmem:[%s5920_s1 + $0x180] sm:$0xff]  ;;  %v128_v14 = vld [vmem:[%s5920_s1 + $0x188] sm:$0xff]  ;;  %v129_v15 = vld [vmem:[%s5920_s1 + $0x190] sm:$0xff] }
   0x8   :  { %145 = vmatpush.msra.mxu0 %v131_v9  ;;  %234 = vmatpush.msra.mxu1 %v132_v10  ;;  %v130_v16 = vld [vmem:[%s5920_s1 + $0x198] sm:$0xff]  ;;  %v123_v17 = vld [vmem:[%s5920_s1 + $0x160] sm:$0xff]  ;;  %v124_v18 = vld [vmem:[%s5920_s1 + $0x168] sm:$0xff] }
   0x9   :  { %323 = vmatpush.msra.mxu2 %v133_v11  ;;  %412 = vmatpush.msra.mxu3 %v134_v12  ;;  %v125_v19 = vld [vmem:[%s5920_s1 + $0x170] sm:$0xff]  ;;  %v126_v20 = vld [vmem:[%s5920_s1 + $0x178] sm:$0xff]  ;;  %v119_v21 = vld [vmem:[%s5920_s1 + $0x140] sm:$0xff] }
   0xa   :  { %146 = vmatpush.msra.mxu0 %v127_v13  ;;  %235 = vmatpush.msra.mxu1 %v128_v14  ;;  %v120_v22 = vld [vmem:[%s5920_s1 + $0x148] sm:$0xff]  ;;  %v121_v23 = vld [vmem:[%s5920_s1 + $0x150] sm:$0xff]  ;;  %v122_v24 = vld [vmem:[%s5920_s1 + $0x158] sm:$0xff] }
   0xb   :  { %324 = vmatpush.msra.mxu2 %v129_v15  ;;  %413 = vmatpush.msra.mxu3 %v130_v16  ;;  %v115_v25 = vld [vmem:[%s5920_s1 + $0x120] sm:$0xff]  ;;  %v116_v26 = vld [vmem:[%s5920_s1 + $0x128] sm:$0xff]  ;;  %v117_v27 = vld [vmem:[%s5920_s1 + $0x130] sm:$0xff] }
   0xc   :  { %147 = vmatpush.msra.mxu0 %v123_v17  ;;  %236 = vmatpush.msra.mxu1 %v124_v18  ;;  %v118_v28 = vld [vmem:[%s5920_s1 + $0x138] sm:$0xff]  ;;  %v111_v29 = vld [vmem:[%s5920_s1 + $0x100] sm:$0xff]  ;;  %v112_v30 = vld [vmem:[%s5920_s1 + $0x108] sm:$0xff] }
   0xd   :  { %325 = vmatpush.msra.mxu2 %v125_v19  ;;  %414 = vmatpush.msra.mxu3 %v126_v20  ;;  %v113_v31 = vld [vmem:[%s5920_s1 + $0x110] sm:$0xff]  ;;  %v114_v32 = vld [vmem:[%s5920_s1 + $0x118] sm:$0xff]  ;;  %v107_v33 = vld [vmem:[%s5920_s1 + $0xe0] sm:$0xff] }
   0xe   :  { %148 = vmatpush.msra.mxu0 %v119_v21  ;;  %237 = vmatpush.msra.mxu1 %v120_v22  ;;  %v108_v34 = vld [vmem:[%s5920_s1 + $0xe8] sm:$0xff]  ;;  %v109_v35 = vld [vmem:[%s5920_s1 + $0xf0] sm:$0xff]  ;;  %v110_v36 = vld [vmem:[%s5920_s1 + $0xf8] sm:$0xff] }
   0xf   :  { %326 = vmatpush.msra.mxu2 %v121_v23  ;;  %415 = vmatpush.msra.mxu3 %v122_v24  ;;  %v103_v37 = vld [vmem:[%s5920_s1 + $0xc0] sm:$0xff]  ;;  %v104_v38 = vld [vmem:[%s5920_s1 + $0xc8] sm:$0xff]  ;;  %v105_v39 = vld [vmem:[%s5920_s1 + $0xd0] sm:$0xff] }
  0x10   :  { %149 = vmatpush.msra.mxu0 %v115_v25  ;;  %238 = vmatpush.msra.mxu1 %v116_v26  ;;  %v106_v40 = vld [vmem:[%s5920_s1 + $0xd8] sm:$0xff]  ;;  %v99_v41 = vld [vmem:[%s5920_s1 + $0xa0] sm:$0xff]  ;;  %v100_v42 = vld [vmem:[%s5920_s1 + $0xa8] sm:$0xff] }
  0x11   :  { %327 = vmatpush.msra.mxu2 %v117_v27  ;;  %416 = vmatpush.msra.mxu3 %v118_v28  ;;  %v101_v43 = vld [vmem:[%s5920_s1 + $0xb0] sm:$0xff]  ;;  %v102_v44 = vld [vmem:[%s5920_s1 + $0xb8] sm:$0xff]  ;;  %v95_v45 = vld [vmem:[%s5920_s1 + $0x80] sm:$0xff] }
  0x12   :  { %150 = vmatpush.msra.mxu0 %v111_v29  ;;  %239 = vmatpush.msra.mxu1 %v112_v30  ;;  %v96_v46 = vld [vmem:[%s5920_s1 + $0x88] sm:$0xff]  ;;  %v97_v47 = vld [vmem:[%s5920_s1 + $0x90] sm:$0xff]  ;;  %v98_v48 = vld [vmem:[%s5920_s1 + $0x98] sm:$0xff] }
  0x13   :  { %328 = vmatpush.msra.mxu2 %v113_v31  ;;  %417 = vmatpush.msra.mxu3 %v114_v32  ;;  %v91_v49 = vld [vmem:[%s5920_s1 + $0x60] sm:$0xff]  ;;  %v92_v50 = vld [vmem:[%s5920_s1 + $0x68] sm:$0xff]  ;;  %v93_v51 = vld [vmem:[%s5920_s1 + $0x70] sm:$0xff] }
  0x14   :  { %151 = vmatpush.msra.mxu0 %v107_v33  ;;  %240 = vmatpush.msra.mxu1 %v108_v34  ;;  %v94_v52 = vld [vmem:[%s5920_s1 + $0x78] sm:$0xff] }
  0x15   :  { %329 = vmatpush.msra.mxu2 %v109_v35  ;;  %418 = vmatpush.msra.mxu3 %v110_v36 }
  0x16   :  { %152 = vmatpush.msra.mxu0 %v103_v37  ;;  %241 = vmatpush.msra.mxu1 %v104_v38 }
  0x17   :  { %330 = vmatpush.msra.mxu2 %v105_v39  ;;  %419 = vmatpush.msra.mxu3 %v106_v40 }
  0x18   :  { %153 = vmatpush.msra.mxu0 %v99_v41  ;;  %242 = vmatpush.msra.mxu1 %v100_v42 }
  0x19   :  { %331 = vmatpush.msra.mxu2 %v101_v43  ;;  %420 = vmatpush.msra.mxu3 %v102_v44 }
  0x1a   :  { %154 = vmatpush.msra.mxu0 %v95_v45  ;;  %243 = vmatpush.msra.mxu1 %v96_v46 }
  0x1b   :  { %24 = vsyncpa [#allocation6], 0  ;;  %332 = vmatpush.msra.mxu2 %v97_v47  ;;  %421 = vmatpush.msra.mxu3 %v98_v48  ;;  %v87_v53 = vld [vmem:[%s5920_s1 + $0x40] sm:$0xff]  ;;  %v88_v54 = vld [vmem:[%s5920_s1 + $0x48] sm:$0xff]  ;;  %s5938_s25 = sld [smem:[#allocation176_spill]]  ;;  %vm719_vm0 = vcmask 1046528  }
  0x1c   :  { %155 = vmatpush.msra.mxu0 %v91_v49  ;;  %244 = vmatpush.msra.mxu1 %v92_v50  ;;  %v89_v55 = vld [vmem:[%s5920_s1 + $0x50] sm:$0xff]  ;;  %v90_v56 = vld [vmem:[%s5920_s1 + $0x58] sm:$0xff]  ;;  %v83_v57 = vld [vmem:[%s5920_s1 + $0x20] sm:$0xff]  ;;  %vm1458_vm1 = vcmask 1045504   ;;  %vm2565_vm2 = vcmask 523264   ;;  %vm3078_vm3 = vcmask 7168  }
  0x1d   :  { %333 = vmatpush.msra.mxu2 %v93_v51  ;;  %422 = vmatpush.msra.mxu3 %v94_v52  ;;  %v84_v58 = vld [vmem:[%s5920_s1 + $0x28] sm:$0xff]  ;;  %v85_v59 = vld [vmem:[%s5920_s1 + $0x30] sm:$0xff]  ;;  %v86_v60 = vld [vmem:[%s5920_s1 + $0x38] sm:$0xff]  ;;  %vm3236_vm8 = vcmask 8192  }
  0x1e   :  { %156 = vmatpush.msra.mxu0 %v87_v53  ;;  %245 = vmatpush.msra.mxu1 %v88_v54  ;;  %v79_v61 = vld [vmem:[%s5920_s1] sm:$0xff]  ;;  %v80_v62 = vld [vmem:[%s5920_s1 + $0x8] sm:$0xff]  ;;  %v81_v63 = vld [vmem:[%s5920_s1 + $0x10] sm:$0xff] }
  0x1f   :  { %334 = vmatpush.msra.mxu2 %v89_v55  ;;  %423 = vmatpush.msra.mxu3 %v90_v56  ;;  %v82_v0 = vld [vmem:[%s5920_s1 + $0x18] sm:$0xff]  ;;  %v3319_v20 = vld [vmem:[%s5920_s1 + $0x3e0] sm:$0xff]  ;;  %v3320_v21 = vld [vmem:[%s5920_s1 + $0x3e8] sm:$0xff] }
  0x20   :  { %157 = vmatpush.msra.mxu0 %v83_v57  ;;  %246 = vmatpush.msra.mxu1 %v84_v58  ;;  %v3321_v22 = vld [vmem:[%s5920_s1 + $0x3f0] sm:$0xff]  ;;  %v3322_v23 = vld [vmem:[%s5920_s1 + $0x3f8] sm:$0xff]  ;;  %v3315_v24 = vld [vmem:[%s5920_s1 + $0x3c0] sm:$0xff] }
  0x21   :  { %335 = vmatpush.msra.mxu2 %v85_v59  ;;  %424 = vmatpush.msra.mxu3 %v86_v60  ;;  %v55_v1 = vld [vmem:[%s5938_s25] sm:$0xff]  ;;  %v56_v2 = vld [vmem:[%s5938_s25 + $0x8] sm:$0xff]  ;;  %v57_v3 = vld [vmem:[%s5938_s25 + $0x10] sm:$0xff] }
  0x22   :  { %158 = vmatpush.msra.mxu0 %v79_v61  ;;  %247 = vmatpush.msra.mxu1 %v80_v62  ;;  %v58_v4 = vld [vmem:[%s5938_s25 + $0x18] sm:$0xff]  ;;  %v59_v5 = vld [vmem:[%s5938_s25 + $0x20] sm:$0xff]  ;;  %v60_v6 = vld [vmem:[%s5938_s25 + $0x28] sm:$0xff] }
  0x23   :  { %336 = vmatpush.msra.mxu2 %v81_v63  ;;  %425 = vmatpush.msra.mxu3 %v82_v0  ;;  %v61_v7 = vld [vmem:[%s5938_s25 + $0x30] sm:$0xff]  ;;  %v62_v8 = vld [vmem:[%s5938_s25 + $0x38] sm:$0xff]  ;;  %v63_v9 = vld [vmem:[%s5938_s25 + $0x40] sm:$0xff] }
  0x24   :  { %159 = vmatmul.f32.vlgmr.msra.gmra.mxu0 %v55_v1  ;;  %248 = vmatmul.f32.vlgmr.msra.gmra.mxu1 %v55_v1  ;;  %v64_v10 = vld [vmem:[%s5938_s25 + $0x48] sm:$0xff]  ;;  %v65_v11 = vld [vmem:[%s5938_s25 + $0x50] sm:$0xff]  ;;  %v66_v12 = vld [vmem:[%s5938_s25 + $0x58] sm:$0xff] }
  0x25   :  { %337 = vmatmul.f32.vlgmr.msra.gmra.mxu2 %v55_v1  ;;  %426 = vmatmul.f32.vlgmr.msra.gmra.mxu3 %v55_v1  ;;  %v67_v13 = vld [vmem:[%s5938_s25 + $0x60] sm:$0xff]  ;;  %v68_v14 = vld [vmem:[%s5938_s25 + $0x68] sm:$0xff]  ;;  %v69_v15 = vld [vmem:[%s5938_s25 + $0x70] sm:$0xff] }
  0x26   :  { %v70_v16 = vld [vmem:[%s5938_s25 + $0x78] sm:$0xff]  ;;  %v71_v19 = vld [vmem:[%s5938_s25 + $0x80] sm:$0xff]  ;;  %786 = vmatpush.msrb.mxu0 %v3319_v20  ;;  %875 = vmatpush.msrb.mxu1 %v3320_v21  ;;  %v3316_v25 = vld [vmem:[%s5920_s1 + $0x3c8] sm:$0xff] }
  0x27   :  { %964 = vmatpush.msrb.mxu2 %v3321_v22  ;;  %1053 = vmatpush.msrb.mxu3 %v3322_v23  ;;  %v3317_v26 = vld [vmem:[%s5920_s1 + $0x3d0] sm:$0xff]  ;;  %v72_v29 = vld [vmem:[%s5938_s25 + $0x88] sm:$0xff]  ;;  %v3318_v30 = vld [vmem:[%s5920_s1 + $0x3d8] sm:$0xff] }
  0x28   :  { %787 = vmatpush.msrb.mxu0 %v3315_v24  ;;  %876 = vmatpush.msrb.mxu1 %v3316_v25  ;;  %v3311_v33 = vld [vmem:[%s5920_s1 + $0x3a0] sm:$0xff]  ;;  %v3312_v34 = vld [vmem:[%s5920_s1 + $0x3a8] sm:$0xff]  ;;  %v3313_v35 = vld [vmem:[%s5920_s1 + $0x3b0] sm:$0xff] }
  0x29   :  { %965 = vmatpush.msrb.mxu2 %v3317_v26  ;;  %1054 = vmatpush.msrb.mxu3 %v3318_v30  ;;  %v3314_v36 = vld [vmem:[%s5920_s1 + $0x3b8] sm:$0xff]  ;;  %v3307_v37 = vld [vmem:[%s5920_s1 + $0x380] sm:$0xff]  ;;  %v3308_v38 = vld [vmem:[%s5920_s1 + $0x388] sm:$0xff] }
  0x2a   :  { %788 = vmatpush.msrb.mxu0 %v3311_v33  ;;  %877 = vmatpush.msrb.mxu1 %v3312_v34  ;;  %v3309_v39 = vld [vmem:[%s5920_s1 + $0x390] sm:$0xff]  ;;  %v3310_v40 = vld [vmem:[%s5920_s1 + $0x398] sm:$0xff]  ;;  %v3303_v41 = vld [vmem:[%s5920_s1 + $0x360] sm:$0xff] }
  0x2b   :  { %966 = vmatpush.msrb.mxu2 %v3313_v35  ;;  %1055 = vmatpush.msrb.mxu3 %v3314_v36  ;;  %v3304_v42 = vld [vmem:[%s5920_s1 + $0x368] sm:$0xff]  ;;  %v3305_v43 = vld [vmem:[%s5920_s1 + $0x370] sm:$0xff]  ;;  %v3306_v44 = vld [vmem:[%s5920_s1 + $0x378] sm:$0xff] }
  0x2c   :  { %162 = vmatmul.f32.gmra.mxu0 %v56_v2  ;;  %251 = vmatmul.f32.gmra.mxu1 %v56_v2  ;;  %v3299_v45 = vld [vmem:[%s5920_s1 + $0x340] sm:$0xff]  ;;  %v3300_v46 = vld [vmem:[%s5920_s1 + $0x348] sm:$0xff]  ;;  %v3301_v49 = vld [vmem:[%s5920_s1 + $0x350] sm:$0xff] }
  0x2d   :  { %340 = vmatmul.f32.gmra.mxu2 %v56_v2  ;;  %429 = vmatmul.f32.gmra.mxu3 %v56_v2  ;;  %v3302_v50 = vld [vmem:[%s5920_s1 + $0x358] sm:$0xff]  ;;  %v73_v53 = vld [vmem:[%s5938_s25 + $0x90] sm:$0xff]  ;;  %v3295_v54 = vld [vmem:[%s5920_s1 + $0x320] sm:$0xff] }
  0x2e   :  { %789 = vmatpush.msrb.mxu0 %v3307_v37  ;;  %878 = vmatpush.msrb.mxu1 %v3308_v38  ;;  %v3296_v55 = vld [vmem:[%s5920_s1 + $0x328] sm:$0xff]  ;;  %v3297_v56 = vld [vmem:[%s5920_s1 + $0x330] sm:$0xff]  ;;  %v3298_v57 = vld [vmem:[%s5920_s1 + $0x338] sm:$0xff] }
  0x2f   :  { %967 = vmatpush.msrb.mxu2 %v3309_v39  ;;  %1056 = vmatpush.msrb.mxu3 %v3310_v40  ;;  %v3291_v58 = vld [vmem:[%s5920_s1 + $0x300] sm:$0xff]  ;;  %v3292_v59 = vld [vmem:[%s5920_s1 + $0x308] sm:$0xff]  ;;  %v3293_v60 = vld [vmem:[%s5920_s1 + $0x310] sm:$0xff] }
  0x30   :  { %790 = vmatpush.msrb.mxu0 %v3303_v41  ;;  %879 = vmatpush.msrb.mxu1 %v3304_v42  ;;  %v3294_v61 = vld [vmem:[%s5920_s1 + $0x318] sm:$0xff]  ;;  %v3287_v62 = vld [vmem:[%s5920_s1 + $0x2e0] sm:$0xff]  ;;  %v3288_v63 = vld [vmem:[%s5920_s1 + $0x2e8] sm:$0xff] }
  0x31   :  { %968 = vmatpush.msrb.mxu2 %v3305_v43  ;;  %1057 = vmatpush.msrb.mxu3 %v3306_v44  ;;  %v3289_v2 = vld [vmem:[%s5920_s1 + $0x2f0] sm:$0xff]  ;;  %v3278_v22 = vld [vmem:[%s5920_s1 + $0x298] sm:$0xff]  ;;  %v75_v25 = vld [vmem:[%s5938_s25 + $0xa0] sm:$0xff] }
  0x32   :  { %791 = vmatpush.msrb.mxu0 %v3299_v45  ;;  %880 = vmatpush.msrb.mxu1 %v3300_v46  ;;  %v3277_v21 = vld [vmem:[%s5920_s1 + $0x290] sm:$0xff]  ;;  %v3271_v26 = vld [vmem:[%s5920_s1 + $0x260] sm:$0xff]  ;;  %v3274_v33 = vld [vmem:[%s5920_s1 + $0x278] sm:$0xff] }
  0x33   :  { %969 = vmatpush.msrb.mxu2 %v3301_v49  ;;  %1058 = vmatpush.msrb.mxu3 %v3302_v50  ;;  %v3273_v30 = vld [vmem:[%s5920_s1 + $0x270] sm:$0xff]  ;;  %v3267_v34 = vld [vmem:[%s5920_s1 + $0x240] sm:$0xff]  ;;  %v3268_v35 = vld [vmem:[%s5920_s1 + $0x248] sm:$0xff] }
  0x34   :  { %165 = vmatmul.f32.gmra.mxu0 %v57_v3  ;;  %254 = vmatmul.f32.gmra.mxu1 %v57_v3  ;;  %v3269_v36 = vld [vmem:[%s5920_s1 + $0x250] sm:$0xff]  ;;  %v3270_v37 = vld [vmem:[%s5920_s1 + $0x258] sm:$0xff]  ;;  %v3263_v38 = vld [vmem:[%s5920_s1 + $0x220] sm:$0xff] }
  0x35   :  { %343 = vmatmul.f32.gmra.mxu2 %v57_v3  ;;  %432 = vmatmul.f32.gmra.mxu3 %v57_v3  ;;  %v3290_v3 = vld [vmem:[%s5920_s1 + $0x2f8] sm:$0xff]  ;;  %v3264_v39 = vld [vmem:[%s5920_s1 + $0x228] sm:$0xff]  ;;  %v3265_v42 = vld [vmem:[%s5920_s1 + $0x230] sm:$0xff] }
  0x36   :  { %792 = vmatpush.msrb.mxu0 %v3295_v54  ;;  %881 = vmatpush.msrb.mxu1 %v3296_v55  ;;  %v3266_v43 = vld [vmem:[%s5920_s1 + $0x238] sm:$0xff]  ;;  %v76_v46 = vld [vmem:[%s5938_s25 + $0xa8] sm:$0xff]  ;;  %v3259_v49 = vld [vmem:[%s5920_s1 + $0x200] sm:$0xff] }
  0x37   :  { %970 = vmatpush.msrb.mxu2 %v3297_v56  ;;  %1059 = vmatpush.msrb.mxu3 %v3298_v57  ;;  %v3260_v50 = vld [vmem:[%s5920_s1 + $0x208] sm:$0xff]  ;;  %v3262_v54 = vld [vmem:[%s5920_s1 + $0x218] sm:$0xff] }
  0x38   :  { %793 = vmatpush.msrb.mxu0 %v3291_v58  ;;  %882 = vmatpush.msrb.mxu1 %v3292_v59  ;;  %v77_v59 = vld [vmem:[%s5938_s25 + $0xb0] sm:$0xff] }
  0x39   :  { %971 = vmatpush.msrb.mxu2 %v3293_v60  ;;  %1060 = vmatpush.msrb.mxu3 %v3294_v61 }
  0x3a   :  { %794 = vmatpush.msrb.mxu0 %v3287_v62  ;;  %883 = vmatpush.msrb.mxu1 %v3288_v63 }
  0x3b   :  { %972 = vmatpush.msrb.mxu2 %v3289_v2  ;;  %1061 = vmatpush.msrb.mxu3 %v3290_v3  ;;  %v78_v2 = vld [vmem:[%s5938_s25 + $0xb8] sm:$0xff] }
  0x3c   :  { %168 = vmatmul.f32.gmra.mxu0 %v58_v4  ;;  %257 = vmatmul.f32.gmra.mxu1 %v58_v4 }
  0x3d   :  { %346 = vmatmul.f32.gmra.mxu2 %v58_v4  ;;  %435 = vmatmul.f32.gmra.mxu3 %v58_v4 }
  0x44   :  { %171 = vmatmul.f32.gmra.mxu0 %v59_v5  ;;  %260 = vmatmul.f32.gmra.mxu1 %v59_v5 }
  0x45   :  { %349 = vmatmul.f32.gmra.mxu2 %v59_v5  ;;  %438 = vmatmul.f32.gmra.mxu3 %v59_v5 }
  0x4c   :  { %174 = vmatmul.f32.gmra.mxu0 %v60_v6  ;;  %263 = vmatmul.f32.gmra.mxu1 %v60_v6 }
  0x4d   :  { %352 = vmatmul.f32.gmra.mxu2 %v60_v6  ;;  %441 = vmatmul.f32.gmra.mxu3 %v60_v6  ;;  %v74_v6 = vld [vmem:[%s5938_s25 + $0x98] sm:$0xff] }
  0x54   :  { %177 = vmatmul.f32.gmra.mxu0 %v61_v7  ;;  %266 = vmatmul.f32.gmra.mxu1 %v61_v7 }
  0x55   :  { %355 = vmatmul.f32.gmra.mxu2 %v61_v7  ;;  %444 = vmatmul.f32.gmra.mxu3 %v61_v7  ;;  %v3283_v7 = vld [vmem:[%s5920_s1 + $0x2c0] sm:$0xff] }
  0x56   :  { %795 = vmatpush.msrb.mxu0 %v3283_v7 }
  0x5c   :  { %180 = vmatmul.f32.gmra.mxu0 %v62_v8  ;;  %269 = vmatmul.f32.gmra.mxu1 %v62_v8 }
  0x5d   :  { %358 = vmatmul.f32.gmra.mxu2 %v62_v8  ;;  %447 = vmatmul.f32.gmra.mxu3 %v62_v8  ;;  %v3284_v8 = vld [vmem:[%s5920_s1 + $0x2c8] sm:$0xff] }
  0x5e   :  { %884 = vmatpush.msrb.mxu1 %v3284_v8 }
  0x64   :  { %183 = vmatmul.f32.gmra.mxu0 %v63_v9  ;;  %272 = vmatmul.f32.gmra.mxu1 %v63_v9 }
  0x65   :  { %361 = vmatmul.f32.gmra.mxu2 %v63_v9  ;;  %450 = vmatmul.f32.gmra.mxu3 %v63_v9  ;;  %v3285_v9 = vld [vmem:[%s5920_s1 + $0x2d0] sm:$0xff] }
  0x66   :  { %973 = vmatpush.msrb.mxu2 %v3285_v9  ;;  %v691_v9 = vld [vmem:[%s5938_s25 + $0x1] sm:$0xff] }
  0x6c   :  { %186 = vmatmul.f32.gmra.mxu0 %v64_v10  ;;  %275 = vmatmul.f32.gmra.mxu1 %v64_v10 }
  0x6d   :  { %364 = vmatmul.f32.gmra.mxu2 %v64_v10  ;;  %453 = vmatmul.f32.gmra.mxu3 %v64_v10  ;;  %v3286_v10 = vld [vmem:[%s5920_s1 + $0x2d8] sm:$0xff] }
  0x6e   :  { %1062 = vmatpush.msrb.mxu3 %v3286_v10 }
  0x74   :  { %189 = vmatmul.f32.gmra.mxu0 %v65_v11  ;;  %278 = vmatmul.f32.gmra.mxu1 %v65_v11 }
  0x75   :  { %367 = vmatmul.f32.gmra.mxu2 %v65_v11  ;;  %456 = vmatmul.f32.gmra.mxu3 %v65_v11  ;;  %v3279_v11 = vld [vmem:[%s5920_s1 + $0x2a0] sm:$0xff] }
  0x76   :  { %796 = vmatpush.msrb.mxu0 %v3279_v11 }
  0x7c   :  { %192 = vmatmul.f32.gmra.mxu0 %v66_v12  ;;  %281 = vmatmul.f32.gmra.mxu1 %v66_v12 }
  0x7d   :  { %370 = vmatmul.f32.gmra.mxu2 %v66_v12  ;;  %459 = vmatmul.f32.gmra.mxu3 %v66_v12  ;;  %v3280_v12 = vld [vmem:[%s5920_s1 + $0x2a8] sm:$0xff] }
  0x7e   :  { %885 = vmatpush.msrb.mxu1 %v3280_v12 }
  0x84   :  { %195 = vmatmul.f32.gmra.mxu0 %v67_v13  ;;  %284 = vmatmul.f32.gmra.mxu1 %v67_v13 }
  0x85   :  { %373 = vmatmul.f32.gmra.mxu2 %v67_v13  ;;  %462 = vmatmul.f32.gmra.mxu3 %v67_v13  ;;  %v3281_v13 = vld [vmem:[%s5920_s1 + $0x2b0] sm:$0xff] }
  0x86   :  { %974 = vmatpush.msrb.mxu2 %v3281_v13 }
  0x88   :  { %975 = vmatpush.msrb.mxu2 %v3277_v21 }
  0x8a   :  { %976 = vmatpush.msrb.mxu2 %v3273_v30 }
  0x8c   :  { %198 = vmatmul.f32.gmra.mxu0 %v68_v14  ;;  %287 = vmatmul.f32.gmra.mxu1 %v68_v14 }
  0x8d   :  { %376 = vmatmul.f32.gmra.mxu2 %v68_v14  ;;  %465 = vmatmul.f32.gmra.mxu3 %v68_v14  ;;  %v3282_v14 = vld [vmem:[%s5920_s1 + $0x2b8] sm:$0xff] }
  0x8e   :  { %1063 = vmatpush.msrb.mxu3 %v3282_v14  ;;  %977 = vmatpush.msrb.mxu2 %v3269_v36  ;;  %v692_v14 = vld [vmem:[%s5938_s25 + $0x9] sm:$0xff] }
  0x90   :  { %1064 = vmatpush.msrb.mxu3 %v3278_v22  ;;  %978 = vmatpush.msrb.mxu2 %v3265_v42 }
  0x92   :  { %1065 = vmatpush.msrb.mxu3 %v3274_v33 }
  0x94   :  { %201 = vmatmul.f32.gmra.mxu0 %v69_v15  ;;  %290 = vmatmul.f32.gmra.mxu1 %v69_v15 }
  0x95   :  { %379 = vmatmul.f32.gmra.mxu2 %v69_v15  ;;  %468 = vmatmul.f32.gmra.mxu3 %v69_v15  ;;  %v3275_v15 = vld [vmem:[%s5920_s1 + $0x280] sm:$0xff] }
  0x96   :  { %797 = vmatpush.msrb.mxu0 %v3275_v15  ;;  %1066 = vmatpush.msrb.mxu3 %v3270_v37 }
  0x98   :  { %798 = vmatpush.msrb.mxu0 %v3271_v26  ;;  %1067 = vmatpush.msrb.mxu3 %v3266_v43 }
  0x9a   :  { %799 = vmatpush.msrb.mxu0 %v3267_v34  ;;  %1068 = vmatpush.msrb.mxu3 %v3262_v54  ;;  %v694_v34 = vld [vmem:[%s5938_s25 + $0x19] sm:$0xff] }
  0x9c   :  { %204 = vmatmul.f32.gmra.mxu0 %v70_v16  ;;  %293 = vmatmul.f32.gmra.mxu1 %v70_v16 }
  0x9d   :  { %382 = vmatmul.f32.gmra.mxu2 %v70_v16  ;;  %471 = vmatmul.f32.gmra.mxu3 %v70_v16  ;;  %v3276_v16 = vld [vmem:[%s5920_s1 + $0x288] sm:$0xff] }
  0x9e   :  { %886 = vmatpush.msrb.mxu1 %v3276_v16  ;;  %800 = vmatpush.msrb.mxu0 %v3263_v38 }
  0xa0   :  { %801 = vmatpush.msrb.mxu0 %v3259_v49 }
  0xa1   :  { %v3759_v17 = vpop.f32.mrf.mxu0  ;;  %v3761_v18 = vpop.f32.mrf.mxu1 }
  0xa4   :  { %207 = vmatmul.f32.gmra.mxu0 %v71_v19  ;;  %296 = vmatmul.f32.gmra.mxu1 %v71_v19 }
  0xa5   :  { %385 = vmatmul.f32.gmra.mxu2 %v71_v19  ;;  %474 = vmatmul.f32.gmra.mxu3 %v71_v19 }
  0xa8   :  { %v3787_v27 = vpop.f32.mrf.mxu2  ;;  %v3789_v28 = vpop.f32.mrf.mxu3 }
  0xa9   :  { %5939 = vst [vmem:[#allocation8_spill] sm:$0xff] %v3787_v27  ;;  %v3797_v31 = vpop.f32.mrf.mxu0  ;;  %v3799_v32 = vpop.f32.mrf.mxu1 }
  0xaa   :  { %5940 = vst [vmem:[#allocation9_spill] sm:$0xff] %v3789_v28 }
  0xac   :  { %210 = vmatmul.f32.gmra.mxu0 %v72_v29  ;;  %299 = vmatmul.f32.gmra.mxu1 %v72_v29 }
  0xad   :  { %388 = vmatmul.f32.gmra.mxu2 %v72_v29  ;;  %477 = vmatmul.f32.gmra.mxu3 %v72_v29  ;;  %v3272_v29 = vld [vmem:[%s5920_s1 + $0x268] sm:$0xff] }
  0xae   :  { %887 = vmatpush.msrb.mxu1 %v3272_v29 }
  0xb0   :  { %v3843_v47 = vpop.f32.mrf.mxu2  ;;  %v3845_v48 = vpop.f32.mrf.mxu3  ;;  %888 = vmatpush.msrb.mxu1 %v3268_v35 }
  0xb1   :  { %5941 = vst [vmem:[#allocation10_spill] sm:$0xff] %v3843_v47  ;;  %v3853_v51 = vpop.f32.mrf.mxu0  ;;  %v3855_v52 = vpop.f32.mrf.mxu1 }
  0xb2   :  { %5942 = vst [vmem:[#allocation11_spill] sm:$0xff] %v3845_v48  ;;  %889 = vmatpush.msrb.mxu1 %v3264_v39  ;;  %v695_v39 = vld [vmem:[%s5938_s25 + $0x21] sm:$0xff] }
  0xb3   :  { %5943 = vst [vmem:[#allocation12_spill] sm:$0xff] %v3853_v51 }
  0xb4   :  { %5944 = vst [vmem:[#allocation13_spill] sm:$0xff] %v3855_v52  ;;  %213 = vmatmul.f32.gmra.mxu0 %v73_v53  ;;  %302 = vmatmul.f32.gmra.mxu1 %v73_v53 }
  0xb5   :  { %391 = vmatmul.f32.gmra.mxu2 %v73_v53  ;;  %480 = vmatmul.f32.gmra.mxu3 %v73_v53  ;;  %v3261_v53 = vld [vmem:[%s5920_s1 + $0x210] sm:$0xff] }
  0xb6   :  { %890 = vmatpush.msrb.mxu1 %v3260_v50  ;;  %979 = vmatpush.msrb.mxu2 %v3261_v53  ;;  %v696_v50 = vld [vmem:[%s5938_s25 + $0x29] sm:$0xff] }
  0xb8   :  { %v3890_v0 = vpop.f32.mrf.mxu2  ;;  %v3892_v1 = vpop.f32.mrf.mxu3 }
  0xb9   :  { %5945 = vst [vmem:[#allocation14_spill] sm:$0xff] %v3890_v0  ;;  %v3900_v4 = vpop.f32.mrf.mxu0  ;;  %v3902_v5 = vpop.f32.mrf.mxu1 }
  0xba   :  { %5946 = vst [vmem:[#allocation15_spill] sm:$0xff] %v3892_v1 }
  0xbb   :  { %5947 = vst [vmem:[#allocation16_spill] sm:$0xff] %v3900_v4 }
  0xbc   :  { %5948 = vst [vmem:[#allocation17_spill] sm:$0xff] %v3902_v5  ;;  %216 = vmatmul.f32.gmra.mxu0 %v74_v6  ;;  %305 = vmatmul.f32.gmra.mxu1 %v74_v6 }
  0xbd   :  { %394 = vmatmul.f32.gmra.mxu2 %v74_v6  ;;  %483 = vmatmul.f32.gmra.mxu3 %v74_v6 }
  0xc0   :  { %v3937_v19 = vpop.f32.mrf.mxu2  ;;  %v3939_v20 = vpop.f32.mrf.mxu3 }
  0xc1   :  { %5949 = vst [vmem:[#allocation18_spill] sm:$0xff] %v3937_v19  ;;  %v3947_v23 = vpop.f32.mrf.mxu0  ;;  %v3949_v24 = vpop.f32.mrf.mxu1 }
  0xc2   :  { %5950 = vst [vmem:[#allocation19_spill] sm:$0xff] %v3939_v20 }
  0xc4   :  { %219 = vmatmul.f32.gmra.mxu0 %v75_v25  ;;  %308 = vmatmul.f32.gmra.mxu1 %v75_v25 }
  0xc5   :  { %397 = vmatmul.f32.gmra.mxu2 %v75_v25  ;;  %486 = vmatmul.f32.gmra.mxu3 %v75_v25  ;;  %v693_v25 = vld [vmem:[%s5938_s25 + $0x11] sm:$0xff] }
  0xc8   :  { %v3984_v40 = vpop.f32.mrf.mxu2  ;;  %v3986_v41 = vpop.f32.mrf.mxu3 }
  0xc9   :  { %5951 = vst [vmem:[#allocation20_spill] sm:$0xff] %v3984_v40  ;;  %v3994_v44 = vpop.f32.mrf.mxu0  ;;  %v3996_v45 = vpop.f32.mrf.mxu1 }
  0xca   :  { %5952 = vst [vmem:[#allocation21_spill] sm:$0xff] %v3986_v41  ;;  %v699_v41 = vld [vmem:[%s5938_s25 + $0x41] sm:$0xff] }
  0xcc   :  { %222 = vmatmul.f32.gmra.mxu0 %v76_v46  ;;  %311 = vmatmul.f32.gmra.mxu1 %v76_v46 }
  0xcd   :  { %400 = vmatmul.f32.gmra.mxu2 %v76_v46  ;;  %489 = vmatmul.f32.gmra.mxu3 %v76_v46 }
  0xd0   :  { %v4013_v55 = vpop.f32.mrf.mxu2  ;;  %v4015_v56 = vpop.f32.mrf.mxu3 }
  0xd1   :  { %v4017_v57 = vpop.f32.mrf.mxu0  ;;  %v4019_v58 = vpop.f32.mrf.mxu1 }
  0xd2   :  { %5953 = vst [vmem:[#allocation22_spill] sm:$0xff] %v4017_v57 }
  0xd3   :  { %5954 = vst [vmem:[#allocation23_spill] sm:$0xff] %v4019_v58  ;;  %v1431_v58 = vld [vmem:[%s5938_s25 + $0xa] sm:$0xff] }
  0xd4   :  { %225 = vmatmul.f32.gmra.mxu0 %v77_v59  ;;  %314 = vmatmul.f32.gmra.mxu1 %v77_v59 }
  0xd5   :  { %403 = vmatmul.f32.gmra.mxu2 %v77_v59  ;;  %492 = vmatmul.f32.gmra.mxu3 %v77_v59 }
  0xd8   :  { %v4024_v60 = vpop.f32.mrf.mxu2  ;;  %v4026_v61 = vpop.f32.mrf.mxu3 }
  0xd9   :  { %v4028_v62 = vpop.f32.mrf.mxu0  ;;  %v4030_v63 = vpop.f32.mrf.mxu1 }
  0xda   :  { %5955 = vst [vmem:[#allocation24_spill] sm:$0xff] %v4028_v62 }
  0xdb   :  { %5956 = vst [vmem:[#allocation25_spill] sm:$0xff] %v4030_v63  ;;  %v1432_v63 = vld [vmem:[%s5938_s25 + $0x12] sm:$0xff] }
  0xdc   :  { %228 = vmatmul.f32.gmra.mxu0 %v78_v2  ;;  %317 = vmatmul.f32.gmra.mxu1 %v78_v2 }
  0xdd   :  { %406 = vmatmul.f32.gmra.mxu2 %v78_v2  ;;  %495 = vmatmul.f32.gmra.mxu3 %v78_v2 }
  0xe0   :  { %v4035_v3 = vpop.f32.mrf.mxu2  ;;  %v4037_v6 = vpop.f32.mrf.mxu3 }
  0xe1   :  { %v4039_v7 = vpop.f32.mrf.mxu0  ;;  %v4041_v8 = vpop.f32.mrf.mxu1 }
  0xe2   :  { %5957 = vst [vmem:[#allocation26_spill] sm:$0xff] %v4039_v7 }
  0xe3   :  { %5958 = vst [vmem:[#allocation27_spill] sm:$0xff] %v4041_v8  ;;  %v1433_v8 = vld [vmem:[%s5938_s25 + $0x1a] sm:$0xff] }
  0xe4   :  { %802 = vmatmul.f32.vlgmr.msrb.gmra.mxu0 %v691_v9  ;;  %891 = vmatmul.f32.vlgmr.msrb.gmra.mxu1 %v691_v9 }
  0xe5   :  { %980 = vmatmul.f32.vlgmr.msrb.gmra.mxu2 %v691_v9  ;;  %1069 = vmatmul.f32.vlgmr.msrb.gmra.mxu3 %v691_v9  ;;  %v697_v9 = vld [vmem:[%s5938_s25 + $0x31] sm:$0xff] }
  0xe8   :  { %v4046_v10 = vpop.f32.mrf.mxu2  ;;  %v4048_v11 = vpop.f32.mrf.mxu3 }
  0xe9   :  { %v4050_v12 = vpop.f32.mrf.mxu0  ;;  %v4052_v13 = vpop.f32.mrf.mxu1 }
  0xea   :  { %5959 = vst [vmem:[#allocation28_spill] sm:$0xff] %v4050_v12 }
  0xeb   :  { %5960 = vst [vmem:[#allocation29_spill] sm:$0xff] %v4052_v13  ;;  %v1434_v13 = vld [vmem:[%s5938_s25 + $0x22] sm:$0xff] }
  0xec   :  { %805 = vmatmul.f32.gmra.mxu0 %v692_v14  ;;  %894 = vmatmul.f32.gmra.mxu1 %v692_v14 }
  0xed   :  { %983 = vmatmul.f32.gmra.mxu2 %v692_v14  ;;  %1072 = vmatmul.f32.gmra.mxu3 %v692_v14 }
  0xf0   :  { %v4057_v15 = vpop.f32.mrf.mxu2  ;;  %v4059_v16 = vpop.f32.mrf.mxu3 }
  0xf1   :  { %v4061_v21 = vpop.f32.mrf.mxu0  ;;  %v4063_v22 = vpop.f32.mrf.mxu1 }
  0xf2   :  { %5961 = vst [vmem:[#allocation30_spill] sm:$0xff] %v4061_v21 }
  0xf3   :  { %5962 = vst [vmem:[#allocation31_spill] sm:$0xff] %v4063_v22 }
  0xf4   :  { %808 = vmatmul.f32.gmra.mxu0 %v693_v25  ;;  %897 = vmatmul.f32.gmra.mxu1 %v693_v25 }
  0xf5   :  { %986 = vmatmul.f32.gmra.mxu2 %v693_v25  ;;  %1075 = vmatmul.f32.gmra.mxu3 %v693_v25 }
  0xf8   :  { %v4068_v26 = vpop.f32.mrf.mxu2  ;;  %v4070_v29 = vpop.f32.mrf.mxu3 }
  0xf9   :  { %v4072_v30 = vpop.f32.mrf.mxu0  ;;  %v4074_v33 = vpop.f32.mrf.mxu1 }
  0xfa   :  { %5963 = vst [vmem:[#allocation32_spill] sm:$0xff] %v4072_v30 }
  0xfb   :  { %5964 = vst [vmem:[#allocation33_spill] sm:$0xff] %v4074_v33 }
  0xfc   :  { %811 = vmatmul.f32.gmra.mxu0 %v694_v34  ;;  %900 = vmatmul.f32.gmra.mxu1 %v694_v34 }
  0xfd   :  { %989 = vmatmul.f32.gmra.mxu2 %v694_v34  ;;  %1078 = vmatmul.f32.gmra.mxu3 %v694_v34 }
 0x100   :  { %v4079_v35 = vpop.f32.mrf.mxu2  ;;  %v4081_v36 = vpop.f32.mrf.mxu3 }
 0x101   :  { %5965 = vst [vmem:[#allocation34_spill] sm:$0xff] %v4079_v35  ;;  %v4083_v37 = vpop.f32.mrf.mxu0  ;;  %v4085_v38 = vpop.f32.mrf.mxu1 }
 0x102   :  { %5966 = vst [vmem:[#allocation35_spill] sm:$0xff] %v4081_v36  ;;  %v3381_v36 = vld [vmem:[%s5920_s1 + $0x5d0] sm:$0xff] }
 0x104   :  { %814 = vmatmul.f32.gmra.mxu0 %v695_v39  ;;  %903 = vmatmul.f32.gmra.mxu1 %v695_v39 }
 0x105   :  { %992 = vmatmul.f32.gmra.mxu2 %v695_v39  ;;  %1081 = vmatmul.f32.gmra.mxu3 %v695_v39 }
 0x108   :  { %v4090_v42 = vpop.f32.mrf.mxu2  ;;  %v4092_v43 = vpop.f32.mrf.mxu3 }
 0x109   :  { %5967 = vst [vmem:[#allocation36_spill] sm:$0xff] %v4090_v42  ;;  %v4094_v46 = vpop.f32.mrf.mxu0  ;;  %v4096_v49 = vpop.f32.mrf.mxu1 }
 0x10a   :  { %5968 = vst [vmem:[#allocation37_spill] sm:$0xff] %v4092_v43  ;;  %v3353_v43 = vld [vmem:[%s5920_s1 + $0x4f0] sm:$0xff] }
 0x10c   :  { %817 = vmatmul.f32.gmra.mxu0 %v696_v50  ;;  %906 = vmatmul.f32.gmra.mxu1 %v696_v50 }
 0x10d   :  { %995 = vmatmul.f32.gmra.mxu2 %v696_v50  ;;  %1084 = vmatmul.f32.gmra.mxu3 %v696_v50  ;;  %v698_v50 = vld [vmem:[%s5938_s25 + $0x39] sm:$0xff] }
 0x110   :  { %v4101_v53 = vpop.f32.mrf.mxu2  ;;  %v4103_v54 = vpop.f32.mrf.mxu3 }
 0x111   :  { %5969 = vst [vmem:[#allocation38_spill] sm:$0xff] %v4101_v53  ;;  %v4105_v59 = vpop.f32.mrf.mxu0  ;;  %v4107_v2 = vpop.f32.mrf.mxu1 }
 0x112   :  { %5970 = vst [vmem:[#allocation39_spill] sm:$0xff] %v4103_v54  ;;  %v3365_v54 = vld [vmem:[%s5920_s1 + $0x550] sm:$0xff] }
 0x114   :  { %820 = vmatmul.f32.gmra.mxu0 %v697_v9  ;;  %909 = vmatmul.f32.gmra.mxu1 %v697_v9 }
 0x115   :  { %998 = vmatmul.f32.gmra.mxu2 %v697_v9  ;;  %1087 = vmatmul.f32.gmra.mxu3 %v697_v9 }
 0x118   :  { %v4112_v14 = vpop.f32.mrf.mxu2  ;;  %v4114_v25 = vpop.f32.mrf.mxu3 }
 0x119   :  { %5971 = vst [vmem:[#allocation40_spill] sm:$0xff] %v4112_v14  ;;  %v4116_v34 = vpop.f32.mrf.mxu0  ;;  %v4118_v39 = vpop.f32.mrf.mxu1  ;;  %v3369_v14 = vld [vmem:[%s5920_s1 + $0x570] sm:$0xff] }
 0x11a   :  { %5972 = vst [vmem:[#allocation41_spill] sm:$0xff] %v4114_v25 }
 0x11c   :  { %823 = vmatmul.f32.gmra.mxu0 %v698_v50  ;;  %912 = vmatmul.f32.gmra.mxu1 %v698_v50 }
 0x11d   :  { %1001 = vmatmul.f32.gmra.mxu2 %v698_v50  ;;  %1090 = vmatmul.f32.gmra.mxu3 %v698_v50 }
 0x120   :  { %v4123_v1 = vpop.f32.mrf.mxu2  ;;  %v4125_v20 = vpop.f32.mrf.mxu3 }
 0x121   :  { %5973 = vst [vmem:[#allocation42_spill] sm:$0xff] %v4123_v1  ;;  %v4127_v9 = vpop.f32.mrf.mxu0  ;;  %v4129_v19 = vpop.f32.mrf.mxu1  ;;  %v3364_v1 = vld [vmem:[%s5920_s1 + $0x548] sm:$0xff] }
 0x122   :  { %5974 = vst [vmem:[#allocation43_spill] sm:$0xff] %v4125_v20  ;;  %v3370_v20 = vld [vmem:[%s5920_s1 + $0x578] sm:$0xff] }
 0x123   :  { %5975 = vst [vmem:[#allocation44_spill] sm:$0xff] %v4127_v9 }
 0x124   :  { %5976 = vst [vmem:[#allocation45_spill] sm:$0xff] %v4129_v19  ;;  %826 = vmatmul.f32.gmra.mxu0 %v699_v41  ;;  %915 = vmatmul.f32.gmra.mxu1 %v699_v41  ;;  %v700_v19 = vld [vmem:[%s5938_s25 + $0x49] sm:$0xff] }
 0x125   :  { %1004 = vmatmul.f32.gmra.mxu2 %v699_v41  ;;  %1093 = vmatmul.f32.gmra.mxu3 %v699_v41 }
 0x128   :  { %v4134_v40 = vpop.f32.mrf.mxu2  ;;  %v4136_v0 = vpop.f32.mrf.mxu3 }
 0x129   :  { %5977 = vst [vmem:[#allocation46_spill] sm:$0xff] %v4134_v40  ;;  %v4138_v50 = vpop.f32.mrf.mxu0  ;;  %v4140_v48 = vpop.f32.mrf.mxu1  ;;  %v1430_v40 = vld [vmem:[%s5938_s25 + $0x2] sm:$0xff] }
 0x12a   :  { %5978 = vst [vmem:[#allocation47_spill] sm:$0xff] %v4136_v0 }
 0x12b   :  { %5979 = vst [vmem:[#allocation48_spill] sm:$0xff] %v4138_v50 }
 0x12c   :  { %5980 = vst [vmem:[#allocation49_spill] sm:$0xff] %v4140_v48  ;;  %829 = vmatmul.f32.gmra.mxu0 %v700_v19  ;;  %918 = vmatmul.f32.gmra.mxu1 %v700_v19  ;;  %v701_v48 = vld [vmem:[%s5938_s25 + $0x51] sm:$0xff] }
 0x12d   :  { %1007 = vmatmul.f32.gmra.mxu2 %v700_v19  ;;  %1096 = vmatmul.f32.gmra.mxu3 %v700_v19 }
 0x130   :  { %v4145_v9 = vpop.f32.mrf.mxu2  ;;  %v4147_v47 = vpop.f32.mrf.mxu3 }
 0x131   :  { %5981 = vst [vmem:[#allocation50_spill] sm:$0xff] %v4145_v9  ;;  %v4149_v41 = vpop.f32.mrf.mxu0  ;;  %v4151_v28 = vpop.f32.mrf.mxu1 }
 0x132   :  { %5982 = vst [vmem:[#allocation51_spill] sm:$0xff] %v4147_v47  ;;  %v702_v47 = vld [vmem:[%s5938_s25 + $0x59] sm:$0xff] }
 0x133   :  { %5983 = vst [vmem:[#allocation52_spill] sm:$0xff] %v4149_v41 }
 0x134   :  { %5984 = vst [vmem:[#allocation53_spill] sm:$0xff] %v4151_v28  ;;  %832 = vmatmul.f32.gmra.mxu0 %v701_v48  ;;  %921 = vmatmul.f32.gmra.mxu1 %v701_v48 }
 0x135   :  { %1010 = vmatmul.f32.gmra.mxu2 %v701_v48  ;;  %1099 = vmatmul.f32.gmra.mxu3 %v701_v48 }
 0x138   :  { %v4156_v50 = vpop.f32.mrf.mxu2  ;;  %v4158_v27 = vpop.f32.mrf.mxu3 }
 0x139   :  { %5985 = vst [vmem:[#allocation54_spill] sm:$0xff] %v4156_v50  ;;  %v4160_v19 = vpop.f32.mrf.mxu0  ;;  %v4162_v9 = vpop.f32.mrf.mxu1 }
 0x13a   :  { %5986 = vst [vmem:[#allocation55_spill] sm:$0xff] %v4158_v27  ;;  %v703_v27 = vld [vmem:[%s5938_s25 + $0x61] sm:$0xff] }
 0x13b   :  { %5987 = vst [vmem:[#allocation56_spill] sm:$0xff] %v4160_v19 }
 0x13c   :  { %5988 = vst [vmem:[#allocation57_spill] sm:$0xff] %v4162_v9  ;;  %835 = vmatmul.f32.gmra.mxu0 %v702_v47  ;;  %924 = vmatmul.f32.gmra.mxu1 %v702_v47 }
 0x13d   :  { %1013 = vmatmul.f32.gmra.mxu2 %v702_v47  ;;  %1102 = vmatmul.f32.gmra.mxu3 %v702_v47 }
 0x140   :  { %v4167_v28 = vpop.f32.mrf.mxu2  ;;  %v4169_v41 = vpop.f32.mrf.mxu3 }
 0x141   :  { %5989 = vst [vmem:[#allocation58_spill] sm:$0xff] %v4167_v28  ;;  %v4171_v48 = vpop.f32.mrf.mxu0  ;;  %v4173_v50 = vpop.f32.mrf.mxu1 }
 0x142   :  { %5990 = vst [vmem:[#allocation59_spill] sm:$0xff] %v4169_v41  ;;  %v704_v41 = vld [vmem:[%s5938_s25 + $0x69] sm:$0xff] }
 0x143   :  { %5991 = vst [vmem:[#allocation60_spill] sm:$0xff] %v4171_v48 }
 0x144   :  { %5992 = vst [vmem:[#allocation61_spill] sm:$0xff] %v4173_v50  ;;  %838 = vmatmul.f32.gmra.mxu0 %v703_v27  ;;  %927 = vmatmul.f32.gmra.mxu1 %v703_v27 }
 0x145   :  { %1016 = vmatmul.f32.gmra.mxu2 %v703_v27  ;;  %1105 = vmatmul.f32.gmra.mxu3 %v703_v27 }
 0x148   :  { %v4178_v9 = vpop.f32.mrf.mxu2  ;;  %v4180_v19 = vpop.f32.mrf.mxu3 }
 0x149   :  { %5993 = vst [vmem:[#allocation62_spill] sm:$0xff] %v4178_v9  ;;  %v4182_v47 = vpop.f32.mrf.mxu0  ;;  %v4184_v28 = vpop.f32.mrf.mxu1 }
 0x14a   :  { %5994 = vst [vmem:[#allocation63_spill] sm:$0xff] %v4180_v19  ;;  %v705_v19 = vld [vmem:[%s5938_s25 + $0x71] sm:$0xff] }
 0x14b   :  { %5995 = vst [vmem:[#allocation64_spill] sm:$0xff] %v4182_v47 }
 0x14c   :  { %5996 = vst [vmem:[#allocation65_spill] sm:$0xff] %v4184_v28  ;;  %841 = vmatmul.f32.gmra.mxu0 %v704_v41  ;;  %930 = vmatmul.f32.gmra.mxu1 %v704_v41 }
 0x14d   :  { %1019 = vmatmul.f32.gmra.mxu2 %v704_v41  ;;  %1108 = vmatmul.f32.gmra.mxu3 %v704_v41 }
 0x150   :  { %v4189_v50 = vpop.f32.mrf.mxu2  ;;  %v4191_v48 = vpop.f32.mrf.mxu3 }
 0x151   :  { %5997 = vst [vmem:[#allocation66_spill] sm:$0xff] %v4189_v50  ;;  %v4193_v27 = vpop.f32.mrf.mxu0  ;;  %v4195_v9 = vpop.f32.mrf.mxu1 }
 0x152   :  { %5998 = vst [vmem:[#allocation67_spill] sm:$0xff] %v4191_v48  ;;  %v706_v48 = vld [vmem:[%s5938_s25 + $0x79] sm:$0xff] }
 0x153   :  { %5999 = vst [vmem:[#allocation68_spill] sm:$0xff] %v4193_v27 }
 0x154   :  { %6000 = vst [vmem:[#allocation69_spill] sm:$0xff] %v4195_v9  ;;  %844 = vmatmul.f32.gmra.mxu0 %v705_v19  ;;  %933 = vmatmul.f32.gmra.mxu1 %v705_v19 }
 0x155   :  { %1022 = vmatmul.f32.gmra.mxu2 %v705_v19  ;;  %1111 = vmatmul.f32.gmra.mxu3 %v705_v19 }
 0x158   :  { %v4200_v28 = vpop.f32.mrf.mxu2  ;;  %v4202_v47 = vpop.f32.mrf.mxu3 }
 0x159   :  { %6001 = vst [vmem:[#allocation70_spill] sm:$0xff] %v4200_v28  ;;  %v4204_v41 = vpop.f32.mrf.mxu0  ;;  %v4206_v50 = vpop.f32.mrf.mxu1 }
 0x15a   :  { %6002 = vst [vmem:[#allocation71_spill] sm:$0xff] %v4202_v47  ;;  %v707_v47 = vld [vmem:[%s5938_s25 + $0x81] sm:$0xff] }
 0x15b   :  { %6003 = vst [vmem:[#allocation72_spill] sm:$0xff] %v4204_v41  ;;  %v3380_v41 = vld [vmem:[%s5920_s1 + $0x5c8] sm:$0xff] }
 0x15c   :  { %6004 = vst [vmem:[#allocation73_spill] sm:$0xff] %v4206_v50  ;;  %847 = vmatmul.f32.gmra.mxu0 %v706_v48  ;;  %936 = vmatmul.f32.gmra.mxu1 %v706_v48  ;;  %v3386_v50 = vld [vmem:[%s5920_s1 + $0x5f8] sm:$0xff] }
 0x15d   :  { %1025 = vmatmul.f32.gmra.mxu2 %v706_v48  ;;  %1114 = vmatmul.f32.gmra.mxu3 %v706_v48  ;;  %v3383_v48 = vld [vmem:[%s5920_s1 + $0x5e0] sm:$0xff] }
 0x15e   :  { %1525 = vmatpush.msra.mxu0 %v3383_v48  ;;  %1792 = vmatpush.msra.mxu3 %v3386_v50  ;;  %v3382_v50 = vld [vmem:[%s5920_s1 + $0x5d8] sm:$0xff] }
 0x160   :  { %v4211_v9 = vpop.f32.mrf.mxu2  ;;  %v4213_v27 = vpop.f32.mrf.mxu3  ;;  %1793 = vmatpush.msra.mxu3 %v3382_v50  ;;  %v3372_v50 = vld [vmem:[%s5920_s1 + $0x588] sm:$0xff] }
 0x161   :  { %6005 = vst [vmem:[#allocation74_spill] sm:$0xff] %v4211_v9  ;;  %v4215_v19 = vpop.f32.mrf.mxu0  ;;  %v4217_v28 = vpop.f32.mrf.mxu1  ;;  %v3385_v9 = vld [vmem:[%s5920_s1 + $0x5f0] sm:$0xff] }
 0x162   :  { %6006 = vst [vmem:[#allocation75_spill] sm:$0xff] %v4213_v27  ;;  %v3384_v27 = vld [vmem:[%s5920_s1 + $0x5e8] sm:$0xff]  ;;  %1703 = vmatpush.msra.mxu2 %v3385_v9 }
 0x163   :  { %1614 = vmatpush.msra.mxu1 %v3384_v27  ;;  %v708_v9 = vld [vmem:[%s5938_s25 + $0x89] sm:$0xff] }
 0x164   :  { %850 = vmatmul.f32.gmra.mxu0 %v707_v47  ;;  %939 = vmatmul.f32.gmra.mxu1 %v707_v47 }
 0x165   :  { %1028 = vmatmul.f32.gmra.mxu2 %v707_v47  ;;  %1117 = vmatmul.f32.gmra.mxu3 %v707_v47  ;;  %v3379_v47 = vld [vmem:[%s5920_s1 + $0x5c0] sm:$0xff] }
 0x166   :  { %1526 = vmatpush.msra.mxu0 %v3379_v47  ;;  %1615 = vmatpush.msra.mxu1 %v3380_v41  ;;  %v3377_v41 = vld [vmem:[%s5920_s1 + $0x5b0] sm:$0xff]  ;;  %v3378_v47 = vld [vmem:[%s5920_s1 + $0x5b8] sm:$0xff] }
 0x167   :  { %1704 = vmatpush.msra.mxu2 %v3381_v36  ;;  %1794 = vmatpush.msra.mxu3 %v3378_v47  ;;  %v3371_v36 = vld [vmem:[%s5920_s1 + $0x580] sm:$0xff]  ;;  %v3368_v47 = vld [vmem:[%s5920_s1 + $0x568] sm:$0xff] }
 0x168   :  { %v4243_v48 = vpop.f32.mrf.mxu2  ;;  %v4245_v27 = vpop.f32.mrf.mxu3 }
 0x169   :  { %6007 = vst [vmem:[#allocation76_spill] sm:$0xff] %v4243_v48  ;;  %v4253_v35 = vpop.f32.mrf.mxu0  ;;  %v4255_v25 = vpop.f32.mrf.mxu1  ;;  %v3376_v48 = vld [vmem:[%s5920_s1 + $0x5a8] sm:$0xff]  ;;  %1705 = vmatpush.msra.mxu2 %v3377_v41  ;;  %v3367_v41 = vld [vmem:[%s5920_s1 + $0x560] sm:$0xff] }
 0x16a   :  { %6008 = vst [vmem:[#allocation77_spill] sm:$0xff] %v4245_v27  ;;  %v3375_v27 = vld [vmem:[%s5920_s1 + $0x5a0] sm:$0xff]  ;;  %1616 = vmatpush.msra.mxu1 %v3376_v48  ;;  %v3373_v48 = vld [vmem:[%s5920_s1 + $0x590] sm:$0xff] }
 0x16b   :  { %1527 = vmatpush.msra.mxu0 %v3375_v27  ;;  %v3374_v27 = vld [vmem:[%s5920_s1 + $0x598] sm:$0xff]  ;;  %1706 = vmatpush.msra.mxu2 %v3373_v48 }
 0x16c   :  { %853 = vmatmul.f32.gmra.mxu0 %v708_v9  ;;  %942 = vmatmul.f32.gmra.mxu1 %v708_v9  ;;  %v3366_v48 = vld [vmem:[%s5920_s1 + $0x558] sm:$0xff] }
 0x16d   :  { %1031 = vmatmul.f32.gmra.mxu2 %v708_v9  ;;  %1120 = vmatmul.f32.gmra.mxu3 %v708_v9  ;;  %v3363_v9 = vld [vmem:[%s5920_s1 + $0x540] sm:$0xff] }
 0x16e   :  { %1528 = vmatpush.msra.mxu0 %v3371_v36  ;;  %1617 = vmatpush.msra.mxu1 %v3372_v50 }
 0x16f   :  { %1795 = vmatpush.msra.mxu3 %v3374_v27  ;;  %1707 = vmatpush.msra.mxu2 %v3369_v14  ;;  %v3357_v14 = vld [vmem:[%s5920_s1 + $0x510] sm:$0xff] }
 0x170   :  { %v4299_v36 = vpop.f32.mrf.mxu2  ;;  %v4301_v50 = vpop.f32.mrf.mxu3  ;;  %1529 = vmatpush.msra.mxu0 %v3367_v41  ;;  %1618 = vmatpush.msra.mxu1 %v3368_v47  ;;  %v3359_v41 = vld [vmem:[%s5920_s1 + $0x520] sm:$0xff]  ;;  %v3360_v47 = vld [vmem:[%s5920_s1 + $0x528] sm:$0xff] }
 0x171   :  { %6009 = vst [vmem:[#allocation78_spill] sm:$0xff] %v4299_v36  ;;  %v4309_v27 = vpop.f32.mrf.mxu0  ;;  %v4311_v53 = vpop.f32.mrf.mxu1  ;;  %v709_v36 = vld [vmem:[%s5938_s25 + $0x91] sm:$0xff]  ;;  %1796 = vmatpush.msra.mxu3 %v3370_v20  ;;  %1708 = vmatpush.msra.mxu2 %v3365_v54  ;;  %v3355_v20 = vld [vmem:[%s5920_s1 + $0x500] sm:$0xff]  ;;  %v3356_v54 = vld [vmem:[%s5920_s1 + $0x508] sm:$0xff] }
 0x172   :  { %6010 = vst [vmem:[#allocation79_spill] sm:$0xff] %v4301_v50  ;;  %1530 = vmatpush.msra.mxu0 %v3363_v9  ;;  %1619 = vmatpush.msra.mxu1 %v3364_v1  ;;  %v3361_v50 = vld [vmem:[%s5920_s1 + $0x530] sm:$0xff]  ;;  %v3362_v1 = vld [vmem:[%s5920_s1 + $0x538] sm:$0xff] }
 0x173   :  { %6011 = vst [vmem:[#allocation80_spill] sm:$0xff] %v4309_v27  ;;  %1797 = vmatpush.msra.mxu3 %v3366_v48  ;;  %v3358_v9 = vld [vmem:[%s5920_s1 + $0x518] sm:$0xff]  ;;  %1709 = vmatpush.msra.mxu2 %v3361_v50  ;;  %v3352_v48 = vld [vmem:[%s5920_s1 + $0x4e8] sm:$0xff]  ;;  %v3329_v27 = vld [vmem:[%s5920_s1 + $0x430] sm:$0xff] }
 0x174   :  { %6012 = vst [vmem:[#allocation81_spill] sm:$0xff] %v4311_v53  ;;  %856 = vmatmul.f32.gmra.mxu0 %v709_v36  ;;  %945 = vmatmul.f32.gmra.mxu1 %v709_v36  ;;  %v3354_v50 = vld [vmem:[%s5920_s1 + $0x4f8] sm:$0xff]  ;;  %v3341_v53 = vld [vmem:[%s5920_s1 + $0x490] sm:$0xff] }
 0x175   :  { %1034 = vmatmul.f32.gmra.mxu2 %v709_v36  ;;  %1123 = vmatmul.f32.gmra.mxu3 %v709_v36  ;;  %v3351_v36 = vld [vmem:[%s5920_s1 + $0x4e0] sm:$0xff] }
 0x176   :  { %1531 = vmatpush.msra.mxu0 %v3359_v41  ;;  %1620 = vmatpush.msra.mxu1 %v3360_v47 }
 0x177   :  { %1798 = vmatpush.msra.mxu3 %v3362_v1  ;;  %1710 = vmatpush.msra.mxu2 %v3357_v14  ;;  %v3350_v14 = vld [vmem:[%s5920_s1 + $0x4d8] sm:$0xff] }
 0x178   :  { %v4346_v41 = vpop.f32.mrf.mxu2  ;;  %v4348_v47 = vpop.f32.mrf.mxu3  ;;  %1532 = vmatpush.msra.mxu0 %v3355_v20  ;;  %1621 = vmatpush.msra.mxu1 %v3356_v54  ;;  %v3347_v20 = vld [vmem:[%s5920_s1 + $0x4c0] sm:$0xff]  ;;  %v3348_v54 = vld [vmem:[%s5920_s1 + $0x4c8] sm:$0xff] }
 0x179   :  { %6013 = vst [vmem:[#allocation82_spill] sm:$0xff] %v4346_v41  ;;  %v4356_v1 = vpop.f32.mrf.mxu0  ;;  %v4358_v42 = vpop.f32.mrf.mxu1  ;;  %v710_v41 = vld [vmem:[%s5938_s25 + $0x99] sm:$0xff]  ;;  %1799 = vmatpush.msra.mxu3 %v3358_v9  ;;  %1711 = vmatpush.msra.mxu2 %v3353_v43  ;;  %v3344_v9 = vld [vmem:[%s5920_s1 + $0x4a8] sm:$0xff] }
 0x17a   :  { %6014 = vst [vmem:[#allocation83_spill] sm:$0xff] %v4348_v47  ;;  %1533 = vmatpush.msra.mxu0 %v3351_v36  ;;  %1622 = vmatpush.msra.mxu1 %v3352_v48  ;;  %v3349_v47 = vld [vmem:[%s5920_s1 + $0x4d0] sm:$0xff]  ;;  %v3343_v43 = vld [vmem:[%s5920_s1 + $0x4a0] sm:$0xff]  ;;  %v3346_v48 = vld [vmem:[%s5920_s1 + $0x4b8] sm:$0xff] }
 0x17b   :  { %6015 = vst [vmem:[#allocation84_spill] sm:$0xff] %v4356_v1  ;;  %1800 = vmatpush.msra.mxu3 %v3354_v50  ;;  %v3345_v36 = vld [vmem:[%s5920_s1 + $0x4b0] sm:$0xff]  ;;  %1712 = vmatpush.msra.mxu2 %v3349_v47  ;;  %v3340_v50 = vld [vmem:[%s5920_s1 + $0x488] sm:$0xff]  ;;  %v3342_v47 = vld [vmem:[%s5920_s1 + $0x498] sm:$0xff] }
 0x17c   :  { %6016 = vst [vmem:[#allocation85_spill] sm:$0xff] %v4358_v42  ;;  %859 = vmatmul.f32.gmra.mxu0 %v710_v41  ;;  %948 = vmatmul.f32.gmra.mxu1 %v710_v41 }
 0x17d   :  { %1037 = vmatmul.f32.gmra.mxu2 %v710_v41  ;;  %1126 = vmatmul.f32.gmra.mxu3 %v710_v41  ;;  %v3339_v41 = vld [vmem:[%s5920_s1 + $0x480] sm:$0xff] }
 0x17e   :  { %1534 = vmatpush.msra.mxu0 %v3347_v20  ;;  %1623 = vmatpush.msra.mxu1 %v3348_v54 }
 0x17f   :  { %1801 = vmatpush.msra.mxu3 %v3350_v14  ;;  %1713 = vmatpush.msra.mxu2 %v3345_v36  ;;  %v3338_v36 = vld [vmem:[%s5920_s1 + $0x478] sm:$0xff] }
 0x180   :  { %v4393_v20 = vpop.f32.mrf.mxu2  ;;  %v4395_v54 = vpop.f32.mrf.mxu3  ;;  %1535 = vmatpush.msra.mxu0 %v3343_v43  ;;  %1624 = vmatpush.msra.mxu1 %v3344_v9  ;;  %v3335_v43 = vld [vmem:[%s5920_s1 + $0x460] sm:$0xff]  ;;  %v3336_v9 = vld [vmem:[%s5920_s1 + $0x468] sm:$0xff] }
 0x181   :  { %6017 = vst [vmem:[#allocation86_spill] sm:$0xff] %v4393_v20  ;;  %v4403_v14 = vpop.f32.mrf.mxu0  ;;  %v4405_v52 = vpop.f32.mrf.mxu1  ;;  %v711_v20 = vld [vmem:[%s5938_s25 + $0xa1] sm:$0xff]  ;;  %1802 = vmatpush.msra.mxu3 %v3346_v48  ;;  %1714 = vmatpush.msra.mxu2 %v3341_v53 }
 0x182   :  { %6018 = vst [vmem:[#allocation87_spill] sm:$0xff] %v4395_v54  ;;  %1536 = vmatpush.msra.mxu0 %v3339_v41  ;;  %1625 = vmatpush.msra.mxu1 %v3340_v50  ;;  %v3337_v54 = vld [vmem:[%s5920_s1 + $0x470] sm:$0xff]  ;;  %v3331_v53 = vld [vmem:[%s5920_s1 + $0x440] sm:$0xff]  ;;  %v3332_v48 = vld [vmem:[%s5920_s1 + $0x448] sm:$0xff] }
 0x183   :  { %1803 = vmatpush.msra.mxu3 %v3342_v47  ;;  %v3333_v41 = vld [vmem:[%s5920_s1 + $0x450] sm:$0xff]  ;;  %v3334_v50 = vld [vmem:[%s5920_s1 + $0x458] sm:$0xff]  ;;  %1715 = vmatpush.msra.mxu2 %v3337_v54  ;;  %v3328_v47 = vld [vmem:[%s5920_s1 + $0x428] sm:$0xff] }
 0x184   :  { %862 = vmatmul.f32.gmra.mxu0 %v711_v20  ;;  %951 = vmatmul.f32.gmra.mxu1 %v711_v20  ;;  %v3330_v54 = vld [vmem:[%s5920_s1 + $0x438] sm:$0xff] }
 0x185   :  { %1040 = vmatmul.f32.gmra.mxu2 %v711_v20  ;;  %1129 = vmatmul.f32.gmra.mxu3 %v711_v20  ;;  %v3327_v20 = vld [vmem:[%s5920_s1 + $0x420] sm:$0xff] }
 0x186   :  { %1537 = vmatpush.msra.mxu0 %v3335_v43  ;;  %1626 = vmatpush.msra.mxu1 %v3336_v9 }
 0x187   :  { %1804 = vmatpush.msra.mxu3 %v3338_v36  ;;  %1716 = vmatpush.msra.mxu2 %v3333_v41  ;;  %v3326_v41 = vld [vmem:[%s5920_s1 + $0x418] sm:$0xff] }
 0x188   :  { %v4440_v43 = vpop.f32.mrf.mxu2  ;;  %v4442_v9 = vpop.f32.mrf.mxu3  ;;  %1538 = vmatpush.msra.mxu0 %v3331_v53  ;;  %1627 = vmatpush.msra.mxu1 %v3332_v48  ;;  %v3323_v53 = vld [vmem:[%s5920_s1 + $0x400] sm:$0xff]  ;;  %v3324_v48 = vld [vmem:[%s5920_s1 + $0x408] sm:$0xff] }
 0x189   :  { %6019 = vst [vmem:[#allocation88_spill] sm:$0xff] %v4440_v43  ;;  %v4450_v36 = vpop.f32.mrf.mxu0  ;;  %v4452_v51 = vpop.f32.mrf.mxu1  ;;  %v712_v43 = vld [vmem:[%s5938_s25 + $0xa9] sm:$0xff]  ;;  %1805 = vmatpush.msra.mxu3 %v3334_v50  ;;  %1717 = vmatpush.msra.mxu2 %v3329_v27 }
 0x18a   :  { %6020 = vst [vmem:[#allocation89_spill] sm:$0xff] %v4442_v9  ;;  %1539 = vmatpush.msra.mxu0 %v3327_v20  ;;  %1628 = vmatpush.msra.mxu1 %v3328_v47  ;;  %v3325_v9 = vld [vmem:[%s5920_s1 + $0x410] sm:$0xff] }
 0x18b   :  { %1806 = vmatpush.msra.mxu3 %v3330_v54  ;;  %1718 = vmatpush.msra.mxu2 %v3325_v9  ;;  %v713_v54 = vld [vmem:[%s5938_s25 + $0xb1] sm:$0xff] }
 0x18c   :  { %865 = vmatmul.f32.gmra.mxu0 %v712_v43  ;;  %954 = vmatmul.f32.gmra.mxu1 %v712_v43 }
 0x18d   :  { %1043 = vmatmul.f32.gmra.mxu2 %v712_v43  ;;  %1132 = vmatmul.f32.gmra.mxu3 %v712_v43  ;;  %v715_v43 = vld [vmem:[%s5938_s25] sm:$0x1] }
 0x18e   :  { %1540 = vmatpush.msra.mxu0 %v3323_v53  ;;  %1629 = vmatpush.msra.mxu1 %v3324_v48  ;;  %v717_v9 = vrot.slane %v715_v43, 1  ;;  %v714_v53 = vld [vmem:[%s5938_s25 + $0xb9] sm:$0x7f] }
 0x18f   :  { %1807 = vmatpush.msra.mxu3 %v3326_v41 }
 0x190   :  { %v4469_v27 = vpop.f32.mrf.mxu2  ;;  %v4471_v50 = vpop.f32.mrf.mxu3  ;;  %v720_v1 = vsel %vm719_vm0, %v714_v53, %v717_v9 }
 0x191   :  { %v4473_v20 = vpop.f32.mrf.mxu0  ;;  %v4475_v47 = vpop.f32.mrf.mxu1 }
 0x192   :  { %6021 = vst [vmem:[#allocation90_spill] sm:$0xff] %v4473_v20 }
 0x193   :  { %6022 = vst [vmem:[#allocation91_spill] sm:$0xff] %v4475_v47 }
 0x194   :  { %868 = vmatmul.f32.gmra.mxu0 %v713_v54  ;;  %957 = vmatmul.f32.gmra.mxu1 %v713_v54 }
 0x195   :  { %1046 = vmatmul.f32.gmra.mxu2 %v713_v54  ;;  %1135 = vmatmul.f32.gmra.mxu3 %v713_v54 }
 0x198   :  { %v4486_v48 = vpop.f32.mrf.mxu2  ;;  %v4488_v41 = vpop.f32.mrf.mxu3 }
 0x199   :  { %v4490_v42 = vpop.f32.mrf.mxu0  ;;  %v4492_v5 = vpop.f32.mrf.mxu1 }
 0x19a   :  { %6023 = vst [vmem:[#allocation92_spill] sm:$0xff] %v4490_v42 }
 0x19b   :  { %6024 = vst [vmem:[#allocation93_spill] sm:$0xff] %v4492_v5 }
 0x19c   :  { %871 = vmatmul.f32.gmra.mxu0 %v720_v1  ;;  %960 = vmatmul.f32.gmra.mxu1 %v720_v1 }
 0x19d   :  { %1049 = vmatmul.f32.gmra.mxu2 %v720_v1  ;;  %1138 = vmatmul.f32.gmra.mxu3 %v720_v1 }
 0x1a0   :  { %v4494_v54 = vpop.f32.mrf.mxu2  ;;  %v4496_v43 = vpop.f32.mrf.mxu3 }
 0x1a1   :  { %v4498_v4 = vpop.f32.mrf.mxu0  ;;  %v4500_v0 = vpop.f32.mrf.mxu1 }
 0x1a2   :  { %6025 = vst [vmem:[#allocation94_spill] sm:$0xff] %v4498_v4 }
 0x1a3   :  { %6026 = vst [vmem:[#allocation95_spill] sm:$0xff] %v4500_v0 }
 0x1a4   :  { %1541 = vmatmul.f32.vlgmr.msra.gmra.mxu0 %v1430_v40  ;;  %1630 = vmatmul.f32.vlgmr.msra.gmra.mxu1 %v1430_v40 }
 0x1a5   :  { %1719 = vmatmul.f32.vlgmr.msra.gmra.mxu2 %v1430_v40  ;;  %1808 = vmatmul.f32.vlgmr.msra.gmra.mxu3 %v1430_v40 }
 0x1a8   :  { %v4505_v9 = vpop.f32.mrf.mxu2  ;;  %v4507_v53 = vpop.f32.mrf.mxu3 }
 0x1a9   :  { %v4509_v1 = vpop.f32.mrf.mxu0  ;;  %v4511_v47 = vpop.f32.mrf.mxu1 }
 0x1aa   :  { %6027 = vst [vmem:[#allocation96_spill] sm:$0xff] %v4509_v1 }
 0x1ab   :  { %6028 = vst [vmem:[#allocation97_spill] sm:$0xff] %v4511_v47 }
 0x1ac   :  { %1544 = vmatmul.f32.gmra.mxu0 %v1431_v58  ;;  %1633 = vmatmul.f32.gmra.mxu1 %v1431_v58 }
 0x1ad   :  { %1722 = vmatmul.f32.gmra.mxu2 %v1431_v58  ;;  %1811 = vmatmul.f32.gmra.mxu3 %v1431_v58 }
 0x1b0   :  { %v4516_v20 = vpop.f32.mrf.mxu2  ;;  %v4518_v57 = vpop.f32.mrf.mxu3 }
 0x1b1   :  { %v4520_v40 = vpop.f32.mrf.mxu0  ;;  %v4522_v5 = vpop.f32.mrf.mxu1 }
 0x1b2   :  { %6029 = vst [vmem:[#allocation98_spill] sm:$0xff] %v4520_v40 }
 0x1b3   :  { %6030 = vst [vmem:[#allocation99_spill] sm:$0xff] %v4522_v5 }
 0x1b4   :  { %1547 = vmatmul.f32.gmra.mxu0 %v1432_v63  ;;  %1636 = vmatmul.f32.gmra.mxu1 %v1432_v63 }
 0x1b5   :  { %1725 = vmatmul.f32.gmra.mxu2 %v1432_v63  ;;  %1814 = vmatmul.f32.gmra.mxu3 %v1432_v63 }
 0x1b8   :  { %v4527_v42 = vpop.f32.mrf.mxu2  ;;  %v4529_v62 = vpop.f32.mrf.mxu3 }
 0x1b9   :  { %v4531_v58 = vpop.f32.mrf.mxu0  ;;  %v4533_v0 = vpop.f32.mrf.mxu1 }
 0x1ba   :  { %6031 = vst [vmem:[#allocation100_spill] sm:$0xff] %v4531_v58 }
 0x1bb   :  { %6032 = vst [vmem:[#allocation101_spill] sm:$0xff] %v4533_v0 }
 0x1bc   :  { %1550 = vmatmul.f32.gmra.mxu0 %v1433_v8  ;;  %1639 = vmatmul.f32.gmra.mxu1 %v1433_v8 }
 0x1bd   :  { %1728 = vmatmul.f32.gmra.mxu2 %v1433_v8  ;;  %1817 = vmatmul.f32.gmra.mxu3 %v1433_v8 }
 0x1c0   :  { %v4538_v4 = vpop.f32.mrf.mxu2  ;;  %v4540_v7 = vpop.f32.mrf.mxu3 }
 0x1c1   :  { %6033 = vst [vmem:[#allocation102_spill] sm:$0xff] %v4538_v4  ;;  %v4542_v63 = vpop.f32.mrf.mxu0  ;;  %v4544_v47 = vpop.f32.mrf.mxu1 }
 0x1c2   :  { %6034 = vst [vmem:[#allocation103_spill] sm:$0xff] %v4540_v7  ;;  %v1435_v7 = vld [vmem:[%s5938_s25 + $0x2a] sm:$0xff] }
 0x1c3   :  { %6035 = vst [vmem:[#allocation104_spill] sm:$0xff] %v4544_v47 }
 0x1c4   :  { %1553 = vmatmul.f32.gmra.mxu0 %v1434_v13  ;;  %1642 = vmatmul.f32.gmra.mxu1 %v1434_v13 }
 0x1c5   :  { %1731 = vmatmul.f32.gmra.mxu2 %v1434_v13  ;;  %1820 = vmatmul.f32.gmra.mxu3 %v1434_v13 }
 0x1c8   :  { %v4549_v1 = vpop.f32.mrf.mxu2  ;;  %v4551_v12 = vpop.f32.mrf.mxu3 }
 0x1c9   :  { %6036 = vst [vmem:[#allocation105_spill] sm:$0xff] %v4549_v1  ;;  %v4553_v8 = vpop.f32.mrf.mxu0  ;;  %v4555_v4 = vpop.f32.mrf.mxu1 }
 0x1ca   :  { %6037 = vst [vmem:[#allocation106_spill] sm:$0xff] %v4551_v12  ;;  %v1436_v12 = vld [vmem:[%s5938_s25 + $0x32] sm:$0xff] }
 0x1cc   :  { %1556 = vmatmul.f32.gmra.mxu0 %v1435_v7  ;;  %1645 = vmatmul.f32.gmra.mxu1 %v1435_v7 }
 0x1cd   :  { %1734 = vmatmul.f32.gmra.mxu2 %v1435_v7  ;;  %1823 = vmatmul.f32.gmra.mxu3 %v1435_v7 }
 0x1d0   :  { %v4560_v5 = vpop.f32.mrf.mxu2  ;;  %v4562_v22 = vpop.f32.mrf.mxu3 }
 0x1d1   :  { %6038 = vst [vmem:[#allocation107_spill] sm:$0xff] %v4560_v5  ;;  %v4564_v13 = vpop.f32.mrf.mxu0  ;;  %v4566_v1 = vpop.f32.mrf.mxu1 }
 0x1d2   :  { %6039 = vst [vmem:[#allocation108_spill] sm:$0xff] %v4562_v22  ;;  %v1437_v22 = vld [vmem:[%s5938_s25 + $0x3a] sm:$0xff] }
 0x1d4   :  { %1559 = vmatmul.f32.gmra.mxu0 %v1436_v12  ;;  %1648 = vmatmul.f32.gmra.mxu1 %v1436_v12 }
 0x1d5   :  { %1737 = vmatmul.f32.gmra.mxu2 %v1436_v12  ;;  %1826 = vmatmul.f32.gmra.mxu3 %v1436_v12 }
 0x1d8   :  { %v4571_v40 = vpop.f32.mrf.mxu2  ;;  %v4573_v21 = vpop.f32.mrf.mxu3 }
 0x1d9   :  { %6040 = vst [vmem:[#allocation109_spill] sm:$0xff] %v4571_v40  ;;  %v4575_v7 = vpop.f32.mrf.mxu0  ;;  %v4577_v5 = vpop.f32.mrf.mxu1 }
 0x1da   :  { %6041 = vst [vmem:[#allocation110_spill] sm:$0xff] %v4573_v21  ;;  %v1438_v21 = vld [vmem:[%s5938_s25 + $0x42] sm:$0xff] }
 0x1dc   :  { %1562 = vmatmul.f32.gmra.mxu0 %v1437_v22  ;;  %1651 = vmatmul.f32.gmra.mxu1 %v1437_v22 }
 0x1dd   :  { %1740 = vmatmul.f32.gmra.mxu2 %v1437_v22  ;;  %1829 = vmatmul.f32.gmra.mxu3 %v1437_v22 }
 0x1e0   :  { %v4582_v0 = vpop.f32.mrf.mxu2  ;;  %v4584_v33 = vpop.f32.mrf.mxu3 }
 0x1e1   :  { %6042 = vst [vmem:[#allocation111_spill] sm:$0xff] %v4582_v0  ;;  %v4586_v12 = vpop.f32.mrf.mxu0  ;;  %v4588_v40 = vpop.f32.mrf.mxu1 }
 0x1e2   :  { %6043 = vst [vmem:[#allocation112_spill] sm:$0xff] %v4584_v33 }
 0x1e3   :  { %6044 = vst [vmem:[#allocation113_spill] sm:$0xff] %v4586_v12 }
 0x1e4   :  { %6045 = vst [vmem:[#allocation114_spill] sm:$0xff] %v4588_v40  ;;  %1565 = vmatmul.f32.gmra.mxu0 %v1438_v21  ;;  %1654 = vmatmul.f32.gmra.mxu1 %v1438_v21  ;;  %v1439_v40 = vld [vmem:[%s5938_s25 + $0x4a] sm:$0xff] }
 0x1e5   :  { %1743 = vmatmul.f32.gmra.mxu2 %v1438_v21  ;;  %1832 = vmatmul.f32.gmra.mxu3 %v1438_v21 }
 0x1e8   :  { %v4593_v58 = vpop.f32.mrf.mxu2  ;;  %v4595_v30 = vpop.f32.mrf.mxu3 }
 0x1e9   :  { %6046 = vst [vmem:[#allocation115_spill] sm:$0xff] %v4593_v58  ;;  %v4597_v22 = vpop.f32.mrf.mxu0  ;;  %v4599_v0 = vpop.f32.mrf.mxu1 }
 0x1ea   :  { %6047 = vst [vmem:[#allocation116_spill] sm:$0xff] %v4595_v30 }
 0x1eb   :  { %6048 = vst [vmem:[#allocation117_spill] sm:$0xff] %v4597_v22 }
 0x1ec   :  { %6049 = vst [vmem:[#allocation118_spill] sm:$0xff] %v4599_v0  ;;  %1568 = vmatmul.f32.gmra.mxu0 %v1439_v40  ;;  %1657 = vmatmul.f32.gmra.mxu1 %v1439_v40  ;;  %v1440_v0 = vld [vmem:[%s5938_s25 + $0x52] sm:$0xff] }
 0x1ed   :  { %1746 = vmatmul.f32.gmra.mxu2 %v1439_v40  ;;  %1835 = vmatmul.f32.gmra.mxu3 %v1439_v40 }
 0x1f0   :  { %v4604_v12 = vpop.f32.mrf.mxu2  ;;  %v4606_v33 = vpop.f32.mrf.mxu3 }
 0x1f1   :  { %6050 = vst [vmem:[#allocation119_spill] sm:$0xff] %v4604_v12  ;;  %v4608_v21 = vpop.f32.mrf.mxu0  ;;  %v4610_v58 = vpop.f32.mrf.mxu1 }
 0x1f2   :  { %6051 = vst [vmem:[#allocation120_spill] sm:$0xff] %v4606_v33  ;;  %v1441_v33 = vld [vmem:[%s5938_s25 + $0x5a] sm:$0xff] }
 0x1f3   :  { %6052 = vst [vmem:[#allocation121_spill] sm:$0xff] %v4608_v21 }
 0x1f4   :  { %6053 = vst [vmem:[#allocation122_spill] sm:$0xff] %v4610_v58  ;;  %1571 = vmatmul.f32.gmra.mxu0 %v1440_v0  ;;  %1660 = vmatmul.f32.gmra.mxu1 %v1440_v0 }
 0x1f5   :  { %1749 = vmatmul.f32.gmra.mxu2 %v1440_v0  ;;  %1838 = vmatmul.f32.gmra.mxu3 %v1440_v0 }
 0x1f8   :  { %v4615_v22 = vpop.f32.mrf.mxu2  ;;  %v4617_v30 = vpop.f32.mrf.mxu3 }
 0x1f9   :  { %6054 = vst [vmem:[#allocation123_spill] sm:$0xff] %v4615_v22  ;;  %v4619_v40 = vpop.f32.mrf.mxu0  ;;  %v4621_v12 = vpop.f32.mrf.mxu1 }
 0x1fa   :  { %6055 = vst [vmem:[#allocation124_spill] sm:$0xff] %v4617_v30  ;;  %v1442_v30 = vld [vmem:[%s5938_s25 + $0x62] sm:$0xff] }
 0x1fb   :  { %6056 = vst [vmem:[#allocation125_spill] sm:$0xff] %v4619_v40 }
 0x1fc   :  { %6057 = vst [vmem:[#allocation126_spill] sm:$0xff] %v4621_v12  ;;  %1574 = vmatmul.f32.gmra.mxu0 %v1441_v33  ;;  %1663 = vmatmul.f32.gmra.mxu1 %v1441_v33 }
 0x1fd   :  { %1752 = vmatmul.f32.gmra.mxu2 %v1441_v33  ;;  %1841 = vmatmul.f32.gmra.mxu3 %v1441_v33 }
 0x200   :  { %v4626_v58 = vpop.f32.mrf.mxu2  ;;  %v4628_v21 = vpop.f32.mrf.mxu3 }
 0x201   :  { %6058 = vst [vmem:[#allocation127_spill] sm:$0xff] %v4626_v58  ;;  %v4630_v0 = vpop.f32.mrf.mxu0  ;;  %v4632_v22 = vpop.f32.mrf.mxu1 }
 0x202   :  { %6059 = vst [vmem:[#allocation128_spill] sm:$0xff] %v4628_v21  ;;  %v1443_v21 = vld [vmem:[%s5938_s25 + $0x6a] sm:$0xff] }
 0x203   :  { %6060 = vst [vmem:[#allocation129_spill] sm:$0xff] %v4630_v0 }
 0x204   :  { %6061 = vst [vmem:[#allocation130_spill] sm:$0xff] %v4632_v22  ;;  %1577 = vmatmul.f32.gmra.mxu0 %v1442_v30  ;;  %1666 = vmatmul.f32.gmra.mxu1 %v1442_v30 }
 0x205   :  { %1755 = vmatmul.f32.gmra.mxu2 %v1442_v30  ;;  %1844 = vmatmul.f32.gmra.mxu3 %v1442_v30 }
 0x208   :  { %v4637_v12 = vpop.f32.mrf.mxu2  ;;  %v4639_v40 = vpop.f32.mrf.mxu3 }
 0x209   :  { %6062 = vst [vmem:[#allocation131_spill] sm:$0xff] %v4637_v12  ;;  %v4641_v33 = vpop.f32.mrf.mxu0  ;;  %v4643_v58 = vpop.f32.mrf.mxu1 }
 0x20a   :  { %6063 = vst [vmem:[#allocation132_spill] sm:$0xff] %v4639_v40  ;;  %v1444_v40 = vld [vmem:[%s5938_s25 + $0x72] sm:$0xff] }
 0x20b   :  { %6064 = vst [vmem:[#allocation133_spill] sm:$0xff] %v4641_v33 }
 0x20c   :  { %6065 = vst [vmem:[#allocation134_spill] sm:$0xff] %v4643_v58  ;;  %1580 = vmatmul.f32.gmra.mxu0 %v1443_v21  ;;  %1669 = vmatmul.f32.gmra.mxu1 %v1443_v21 }
 0x20d   :  { %1758 = vmatmul.f32.gmra.mxu2 %v1443_v21  ;;  %1847 = vmatmul.f32.gmra.mxu3 %v1443_v21 }
 0x210   :  { %v4648_v22 = vpop.f32.mrf.mxu2  ;;  %v4650_v0 = vpop.f32.mrf.mxu3 }
 0x211   :  { %6066 = vst [vmem:[#allocation135_spill] sm:$0xff] %v4648_v22  ;;  %v4652_v30 = vpop.f32.mrf.mxu0  ;;  %v4654_v12 = vpop.f32.mrf.mxu1 }
 0x212   :  { %6067 = vst [vmem:[#allocation136_spill] sm:$0xff] %v4650_v0  ;;  %v1445_v0 = vld [vmem:[%s5938_s25 + $0x7a] sm:$0xff] }
 0x213   :  { %6068 = vst [vmem:[#allocation137_spill] sm:$0xff] %v4652_v30 }
 0x214   :  { %6069 = vst [vmem:[#allocation138_spill] sm:$0xff] %v4654_v12  ;;  %1583 = vmatmul.f32.gmra.mxu0 %v1444_v40  ;;  %1672 = vmatmul.f32.gmra.mxu1 %v1444_v40 }
 0x215   :  { %1761 = vmatmul.f32.gmra.mxu2 %v1444_v40  ;;  %1850 = vmatmul.f32.gmra.mxu3 %v1444_v40 }
 0x218   :  { %v4659_v58 = vpop.f32.mrf.mxu2  ;;  %v4661_v33 = vpop.f32.mrf.mxu3 }
 0x219   :  { %6070 = vst [vmem:[#allocation139_spill] sm:$0xff] %v4659_v58  ;;  %v4663_v21 = vpop.f32.mrf.mxu0  ;;  %v4665_v22 = vpop.f32.mrf.mxu1 }
 0x21a   :  { %6071 = vst [vmem:[#allocation140_spill] sm:$0xff] %v4661_v33  ;;  %v1446_v33 = vld [vmem:[%s5938_s25 + $0x82] sm:$0xff] }
 0x21b   :  { %6072 = vst [vmem:[#allocation141_spill] sm:$0xff] %v4663_v21 }
 0x21c   :  { %6073 = vst [vmem:[#allocation142_spill] sm:$0xff] %v4665_v22  ;;  %1586 = vmatmul.f32.gmra.mxu0 %v1445_v0  ;;  %1675 = vmatmul.f32.gmra.mxu1 %v1445_v0 }
 0x21d   :  { %1764 = vmatmul.f32.gmra.mxu2 %v1445_v0  ;;  %1853 = vmatmul.f32.gmra.mxu3 %v1445_v0 }
 0x220   :  { %v4670_v12 = vpop.f32.mrf.mxu2  ;;  %v4672_v30 = vpop.f32.mrf.mxu3 }
 0x221   :  { %6074 = vst [vmem:[#allocation143_spill] sm:$0xff] %v4670_v12  ;;  %v4674_v40 = vpop.f32.mrf.mxu0  ;;  %v4676_v58 = vpop.f32.mrf.mxu1 }
 0x222   :  { %6075 = vst [vmem:[#allocation144_spill] sm:$0xff] %v4672_v30  ;;  %v1447_v30 = vld [vmem:[%s5938_s25 + $0x8a] sm:$0xff] }
 0x223   :  { %6076 = vst [vmem:[#allocation145_spill] sm:$0xff] %v4674_v40 }
 0x224   :  { %6077 = vst [vmem:[#allocation146_spill] sm:$0xff] %v4676_v58  ;;  %1589 = vmatmul.f32.gmra.mxu0 %v1446_v33  ;;  %1678 = vmatmul.f32.gmra.mxu1 %v1446_v33 }
 0x225   :  { %1767 = vmatmul.f32.gmra.mxu2 %v1446_v33  ;;  %1856 = vmatmul.f32.gmra.mxu3 %v1446_v33 }
 0x228   :  { %v4681_v22 = vpop.f32.mrf.mxu2  ;;  %v4683_v21 = vpop.f32.mrf.mxu3 }
 0x229   :  { %6078 = vst [vmem:[#allocation147_spill] sm:$0xff] %v4681_v22  ;;  %v4685_v0 = vpop.f32.mrf.mxu0  ;;  %v4687_v12 = vpop.f32.mrf.mxu1 }
 0x22a   :  { %6079 = vst [vmem:[#allocation148_spill] sm:$0xff] %v4683_v21  ;;  %v1448_v21 = vld [vmem:[%s5938_s25 + $0x92] sm:$0xff] }
 0x22b   :  { %6080 = vst [vmem:[#allocation149_spill] sm:$0xff] %v4685_v0 }
 0x22c   :  { %6081 = vst [vmem:[#allocation150_spill] sm:$0xff] %v4687_v12  ;;  %1592 = vmatmul.f32.gmra.mxu0 %v1447_v30  ;;  %1681 = vmatmul.f32.gmra.mxu1 %v1447_v30 }
 0x22d   :  { %1770 = vmatmul.f32.gmra.mxu2 %v1447_v30  ;;  %1859 = vmatmul.f32.gmra.mxu3 %v1447_v30 }
 0x230   :  { %v4692_v58 = vpop.f32.mrf.mxu2  ;;  %v4694_v40 = vpop.f32.mrf.mxu3 }
 0x231   :  { %6082 = vst [vmem:[#allocation151_spill] sm:$0xff] %v4692_v58  ;;  %v4696_v33 = vpop.f32.mrf.mxu0  ;;  %v4698_v22 = vpop.f32.mrf.mxu1 }
 0x232   :  { %6083 = vst [vmem:[#allocation152_spill] sm:$0xff] %v4694_v40  ;;  %v1449_v40 = vld [vmem:[%s5938_s25 + $0x9a] sm:$0xff] }
 0x233   :  { %6084 = vst [vmem:[#allocation153_spill] sm:$0xff] %v4696_v33 }
 0x234   :  { %6085 = vst [vmem:[#allocation154_spill] sm:$0xff] %v4698_v22  ;;  %1595 = vmatmul.f32.gmra.mxu0 %v1448_v21  ;;  %1684 = vmatmul.f32.gmra.mxu1 %v1448_v21 }
 0x235   :  { %1773 = vmatmul.f32.gmra.mxu2 %v1448_v21  ;;  %1862 = vmatmul.f32.gmra.mxu3 %v1448_v21 }
 0x238   :  { %v4703_v12 = vpop.f32.mrf.mxu2  ;;  %v4705_v0 = vpop.f32.mrf.mxu3 }
 0x239   :  { %6086 = vst [vmem:[#allocation155_spill] sm:$0xff] %v4703_v12  ;;  %v4707_v30 = vpop.f32.mrf.mxu0  ;;  %v4709_v58 = vpop.f32.mrf.mxu1 }
 0x23a   :  { %6087 = vst [vmem:[#allocation156_spill] sm:$0xff] %v4705_v0  ;;  %v1450_v0 = vld [vmem:[%s5938_s25 + $0xa2] sm:$0xff] }
 0x23b   :  { %6088 = vst [vmem:[#allocation157_spill] sm:$0xff] %v4707_v30 }
 0x23c   :  { %6089 = vst [vmem:[#allocation158_spill] sm:$0xff] %v4709_v58  ;;  %1598 = vmatmul.f32.gmra.mxu0 %v1449_v40  ;;  %1687 = vmatmul.f32.gmra.mxu1 %v1449_v40 }
 0x23d   :  { %1776 = vmatmul.f32.gmra.mxu2 %v1449_v40  ;;  %1865 = vmatmul.f32.gmra.mxu3 %v1449_v40 }
 0x240   :  { %v4714_v22 = vpop.f32.mrf.mxu2  ;;  %v4716_v33 = vpop.f32.mrf.mxu3 }
 0x241   :  { %6090 = vst [vmem:[#allocation159_spill] sm:$0xff] %v4714_v22  ;;  %v4718_v21 = vpop.f32.mrf.mxu0  ;;  %v4720_v12 = vpop.f32.mrf.mxu1 }
 0x242   :  { %6091 = vst [vmem:[#allocation160_spill] sm:$0xff] %v4716_v33  ;;  %v1451_v33 = vld [vmem:[%s5938_s25 + $0xaa] sm:$0xff] }
 0x243   :  { %6092 = vst [vmem:[#allocation161_spill] sm:$0xff] %v4718_v21 }
 0x244   :  { %6093 = vst [vmem:[#allocation162_spill] sm:$0xff] %v4720_v12  ;;  %1601 = vmatmul.f32.gmra.mxu0 %v1450_v0  ;;  %1690 = vmatmul.f32.gmra.mxu1 %v1450_v0  ;;  %v1164_v12 = vadd.f32 %v4469_v27, %v4013_v55  ;;  %v1454_v55 = vld [vmem:[%s5938_s25] sm:$0x3]  ;;  %v1453_v27 = vld [vmem:[%s5938_s25 + $0xba] sm:$0x3f] }
 0x245   :  { %1779 = vmatmul.f32.gmra.mxu2 %v1450_v0  ;;  %1868 = vmatmul.f32.gmra.mxu3 %v1450_v0  ;;  %v1165_v0 = vadd.f32 %v4471_v50, %v4015_v56  ;;  %v1456_v56 = vrot.slane %v1454_v55, 2  ;;  %v1168_v50 = vadd.f32 %v4486_v48, %v4024_v60  ;;  %v1172_v60 = vadd.f32 %v4494_v54, %v4035_v3 }
 0x247   :  { %v1459_v55 = vsel %vm1458_vm1, %v1453_v27, %v1456_v56  ;;  %v1176_v56 = vadd.f32 %v4505_v9, %v4046_v10  ;;  %v1177_v27 = vadd.f32 %v4507_v53, %v4048_v11 }
 0x248   :  { %v4725_v58 = vpop.f32.mrf.mxu2  ;;  %v4727_v30 = vpop.f32.mrf.mxu3 }
 0x249   :  { %6094 = vst [vmem:[#allocation163_spill] sm:$0xff] %v4725_v58  ;;  %v4729_v40 = vpop.f32.mrf.mxu0  ;;  %v4731_v22 = vpop.f32.mrf.mxu1 }
 0x24a   :  { %6095 = vst [vmem:[#allocation164_spill] sm:$0xff] %v4727_v30 }
 0x24b   :  { %6096 = vst [vmem:[#allocation165_spill] sm:$0xff] %v4729_v40 }
 0x24c   :  { %6097 = vst [vmem:[#allocation166_spill] sm:$0xff] %v4731_v22  ;;  %1604 = vmatmul.f32.gmra.mxu0 %v1451_v33  ;;  %1693 = vmatmul.f32.gmra.mxu1 %v1451_v33 }
 0x24d   :  { %1782 = vmatmul.f32.gmra.mxu2 %v1451_v33  ;;  %1871 = vmatmul.f32.gmra.mxu3 %v1451_v33  ;;  %v1452_v33 = vld [vmem:[%s5938_s25 + $0xb2] sm:$0xff] }
 0x250   :  { %v1735_v58 = vpop.f32.mrf.mxu2  ;;  %v1824_v30 = vpop.f32.mrf.mxu3 }
 0x251   :  { %v4740_v21 = vadd.f32 %v1735_v58, %v1164_v12  ;;  %v4742_v40 = vadd.f32 %v1824_v30, %v1165_v0  ;;  %v4744_v22 = vpop.f32.mrf.mxu0  ;;  %v4746_v47 = vpop.f32.mrf.mxu1  ;;  %v1169_v58 = vadd.f32 %v4488_v41, %v4026_v61  ;;  %v1173_v61 = vadd.f32 %v4496_v43, %v4037_v6 }
 0x253   :  { %6098 = vst [vmem:[#allocation167_spill] sm:$0xff] %v4740_v21 }
 0x254   :  { %6099 = vst [vmem:[#allocation168_spill] sm:$0xff] %v4742_v40  ;;  %1607 = vmatmul.f32.gmra.mxu0 %v1452_v33  ;;  %1696 = vmatmul.f32.gmra.mxu1 %v1452_v33 }
 0x255   :  { %1785 = vmatmul.f32.gmra.mxu2 %v1452_v33  ;;  %1874 = vmatmul.f32.gmra.mxu3 %v1452_v33 }
 0x258   :  { %v1738_v12 = vpop.f32.mrf.mxu2  ;;  %v1827_v30 = vpop.f32.mrf.mxu3 }
 0x259   :  { %v4761_v0 = vadd.f32 %v1738_v12, %v1168_v50  ;;  %v4763_v40 = vadd.f32 %v1827_v30, %v1169_v58  ;;  %v4765_v21 = vpop.f32.mrf.mxu0  ;;  %v4767_v33 = vpop.f32.mrf.mxu1 }
 0x25b   :  { %6100 = vst [vmem:[#allocation169_spill] sm:$0xff] %v4761_v0 }
 0x25c   :  { %6101 = vst [vmem:[#allocation170_spill] sm:$0xff] %v4763_v40  ;;  %1610 = vmatmul.f32.gmra.mxu0 %v1459_v55  ;;  %1699 = vmatmul.f32.gmra.mxu1 %v1459_v55 }
 0x25d   :  { %1788 = vmatmul.f32.gmra.mxu2 %v1459_v55  ;;  %1877 = vmatmul.f32.gmra.mxu3 %v1459_v55 }
 0x260   :  { %v1741_v48 = vpop.f32.mrf.mxu2  ;;  %v1830_v41 = vpop.f32.mrf.mxu3 }
 0x261   :  { %v4773_v50 = vadd.f32 %v1741_v48, %v1172_v60  ;;  %v4775_v58 = vadd.f32 %v1830_v41, %v1173_v61  ;;  %v4777_v12 = vpop.f32.mrf.mxu0  ;;  %v4779_v30 = vpop.f32.mrf.mxu1  ;;  %v1180_v61 = vadd.f32 %v4516_v20, %v4057_v15  ;;  %v1181_v48 = vadd.f32 %v4518_v57, %v4059_v16 }
 0x263   :  { %6102 = vst [vmem:[#allocation171_spill] sm:$0xff] %v4773_v50  ;;  %v4835_v50 = vadd.f32 %v4253_v35, %v3797_v31  ;;  %v4856_v31 = vld [vmem:[%s5921_s2] sm:$0xf]  ;;  %v1202_v35 = vadd.f32 %v4575_v7, %v4116_v34 }
 0x264   :  { %6103 = vst [vmem:[#allocation172_spill] sm:$0xff] %v4775_v58  ;;  %v4831_v58 = vadd.f32 %v4217_v28, %v3761_v18  ;;  %v1198_v18 = vadd.f32 %v4564_v13, %v4105_v59  ;;  %v1199_v28 = vadd.f32 %v4566_v1, %v4107_v2  ;;  %v1203_v59 = vadd.f32 %v4577_v5, %v4118_v39  ;;  %v6109_v13 = vld [vmem:[#allocation100_spill] sm:$0xff] }
 0x268   :  { %v1744_v3 = vpop.f32.mrf.mxu2  ;;  %v1833_v54 = vpop.f32.mrf.mxu3 }
 0x269   :  { %v4785_v55 = vadd.f32 %v1744_v3, %v1176_v56  ;;  %v4787_v6 = vadd.f32 %v1833_v54, %v1177_v27  ;;  %v4789_v43 = vpop.f32.mrf.mxu0  ;;  %v4791_v60 = vpop.f32.mrf.mxu1  ;;  %v1184_v27 = vadd.f32 %v4527_v42, %v4068_v26  ;;  %v1185_v3 = vadd.f32 %v4529_v62, %v4070_v29 }
 0x26b   :  { %6104 = vst [vmem:[#allocation173_spill] sm:$0xff] %v4785_v55  ;;  %v4843_v55 = vadd.f32 %v4403_v14, %v3947_v23  ;;  %v4864_v23 = vadd.f32 %v4452_v51, %v3996_v45  ;;  %v1190_v51 = vadd.f32 %v4542_v63, %v4083_v37  ;;  %v6107_v45 = vld [vmem:[#allocation104_spill] sm:$0xff]  ;;  %v6111_v37 = vld [vmem:[#allocation101_spill] sm:$0xff] }
 0x26c   :  { %6105 = vst [vmem:[#allocation174_spill] sm:$0xff] %v4787_v6  ;;  %v4839_v6 = vadd.f32 %v4255_v25, %v3799_v32  ;;  %v4860_v32 = vadd.f32 %v4450_v36, %v3994_v44 }
 0x270   :  { %v1747_v10 = vpop.f32.mrf.mxu2  ;;  %v1836_v9 = vpop.f32.mrf.mxu3 }
 0x271   :  { %v4797_v41 = vadd.f32 %v1747_v10, %v1180_v61  ;;  %v4799_v11 = vadd.f32 %v1836_v9, %v1181_v48  ;;  %v4801_v53 = vpop.f32.mrf.mxu0  ;;  %v4803_v56 = vpop.f32.mrf.mxu1 }
 0x273   :  { %6106 = vst [vmem:[#allocation175_spill] sm:$0xff] %v4799_v11 }
 0x278   :  { %v1750_v15 = vpop.f32.mrf.mxu2  ;;  %v1839_v20 = vpop.f32.mrf.mxu3 }
 0x279   :  { %v4809_v54 = vadd.f32 %v1750_v15, %v1184_v27  ;;  %v4811_v57 = vadd.f32 %v1839_v20, %v1185_v3  ;;  %v1575_v16 = vpop.f32.mrf.mxu0  ;;  %v1664_v61 = vpop.f32.mrf.mxu1  ;;  %v4827_v20 = vadd.f32 %v4215_v19, %v3759_v17  ;;  %v4847_v17 = vadd.f32 %v4405_v52, %v3949_v24 }
 0x27a   :  { %v1194_v52 = vadd.f32 %v4553_v8, %v4094_v46  ;;  %v1195_v24 = vadd.f32 %v4555_v4, %v4096_v49  ;;  %v1191_v46 = vadd.f32 %v6107_v45, %v4085_v38  ;;  %v4883_v4 = vperm.slane %v4856_v31, 0  ;;  %v6108_v8 = vld [vmem:[#allocation32_spill] sm:$0xff] }
 0x27b   :  { %v4886_v49 = vperm.slane %v4856_v31, 1  ;;  %v1186_v7 = vadd.f32 %v6109_v13, %v6108_v8  ;;  %v6119_v13 = vld [vmem:[#allocation97_spill] sm:$0xff] }
 0x280   :  { %v4813_v48 = vpop.f32.mrf.mxu2  ;;  %v4815_v10 = vpop.f32.mrf.mxu3 }
 0x281   :  { %v1578_v9 = vpop.f32.mrf.mxu0  ;;  %v1667_v40 = vpop.f32.mrf.mxu1 }
 0x282   :  { %v1930_v38 = vadd.f32 %v1667_v40, %v1191_v46 }
 0x288   :  { %v4817_v0 = vpop.f32.mrf.mxu2  ;;  %v4819_v26 = vpop.f32.mrf.mxu3 }
 0x289   :  { %v1581_v42 = vpop.f32.mrf.mxu0  ;;  %v1670_v62 = vpop.f32.mrf.mxu1 }
 0x28a   :  { %v1933_v39 = vadd.f32 %v1581_v42, %v1194_v52  ;;  %v1934_v14 = vadd.f32 %v1670_v62, %v1195_v24  ;;  %v6112_v42 = vld [vmem:[#allocation30_spill] sm:$0xff]  ;;  %v6114_v24 = vld [vmem:[#allocation31_spill] sm:$0xff] }
 0x28b   :  { %v6113_v62 = vld [vmem:[#allocation98_spill] sm:$0xff] }
 0x28c   :  { %v1182_v52 = vadd.f32 %v6113_v62, %v6112_v42  ;;  %v2231_v8 = vadd.f32 %v4883_v4, %v1933_v39  ;;  %v2232_v40 = vadd.f32 %v4886_v49, %v1934_v14  ;;  %v6122_v62 = vld [vmem:[#allocation27_spill] sm:$0xff] }
 0x290   :  { %v4821_v29 = vpop.f32.mrf.mxu2  ;;  %v4823_v27 = vpop.f32.mrf.mxu3 }
 0x291   :  { %v1584_v3 = vpop.f32.mrf.mxu0  ;;  %v1673_v15 = vpop.f32.mrf.mxu1 }
 0x292   :  { %v1937_v2 = vadd.f32 %v1584_v3, %v1198_v18  ;;  %v1938_v25 = vadd.f32 %v1673_v15, %v1199_v28  ;;  %v6110_v3 = vld [vmem:[#allocation33_spill] sm:$0xff]  ;;  %v1929_v15 = vadd.f32 %v1578_v9, %v1190_v51  ;;  %v6116_v51 = vld [vmem:[#allocation28_spill] sm:$0xff] }
 0x293   :  { %v1187_v63 = vadd.f32 %v6111_v37, %v6110_v3  ;;  %v1921_v3 = vadd.f32 %v4801_v53, %v1182_v52 }
 0x294   :  { %v2235_v18 = vadd.f32 %v4883_v4, %v1937_v2  ;;  %v2236_v28 = vadd.f32 %v4886_v49, %v1938_v25  ;;  %v6117_v25 = vld [vmem:[#allocation96_spill] sm:$0xff]  ;;  %v2227_v42 = vadd.f32 %v4883_v4, %v1929_v15 }
 0x295   :  { %v1178_v46 = vadd.f32 %v6117_v25, %v6116_v51  ;;  %v6126_v25 = vld [vmem:[#allocation25_spill] sm:$0xff] }
 0x296   :  { %v2332_v39 = vmax.f32 %v2236_v28, 0.0 }
 0x298   :  { %v4874_v44 = vpop.f32.mrf.mxu2  ;;  %v4876_v19 = vpop.f32.mrf.mxu3 }
 0x299   :  { %v1587_v34 = vpop.f32.mrf.mxu0  ;;  %v1676_v5 = vpop.f32.mrf.mxu1 }
 0x29a   :  { %v1941_v36 = vadd.f32 %v1587_v34, %v1202_v35  ;;  %v1942_v1 = vadd.f32 %v1676_v5, %v1203_v59  ;;  %v6115_v35 = vld [vmem:[#allocation99_spill] sm:$0xff]  ;;  %v1925_v34 = vadd.f32 %v1575_v16, %v1186_v7  ;;  %v1926_v5 = vadd.f32 %v1664_v61, %v1187_v63  ;;  %v6121_v63 = vld [vmem:[#allocation94_spill] sm:$0xff] }
 0x29b   :  { %v1183_v59 = vadd.f32 %v6115_v35, %v6114_v24  ;;  %v2228_v16 = vadd.f32 %v4886_v49, %v1930_v38  ;;  %v2331_v61 = vmax.f32 %v2235_v18, 0.0  ;;  %v6123_v24 = vld [vmem:[#allocation95_spill] sm:$0xff]  ;;  %v2327_v35 = vmax.f32 %v2231_v8, 0.0  ;;  %v6128_v8 = vld [vmem:[#allocation22_spill] sm:$0xff] }
 0x29c   :  { %v2239_v45 = vadd.f32 %v4883_v4, %v1941_v36  ;;  %v2240_v11 = vadd.f32 %v4886_v49, %v1942_v1  ;;  %v6118_v36 = vld [vmem:[#allocation29_spill] sm:$0xff]  ;;  %v1175_v53 = vadd.f32 %v6123_v24, %v6122_v62  ;;  %v2223_v18 = vadd.f32 %v4883_v4, %v1925_v34 }
 0x29d   :  { %v1179_v1 = vadd.f32 %v6119_v13, %v6118_v36  ;;  %v1922_v37 = vadd.f32 %v4803_v56, %v1183_v59  ;;  %v1917_v56 = vadd.f32 %v4789_v43, %v1178_v46  ;;  %v2224_v28 = vadd.f32 %v4886_v49, %v1926_v5  ;;  %v6127_v36 = vld [vmem:[#allocation93_spill] sm:$0xff] }
 0x29e   :  { %v2335_v9 = vmax.f32 %v2239_v45, 0.0  ;;  %v2336_v2 = vmax.f32 %v2240_v11, 0.0  ;;  %v6120_v11 = vld [vmem:[#allocation26_spill] sm:$0xff]  ;;  %v2328_v59 = vmax.f32 %v2232_v40, 0.0  ;;  %v1171_v43 = vadd.f32 %v6127_v36, %v6126_v25 }
 0x29f   :  { %v1174_v45 = vadd.f32 %v6121_v63, %v6120_v11  ;;  %v1918_v15 = vadd.f32 %v4791_v60, %v1179_v1  ;;  %v1914_v46 = vadd.f32 %v4779_v30, %v1175_v53  ;;  %v2219_v13 = vadd.f32 %v4883_v4, %v1921_v3  ;;  %v6129_v40 = vld [vmem:[#allocation90_spill] sm:$0xff]  ;;  %v6131_v11 = vld [vmem:[#allocation91_spill] sm:$0xff] }
 0x2a0   :  { %v4910_v7 = vpop.f32.mrf.mxu2  ;;  %v4912_v14 = vpop.f32.mrf.mxu3  ;;  %2569 = vmatpush.msrb.mxu0 %v2335_v9  ;;  %2609 = vmatpush.msrb.mxu2 %v2336_v2  ;;  %v6124_v9 = vld [vmem:[#allocation24_spill] sm:$0xff]  ;;  %v2220_v34 = vadd.f32 %v4886_v49, %v1922_v37  ;;  %v2323_v1 = vmax.f32 %v2227_v42, 0.0  ;;  %v2324_v5 = vmax.f32 %v2228_v16, 0.0  ;;  %v2215_v30 = vadd.f32 %v4883_v4, %v1917_v56  ;;  %v6132_v42 = vld [vmem:[#allocation46_spill] sm:$0xff]  ;;  %v6133_v16 = vld [vmem:[#allocation115_spill] sm:$0xff] }
 0x2a1   :  { %v4920_v52 = vpop.f32.mrf.mxu0  ;;  %v4922_v38 = vpop.f32.mrf.mxu1  ;;  %v6125_v2 = vld [vmem:[#allocation92_spill] sm:$0xff]  ;;  %v1913_v60 = vadd.f32 %v4777_v12, %v1174_v45  ;;  %v1910_v12 = vadd.f32 %v4767_v33, %v1171_v43  ;;  %v2216_v3 = vadd.f32 %v4886_v49, %v1918_v15  ;;  %v2319_v45 = vmax.f32 %v2223_v18, 0.0  ;;  %v6134_v53 = vld [vmem:[#allocation47_spill] sm:$0xff]  ;;  %v6137_v36 = vld [vmem:[#allocation166_spill] sm:$0xff] }
 0x2a2   :  { %2570 = vmatpush.msrb.mxu0 %v2331_v61  ;;  %2610 = vmatpush.msrb.mxu2 %v2332_v39  ;;  %v1170_v51 = vadd.f32 %v6125_v2, %v6124_v9  ;;  %v1166_v61 = vadd.f32 %v6129_v40, %v6128_v8  ;;  %v6130_v39 = vld [vmem:[#allocation23_spill] sm:$0xff]  ;;  %v2320_v37 = vmax.f32 %v2224_v28, 0.0  ;;  %v1208_v24 = vadd.f32 %v6133_v16, %v6132_v42  ;;  %v6141_v8 = vld [vmem:[#allocation84_spill] sm:$0xff] }
 0x2a3   :  { %v1167_v63 = vadd.f32 %v6131_v11, %v6130_v39  ;;  %v2211_v33 = vadd.f32 %v4883_v4, %v1913_v60  ;;  %v2212_v56 = vadd.f32 %v4886_v49, %v1914_v46  ;;  %v2315_v2 = vmax.f32 %v2219_v13, 0.0  ;;  %v6144_v11 = vld [vmem:[#allocation161_spill] sm:$0xff]  ;;  %v6146_v42 = vld [vmem:[#allocation12_spill] sm:$0xff] }
 0x2a4   :  { %2571 = vmatpush.msrb.mxu0 %v2327_v35  ;;  %2611 = vmatpush.msrb.mxu2 %v2328_v59  ;;  %v1909_v62 = vadd.f32 %v4765_v21, %v1170_v51  ;;  %v6135_v35 = vld [vmem:[#allocation116_spill] sm:$0xff]  ;;  %v1905_v9 = vadd.f32 %v4744_v22, %v1166_v61  ;;  %v2316_v15 = vmax.f32 %v2220_v34, 0.0  ;;  %v6136_v51 = vld [vmem:[#allocation165_spill] sm:$0xff]  ;;  %v1902_v43 = vadd.f32 %v6137_v36, %v4864_v23 }
 0x2a5   :  { %v1209_v59 = vadd.f32 %v6135_v35, %v6134_v53  ;;  %v1906_v21 = vadd.f32 %v4746_v47, %v1167_v63  ;;  %v1901_v25 = vadd.f32 %v6136_v51, %v4860_v32  ;;  %v2208_v13 = vadd.f32 %v4886_v49, %v1910_v12  ;;  %v6140_v32 = vld [vmem:[#allocation16_spill] sm:$0xff]  ;;  %v6142_v23 = vld [vmem:[#allocation17_spill] sm:$0xff] }
 0x2a6   :  { %2572 = vmatpush.msrb.mxu0 %v2323_v1  ;;  %2612 = vmatpush.msrb.mxu2 %v2324_v5  ;;  %v2207_v46 = vadd.f32 %v4883_v4, %v1909_v62  ;;  %v2311_v34 = vmax.f32 %v2215_v30, 0.0  ;;  %v2312_v5 = vmax.f32 %v2216_v3, 0.0  ;;  %v1154_v40 = vadd.f32 %v6141_v8, %v6140_v32  ;;  %v6143_v61 = vld [vmem:[#allocation85_spill] sm:$0xff]  ;;  %v6147_v16 = vld [vmem:[#allocation80_spill] sm:$0xff] }
 0x2a7   :  { %v1155_v39 = vadd.f32 %v6143_v61, %v6142_v23  ;;  %v1897_v63 = vadd.f32 %v6144_v11, %v4843_v55  ;;  %v2203_v62 = vadd.f32 %v4883_v4, %v1905_v9  ;;  %v2204_v12 = vadd.f32 %v4886_v49, %v1906_v21  ;;  %v6148_v53 = vld [vmem:[#allocation13_spill] sm:$0xff]  ;;  %v6151_v55 = vld [vmem:[#allocation158_spill] sm:$0xff] }
 0x2a8   :  { %v1768_v18 = vpop.f32.mrf.mxu2  ;;  %v1857_v28 = vpop.f32.mrf.mxu3  ;;  %2573 = vmatpush.msrb.mxu0 %v2319_v45  ;;  %2613 = vmatpush.msrb.mxu2 %v2320_v37  ;;  %v6145_v45 = vld [vmem:[#allocation162_spill] sm:$0xff]  ;;  %v2307_v30 = vmax.f32 %v2211_v33, 0.0  ;;  %v2308_v3 = vmax.f32 %v2212_v56, 0.0  ;;  %v6149_v35 = vld [vmem:[#allocation81_spill] sm:$0xff]  ;;  %v2200_v9 = vadd.f32 %v4886_v49, %v1902_v43  ;;  %v2304_v21 = vmax.f32 %v2208_v13, 0.0  ;;  %v6152_v33 = vld [vmem:[#allocation36_spill] sm:$0xff] }
 0x2a9   :  { %v4954_v1 = vadd.f32 %v1768_v18, %v1208_v24  ;;  %v4956_v22 = vadd.f32 %v1857_v28, %v1209_v59  ;;  %v4958_v47 = vpop.f32.mrf.mxu0  ;;  %v4960_v60 = vpop.f32.mrf.mxu1  ;;  %v1898_v37 = vadd.f32 %v6145_v45, %v4847_v17  ;;  %v1150_v24 = vadd.f32 %v6147_v16, %v6146_v42  ;;  %v6153_v56 = vld [vmem:[#allocation105_spill] sm:$0xff]  ;;  %v6160_v11 = vld [vmem:[#allocation38_spill] sm:$0xff]  ;;  %v6161_v45 = vld [vmem:[#allocation107_spill] sm:$0xff] }
 0x2aa   :  { %2574 = vmatpush.msrb.mxu0 %v2315_v2  ;;  %2614 = vmatpush.msrb.mxu2 %v2316_v15  ;;  %v1151_v59 = vadd.f32 %v6149_v35, %v6148_v53  ;;  %v6150_v2 = vld [vmem:[#allocation157_spill] sm:$0xff]  ;;  %v1894_v18 = vadd.f32 %v6151_v55, %v1155_v39  ;;  %v2199_v17 = vadd.f32 %v4883_v4, %v1901_v25  ;;  %v2303_v28 = vmax.f32 %v2207_v46, 0.0  ;;  %v6163_v42 = vld [vmem:[#allocation108_spill] sm:$0xff] }
 0x2ab   :  { %6138 = vst [vmem:[#allocation104_spill] sm:$0xff] %v4954_v1  ;;  %v1893_v15 = vadd.f32 %v6150_v2, %v1154_v40  ;;  %v4984_v51 = vadd.f32 %v6153_v56, %v6152_v33  ;;  %v6154_v36 = vld [vmem:[#allocation37_spill] sm:$0xff]  ;;  %v6157_v40 = vld [vmem:[#allocation154_spill] sm:$0xff]  ;;  %v2195_v25 = vadd.f32 %v4883_v4, %v1897_v63  ;;  %v2196_v43 = vadd.f32 %v4886_v49, %v1898_v37  ;;  %v6168_v56 = vld [vmem:[#allocation43_spill] sm:$0xff] }
 0x2ac   :  { %6139 = vst [vmem:[#allocation32_spill] sm:$0xff] %v4956_v22  ;;  %2575 = vmatpush.msrb.mxu0 %v2311_v34  ;;  %2615 = vmatpush.msrb.mxu2 %v2312_v5  ;;  %v6155_v34 = vld [vmem:[#allocation106_spill] sm:$0xff]  ;;  %v6156_v32 = vld [vmem:[#allocation153_spill] sm:$0xff]  ;;  %v1890_v23 = vadd.f32 %v6157_v40, %v1151_v59  ;;  %v2299_v46 = vmax.f32 %v2203_v62, 0.0  ;;  %v2300_v13 = vmax.f32 %v2204_v12, 0.0  ;;  %v2192_v59 = vadd.f32 %v4886_v49, %v1894_v18  ;;  %v6240_v22 = vld [vmem:[#allocation64_spill] sm:$0xff] }
 0x2ad   :  { %v4988_v5 = vadd.f32 %v6155_v34, %v6154_v36  ;;  %v1889_v8 = vadd.f32 %v6156_v32, %v1150_v24  ;;  %v6164_v24 = vld [vmem:[#allocation149_spill] sm:$0xff]  ;;  %v6165_v63 = vld [vmem:[#allocation150_spill] sm:$0xff]  ;;  %v2191_v35 = vadd.f32 %v4883_v4, %v1893_v15  ;;  %v2295_v2 = vmax.f32 %v2199_v17, 0.0 }
 0x2ae   :  { %2576 = vmatpush.msrb.mxu0 %v2307_v30  ;;  %2616 = vmatpush.msrb.mxu2 %v2308_v3  ;;  %v1196_v30 = vadd.f32 %v6161_v45, %v6160_v11  ;;  %v6162_v3 = vld [vmem:[#allocation39_spill] sm:$0xff]  ;;  %v1885_v53 = vadd.f32 %v6164_v24, %v4835_v50  ;;  %v1886_v37 = vadd.f32 %v6165_v63, %v4839_v6  ;;  %v2296_v55 = vmax.f32 %v2200_v9, 0.0  ;;  %v6169_v50 = vld [vmem:[#allocation112_spill] sm:$0xff]  ;;  %v6170_v6 = vld [vmem:[#allocation145_spill] sm:$0xff] }
 0x2af   :  { %v1197_v16 = vadd.f32 %v6163_v42, %v6162_v3  ;;  %v1205_v36 = vadd.f32 %v6169_v50, %v6168_v56  ;;  %v1881_v34 = vadd.f32 %v6170_v6, %v4827_v20  ;;  %v6171_v32 = vld [vmem:[#allocation146_spill] sm:$0xff]  ;;  %v2187_v15 = vadd.f32 %v4883_v4, %v1889_v8  ;;  %v6174_v45 = vld [vmem:[#allocation41_spill] sm:$0xff]  ;;  %v6178_v6 = vld [vmem:[#allocation35_spill] sm:$0xff] }
 0x2b0   :  { %v4994_v61 = vpop.f32.mrf.mxu2  ;;  %v4996_v39 = vpop.f32.mrf.mxu3  ;;  %2577 = vmatpush.msrb.mxu0 %v2303_v28  ;;  %2617 = vmatpush.msrb.mxu2 %v2304_v21  ;;  %v6166_v28 = vld [vmem:[#allocation42_spill] sm:$0xff]  ;;  %v6167_v21 = vld [vmem:[#allocation111_spill] sm:$0xff]  ;;  %v1882_v40 = vadd.f32 %v6171_v32, %v4831_v58  ;;  %v2188_v18 = vadd.f32 %v4886_v49, %v1890_v23  ;;  %v2291_v17 = vmax.f32 %v2195_v25, 0.0  ;;  %v2292_v9 = vmax.f32 %v2196_v43, 0.0 }
 0x2b1   :  { %6158 = vst [vmem:[#allocation100_spill] sm:$0xff] %v4994_v61  ;;  %v5006_v62 = vpop.f32.mrf.mxu0  ;;  %v5008_v12 = vpop.f32.mrf.mxu1  ;;  %v1204_v33 = vadd.f32 %v6167_v21, %v6166_v28  ;;  %v6175_v3 = vld [vmem:[#allocation110_spill] sm:$0xff]  ;;  %v1944_v20 = vadd.f32 %v4912_v14, %v1205_v36  ;;  %v2183_v58 = vadd.f32 %v4883_v4, %v1885_v53  ;;  %v2184_v8 = vadd.f32 %v4886_v49, %v1886_v37 }
 0x2b2   :  { %6159 = vst [vmem:[#allocation33_spill] sm:$0xff] %v4996_v39  ;;  %2578 = vmatpush.msrb.mxu0 %v2299_v46  ;;  %2618 = vmatpush.msrb.mxu2 %v2300_v13  ;;  %v6172_v46 = vld [vmem:[#allocation40_spill] sm:$0xff]  ;;  %v6173_v13 = vld [vmem:[#allocation109_spill] sm:$0xff]  ;;  %v1201_v42 = vadd.f32 %v6175_v3, %v6174_v45  ;;  %v2287_v23 = vmax.f32 %v2191_v35, 0.0  ;;  %v2288_v63 = vmax.f32 %v2192_v59, 0.0  ;;  %v5031_v25 = vperm.slane %v4856_v31, 2 }
 0x2b3   :  { %v1200_v11 = vadd.f32 %v6173_v13, %v6172_v46  ;;  %v1943_v24 = vadd.f32 %v4910_v7, %v1204_v33  ;;  %v5034_v43 = vperm.slane %v4856_v31, 3  ;;  %v2179_v14 = vadd.f32 %v4883_v4, %v1881_v34  ;;  %v6176_v56 = vld [vmem:[#allocation34_spill] sm:$0xff]  ;;  %v6179_v34 = vld [vmem:[#allocation103_spill] sm:$0xff] }
 0x2b4   :  { %2579 = vmatpush.msrb.mxu0 %v2295_v2  ;;  %2619 = vmatpush.msrb.mxu2 %v2296_v55  ;;  %v1940_v7 = vadd.f32 %v4876_v19, %v1201_v42  ;;  %v2180_v53 = vadd.f32 %v4886_v49, %v1882_v40  ;;  %v2283_v35 = vmax.f32 %v2187_v15, 0.0  ;;  %v2284_v59 = vmax.f32 %v2188_v18, 0.0  ;;  %v6177_v50 = vld [vmem:[#allocation102_spill] sm:$0xff] }
 0x2b5   :  { %v1939_v2 = vadd.f32 %v4874_v44, %v1200_v11  ;;  %v1935_v28 = vadd.f32 %v4821_v29, %v1196_v30  ;;  %v1936_v31 = vadd.f32 %v4823_v27, %v1197_v16  ;;  %v2241_v44 = vadd.f32 %v5031_v25, %v1943_v24 }
 0x2b6   :  { %2580 = vmatpush.msrb.mxu0 %v2291_v17  ;;  %2620 = vmatpush.msrb.mxu2 %v2292_v9  ;;  %v2242_v19 = vadd.f32 %v5034_v43, %v1944_v20  ;;  %v1188_v36 = vadd.f32 %v6177_v50, %v6176_v56  ;;  %v1189_v32 = vadd.f32 %v6179_v34, %v6178_v6  ;;  %v2279_v40 = vmax.f32 %v2183_v58, 0.0  ;;  %v6183_v56 = vld [vmem:[#allocation9_spill] sm:$0xff]  ;;  %v6186_v6 = vld [vmem:[#allocation78_spill] sm:$0xff] }
 0x2b7   :  { %v2280_v29 = vmax.f32 %v2184_v8, 0.0  ;;  %v1931_v27 = vadd.f32 %v4817_v0, %v4984_v51  ;;  %v1932_v30 = vadd.f32 %v4819_v26, %v4988_v5  ;;  %v2237_v16 = vadd.f32 %v5031_v25, %v1939_v2 }
 0x2b8   :  { %v5040_v55 = vpop.f32.mrf.mxu2  ;;  %v5042_v37 = vpop.f32.mrf.mxu3  ;;  %2581 = vmatpush.msrb.mxu0 %v2287_v23  ;;  %2621 = vmatpush.msrb.mxu2 %v2288_v63  ;;  %v2238_v15 = vadd.f32 %v5034_v43, %v1940_v7  ;;  %v1927_v18 = vadd.f32 %v4813_v48, %v1188_v36  ;;  %v1928_v17 = vadd.f32 %v4815_v10, %v1189_v32  ;;  %v2275_v9 = vmax.f32 %v2179_v14, 0.0  ;;  %v6185_v36 = vld [vmem:[#allocation10_spill] sm:$0xff]  ;;  %v6187_v32 = vld [vmem:[#allocation173_spill] sm:$0xff] }
 0x2b9   :  { %v5048_v21 = vpop.f32.mrf.mxu0  ;;  %v5050_v33 = vpop.f32.mrf.mxu1  ;;  %v2276_v46 = vmax.f32 %v2180_v53, 0.0  ;;  %v2233_v13 = vadd.f32 %v5031_v25, %v1935_v28  ;;  %v2234_v11 = vadd.f32 %v5034_v43, %v1936_v31  ;;  %v2337_v0 = vmax.f32 %v2241_v44, 0.0  ;;  %v6181_v44 = vld [vmem:[#allocation8_spill] sm:$0xff] }
 0x2ba   :  { %2582 = vmatpush.msrb.mxu0 %v2283_v35  ;;  %2622 = vmatpush.msrb.mxu2 %v2284_v59  ;;  %v2338_v51 = vmax.f32 %v2242_v19, 0.0  ;;  %v2229_v26 = vadd.f32 %v5031_v25, %v1931_v27  ;;  %v2230_v5 = vadd.f32 %v5034_v43, %v1932_v30  ;;  %v2333_v45 = vmax.f32 %v2237_v16, 0.0  ;;  %v6180_v35 = vld [vmem:[#allocation175_spill] sm:$0xff]  ;;  %v6182_v19 = vld [vmem:[#allocation76_spill] sm:$0xff] }
 0x2bb   :  { %v2334_v48 = vmax.f32 %v2238_v15, 0.0  ;;  %v2225_v42 = vadd.f32 %v5031_v25, %v1927_v18  ;;  %v2226_v24 = vadd.f32 %v5034_v43, %v1928_v17  ;;  %v2329_v20 = vmax.f32 %v2233_v13, 0.0  ;;  %v6189_v16 = vld [vmem:[#allocation11_spill] sm:$0xff]  ;;  %v6191_v17 = vld [vmem:[#allocation14_spill] sm:$0xff]  ;;  %v6193_v13 = vld [vmem:[#allocation20_spill] sm:$0xff] }
 0x2bc   :  { %2583 = vmatpush.msrb.mxu0 %v2279_v40  ;;  %2623 = vmatpush.msrb.mxu2 %v2280_v29  ;;  %v2330_v58 = vmax.f32 %v2234_v11, 0.0  ;;  %v2221_v63 = vadd.f32 %v5031_v25, %v4809_v54  ;;  %v2222_v2 = vadd.f32 %v5034_v43, %v4811_v57  ;;  %v2325_v7 = vmax.f32 %v2229_v26, 0.0  ;;  %v6184_v57 = vld [vmem:[#allocation77_spill] sm:$0xff]  ;;  %v6188_v40 = vld [vmem:[#allocation174_spill] sm:$0xff]  ;;  %v6190_v15 = vld [vmem:[#allocation79_spill] sm:$0xff] }
 0x2bd   :  { %v2326_v14 = vmax.f32 %v2230_v5, 0.0  ;;  %v2217_v53 = vadd.f32 %v5031_v25, %v4797_v41  ;;  %v2218_v59 = vadd.f32 %v5034_v43, %v6180_v35  ;;  %v2321_v28 = vmax.f32 %v2225_v42, 0.0  ;;  %v6194_v11 = vld [vmem:[#allocation88_spill] sm:$0xff]  ;;  %v6196_v26 = vld [vmem:[#allocation89_spill] sm:$0xff]  ;;  %v6197_v42 = vld [vmem:[#allocation171_spill] sm:$0xff] }
 0x2be   :  { %2584 = vmatpush.msrb.mxu0 %v2275_v9  ;;  %2624 = vmatpush.msrb.mxu2 %v2276_v46  ;;  %v2322_v31 = vmax.f32 %v2226_v24, 0.0  ;;  %v5088_v54 = vadd.f32 %v6182_v19, %v6181_v44  ;;  %v5092_v50 = vadd.f32 %v6184_v57, %v6183_v56  ;;  %v1148_v34 = vadd.f32 %v6186_v6, %v6185_v36  ;;  %v6192_v9 = vld [vmem:[#allocation82_spill] sm:$0xff]  ;;  %v6201_v44 = vld [vmem:[#allocation19_spill] sm:$0xff]  ;;  %v6204_v6 = vld [vmem:[#allocation164_spill] sm:$0xff] }
 0x2bf   :  { %v2213_v41 = vadd.f32 %v5031_v25, %v6187_v32  ;;  %v2214_v29 = vadd.f32 %v5034_v43, %v6188_v40  ;;  %v2317_v27 = vmax.f32 %v2221_v63, 0.0  ;;  %v2318_v30 = vmax.f32 %v2222_v2, 0.0  ;;  %v6199_v35 = vld [vmem:[#allocation18_spill] sm:$0xff]  ;;  %v6202_v19 = vld [vmem:[#allocation87_spill] sm:$0xff]  ;;  %v6205_v40 = vld [vmem:[#allocation169_spill] sm:$0xff] }
 0x2c0   :  { %2649 = vmatpush.msra.mxu0 %v2337_v0  ;;  %2689 = vmatpush.msra.mxu2 %v2338_v51  ;;  %v5068_v10 = vpop.f32.mrf.mxu2  ;;  %v5070_v3 = vpop.f32.mrf.mxu3  ;;  %v1149_v18 = vadd.f32 %v6190_v15, %v6189_v16  ;;  %v1152_v46 = vadd.f32 %v6192_v9, %v6191_v17  ;;  %v1160_v0 = vadd.f32 %v6194_v11, %v6193_v13  ;;  %v6195_v51 = vld [vmem:[#allocation21_spill] sm:$0xff]  ;;  %v2313_v63 = vmax.f32 %v2217_v53, 0.0  ;;  %v6203_v57 = vld [vmem:[#allocation163_spill] sm:$0xff]  ;;  %v6209_v13 = vld [vmem:[#allocation44_spill] sm:$0xff] }
 0x2c1   :  { %v5074_v8 = vpop.f32.mrf.mxu0  ;;  %v5076_v23 = vpop.f32.mrf.mxu1  ;;  %v1161_v5 = vadd.f32 %v6196_v26, %v6195_v51  ;;  %v2209_v24 = vadd.f32 %v5031_v25, %v6197_v42  ;;  %v2314_v2 = vmax.f32 %v2218_v59, 0.0  ;;  %v1157_v56 = vadd.f32 %v6202_v19, %v6201_v44  ;;  %v6206_v59 = vld [vmem:[#allocation170_spill] sm:$0xff]  ;;  %v6210_v11 = vld [vmem:[#allocation113_spill] sm:$0xff] }
 0x2c2   :  { %2650 = vmatpush.msra.mxu0 %v2333_v45  ;;  %2690 = vmatpush.msra.mxu2 %v2334_v48  ;;  %v1899_v36 = vadd.f32 %v6203_v57, %v1160_v0  ;;  %v2205_v53 = vadd.f32 %v5031_v25, %v6205_v40  ;;  %v2206_v16 = vadd.f32 %v5034_v43, %v6206_v59  ;;  %v2309_v15 = vmax.f32 %v2213_v41, 0.0  ;;  %v6211_v0 = vld [vmem:[#allocation159_spill] sm:$0xff]  ;;  %v6216_v44 = vld [vmem:[#allocation114_spill] sm:$0xff]  ;;  %v6217_v57 = vld [vmem:[#allocation48_spill] sm:$0xff] }
 0x2c3   :  { %v1900_v32 = vadd.f32 %v6204_v6, %v1161_v5  ;;  %v2310_v17 = vmax.f32 %v2214_v29, 0.0  ;;  %v5134_v51 = vadd.f32 %v6210_v11, %v6209_v13  ;;  %v6212_v5 = vld [vmem:[#allocation160_spill] sm:$0xff]  ;;  %v2305_v29 = vmax.f32 %v2209_v24, 0.0  ;;  %v6218_v6 = vld [vmem:[#allocation117_spill] sm:$0xff] }
 0x2c4   :  { %2651 = vmatpush.msra.mxu0 %v2329_v20  ;;  %2691 = vmatpush.msra.mxu2 %v2330_v58  ;;  %v6198_v20 = vld [vmem:[#allocation172_spill] sm:$0xff]  ;;  %v1896_v42 = vadd.f32 %v6212_v5, %v1157_v56  ;;  %v5148_v40 = vadd.f32 %v6218_v6, %v6217_v57  ;;  %v2301_v24 = vmax.f32 %v2205_v53, 0.0  ;;  %v6224_v5 = vld [vmem:[#allocation119_spill] sm:$0xff] }
 0x2c5   :  { %v2210_v58 = vadd.f32 %v5034_v43, %v6198_v20  ;;  %v6213_v20 = vld [vmem:[#allocation167_spill] sm:$0xff]  ;;  %v6220_v59 = vld [vmem:[#allocation156_spill] sm:$0xff]  ;;  %v2198_v13 = vadd.f32 %v5034_v43, %v1900_v32 }
 0x2c6   :  { %2652 = vmatpush.msra.mxu0 %v2325_v7  ;;  %2692 = vmatpush.msra.mxu2 %v2326_v14  ;;  %v2194_v53 = vadd.f32 %v5034_v43, %v1896_v42  ;;  %v6228_v6 = vld [vmem:[#allocation52_spill] sm:$0xff] }
 0x2c8   :  { %2653 = vmatpush.msra.mxu0 %v2321_v28  ;;  %2693 = vmatpush.msra.mxu2 %v2322_v31  ;;  %v5108_v45 = vpop.f32.mrf.mxu2  ;;  %v5110_v48 = vpop.f32.mrf.mxu3  ;;  %v6200_v28 = vld [vmem:[#allocation86_spill] sm:$0xff] }
 0x2c9   :  { %v5116_v7 = vpop.f32.mrf.mxu0  ;;  %v5118_v14 = vpop.f32.mrf.mxu1  ;;  %v1156_v31 = vadd.f32 %v6200_v28, %v6199_v35  ;;  %v2201_v35 = vadd.f32 %v5031_v25, %v6213_v20  ;;  %v6214_v28 = vld [vmem:[#allocation168_spill] sm:$0xff] }
 0x2ca   :  { %2654 = vmatpush.msra.mxu0 %v2317_v27  ;;  %2694 = vmatpush.msra.mxu2 %v2318_v30  ;;  %v6207_v27 = vld [vmem:[#allocation15_spill] sm:$0xff]  ;;  %v2202_v41 = vadd.f32 %v5034_v43, %v6214_v28 }
 0x2cb   :  { %v6208_v30 = vld [vmem:[#allocation83_spill] sm:$0xff]  ;;  %v1895_v26 = vadd.f32 %v6211_v0, %v1156_v31  ;;  %v6223_v0 = vld [vmem:[#allocation50_spill] sm:$0xff] }
 0x2cc   :  { %2655 = vmatpush.msra.mxu0 %v2313_v63  ;;  %2695 = vmatpush.msra.mxu2 %v2314_v2  ;;  %v1153_v9 = vadd.f32 %v6208_v30, %v6207_v27  ;;  %v2306_v63 = vmax.f32 %v2210_v58, 0.0  ;;  %v6215_v2 = vld [vmem:[#allocation45_spill] sm:$0xff]  ;;  %v6219_v31 = vld [vmem:[#allocation155_spill] sm:$0xff]  ;;  %v2197_v30 = vadd.f32 %v5031_v25, %v1899_v36  ;;  %v2302_v58 = vmax.f32 %v2206_v16, 0.0 }
 0x2cd   :  { %v5144_v19 = vadd.f32 %v6216_v44, %v6215_v2  ;;  %v1891_v56 = vadd.f32 %v6219_v31, %v1152_v46  ;;  %v5160_v20 = vadd.f32 %v6224_v5, %v6223_v0  ;;  %v6226_v28 = vld [vmem:[#allocation151_spill] sm:$0xff]  ;;  %v6227_v2 = vld [vmem:[#allocation152_spill] sm:$0xff]  ;;  %v2193_v32 = vadd.f32 %v5031_v25, %v1895_v26  ;;  %v6229_v31 = vld [vmem:[#allocation121_spill] sm:$0xff] }
 0x2ce   :  { %2656 = vmatpush.msra.mxu0 %v2309_v15  ;;  %2696 = vmatpush.msra.mxu2 %v2310_v17  ;;  %v1892_v27 = vadd.f32 %v6220_v59, %v1153_v9  ;;  %v6221_v15 = vld [vmem:[#allocation49_spill] sm:$0xff]  ;;  %v6222_v17 = vld [vmem:[#allocation118_spill] sm:$0xff]  ;;  %v1887_v46 = vadd.f32 %v6226_v28, %v1148_v34  ;;  %v1888_v9 = vadd.f32 %v6227_v2, %v1149_v18  ;;  %v2297_v16 = vmax.f32 %v2201_v35, 0.0  ;;  %v6233_v26 = vld [vmem:[#allocation148_spill] sm:$0xff] }
 0x2cf   :  { %v5156_v11 = vadd.f32 %v6222_v17, %v6221_v15  ;;  %6225 = vst [vmem:[#allocation101_spill] sm:$0xff] %v5160_v20  ;;  %v5172_v59 = vadd.f32 %v6229_v31, %v6228_v6  ;;  %v6230_v34 = vld [vmem:[#allocation53_spill] sm:$0xff]  ;;  %v6231_v18 = vld [vmem:[#allocation122_spill] sm:$0xff]  ;;  %v6232_v17 = vld [vmem:[#allocation147_spill] sm:$0xff]  ;;  %v1884_v42 = vadd.f32 %v6233_v26, %v5092_v50  ;;  %v2189_v35 = vadd.f32 %v5031_v25, %v1891_v56 }
 0x2d0   :  { %2657 = vmatpush.msra.mxu0 %v2305_v29  ;;  %2697 = vmatpush.msra.mxu2 %v2306_v63  ;;  %v5164_v44 = vpop.f32.mrf.mxu2  ;;  %v5166_v36 = vpop.f32.mrf.mxu3  ;;  %v2298_v29 = vmax.f32 %v2202_v41, 0.0  ;;  %v5176_v15 = vadd.f32 %v6231_v18, %v6230_v34  ;;  %v1883_v0 = vadd.f32 %v6232_v17, %v5088_v54  ;;  %v2190_v41 = vadd.f32 %v5034_v43, %v1892_v27  ;;  %v6234_v5 = vld [vmem:[#allocation54_spill] sm:$0xff]  ;;  %v6235_v28 = vld [vmem:[#allocation123_spill] sm:$0xff]  ;;  %v6236_v6 = vld [vmem:[#allocation56_spill] sm:$0xff] }
 0x2d1   :  { %v1608_v63 = vpop.f32.mrf.mxu0  ;;  %v1697_v57 = vpop.f32.mrf.mxu1  ;;  %v5186_v2 = vadd.f32 %v6235_v28, %v6234_v5  ;;  %v6237_v31 = vld [vmem:[#allocation125_spill] sm:$0xff]  ;;  %v6239_v54 = vld [vmem:[#allocation126_spill] sm:$0xff]  ;;  %v2467_v56 = vld [vmem:[%s5923_s4] sm:$0xff]  ;;  %v2185_v27 = vadd.f32 %v5031_v25, %v1887_v46  ;;  %v2182_v46 = vadd.f32 %v5034_v43, %v1884_v42 }
 0x2d2   :  { %2658 = vmatpush.msra.mxu0 %v2301_v24  ;;  %2698 = vmatpush.msra.mxu2 %v2302_v58  ;;  %v2293_v24 = vmax.f32 %v2197_v30, 0.0  ;;  %v2294_v58 = vmax.f32 %v2198_v13, 0.0  ;;  %v1218_v34 = vadd.f32 %v6237_v31, %v6236_v6  ;;  %v6238_v18 = vld [vmem:[#allocation57_spill] sm:$0xff]  ;;  %v2186_v30 = vadd.f32 %v5034_v43, %v1888_v9  ;;  %v6243_v5 = vld [vmem:[#allocation134_spill] sm:$0xff]  ;;  %v6244_v6 = vld [vmem:[#allocation68_spill] sm:$0xff] }
 0x2d3   :  { %v1219_v17 = vadd.f32 %v6239_v54, %v6238_v18  ;;  %v6241_v50 = vld [vmem:[#allocation133_spill] sm:$0xff]  ;;  %v2289_v13 = vmax.f32 %v2193_v32, 0.0  ;;  %2625 = vmatmul.f32.vlgmr.msrb.gmra.mxu2 %v2467_v56  ;;  %2585 = vmatmul.f32.vlgmr.msrb.gmra.mxu0 %v2467_v56  ;;  %v2181_v1 = vadd.f32 %v5031_v25, %v1883_v0  ;;  %v2285_v9 = vmax.f32 %v2189_v35, 0.0 }
 0x2d4   :  { %2659 = vmatpush.msra.mxu0 %v2297_v16  ;;  %2699 = vmatpush.msra.mxu2 %v2298_v29  ;;  %v1226_v26 = vadd.f32 %v6241_v50, %v6240_v22  ;;  %v2290_v16 = vmax.f32 %v2194_v53, 0.0  ;;  %v6242_v29 = vld [vmem:[#allocation65_spill] sm:$0xff]  ;;  %v6247_v22 = vld [vmem:[#allocation138_spill] sm:$0xff]  ;;  %v2286_v32 = vmax.f32 %v2190_v41, 0.0  ;;  %v6248_v53 = vld [vmem:[#allocation72_spill] sm:$0xff] }
 0x2d5   :  { %v1227_v28 = vadd.f32 %v6243_v5, %v6242_v29  ;;  %v6245_v31 = vld [vmem:[#allocation137_spill] sm:$0xff]  ;;  %v6251_v5 = vld [vmem:[#allocation142_spill] sm:$0xff] }
 0x2d6   :  { %2660 = vmatpush.msra.mxu0 %v2293_v24  ;;  %2700 = vmatpush.msra.mxu2 %v2294_v58  ;;  %v1230_v18 = vadd.f32 %v6245_v31, %v6244_v6  ;;  %v6246_v54 = vld [vmem:[#allocation69_spill] sm:$0xff] }
 0x2d7   :  { %v1231_v50 = vadd.f32 %v6247_v22, %v6246_v54  ;;  %v6249_v24 = vld [vmem:[#allocation141_spill] sm:$0xff]  ;;  %v6252_v22 = vld [vmem:[#allocation60_spill] sm:$0xff] }
 0x2d8   :  { %2661 = vmatpush.msra.mxu0 %v2289_v13  ;;  %2701 = vmatpush.msra.mxu2 %v2290_v16  ;;  %v1234_v58 = vadd.f32 %v6249_v24, %v6248_v53  ;;  %v6250_v29 = vld [vmem:[#allocation73_spill] sm:$0xff]  ;;  %v1969_v6 = vadd.f32 %v1608_v63, %v1230_v18  ;;  %v5211_v61 = vpop.f32.mrf.mxu2  ;;  %v5213_v54 = vpop.f32.mrf.mxu3  ;;  %v6255_v13 = vld [vmem:[#allocation130_spill] sm:$0xff]  ;;  %v2281_v53 = vmax.f32 %v2185_v27, 0.0  ;;  %v2282_v24 = vmax.f32 %v2186_v30, 0.0 }
 0x2d9   :  { %v1235_v39 = vadd.f32 %v6251_v5, %v6250_v29  ;;  %v1970_v31 = vadd.f32 %v1697_v57, %v1231_v50  ;;  %v6253_v0 = vld [vmem:[#allocation129_spill] sm:$0xff]  ;;  %v1611_v35 = vpop.f32.mrf.mxu0  ;;  %v1700_v41 = vpop.f32.mrf.mxu1  ;;  %v1965_v29 = vadd.f32 %v5116_v7, %v1226_v26  ;;  %v1966_v63 = vadd.f32 %v5118_v14, %v1227_v28  ;;  %v6256_v26 = vld [vmem:[#allocation55_spill] sm:$0xff]  ;;  %v6257_v14 = vld [vmem:[#allocation124_spill] sm:$0xff] }
 0x2da   :  { %v1222_v20 = vadd.f32 %v6253_v0, %v6252_v22  ;;  %v6254_v42 = vld [vmem:[#allocation61_spill] sm:$0xff]  ;;  %2662 = vmatpush.msra.mxu0 %v2285_v9  ;;  %2702 = vmatpush.msra.mxu2 %v2286_v32  ;;  %v1973_v57 = vadd.f32 %v1611_v35, %v1234_v58  ;;  %v2277_v22 = vmax.f32 %v2181_v1, 0.0  ;;  %v2278_v0 = vmax.f32 %v2182_v46, 0.0  ;;  %v6258_v46 = vld [vmem:[#allocation58_spill] sm:$0xff]  ;;  %v6259_v32 = vld [vmem:[#allocation127_spill] sm:$0xff] }
 0x2db   :  { %v1223_v16 = vadd.f32 %v6255_v13, %v6254_v42  ;;  %v1974_v18 = vadd.f32 %v1700_v41, %v1235_v39  ;;  %v2267_v42 = vadd.f32 %v4883_v4, %v1969_v6  ;;  %v2268_v9 = vadd.f32 %v4886_v49, %v1970_v31  ;;  %v6260_v6 = vld [vmem:[#allocation62_spill] sm:$0xff]  ;;  %v6261_v31 = vld [vmem:[#allocation131_spill] sm:$0xff]  ;;  %v6263_v41 = vld [vmem:[#allocation132_spill] sm:$0xff] }
 0x2dc   :  { %v1961_v50 = vadd.f32 %v5074_v8, %v1222_v20  ;;  %2663 = vmatpush.msra.mxu0 %v2281_v53  ;;  %2703 = vmatpush.msra.mxu2 %v2282_v24  ;;  %v2271_v27 = vadd.f32 %v4883_v4, %v1973_v57  ;;  %v5229_v30 = vadd.f32 %v6257_v14, %v6256_v26  ;;  %v6262_v35 = vld [vmem:[#allocation63_spill] sm:$0xff]  ;;  %v6264_v24 = vld [vmem:[#allocation66_spill] sm:$0xff] }
 0x2dd   :  { %v1962_v5 = vadd.f32 %v5076_v23, %v1223_v16  ;;  %v2272_v7 = vadd.f32 %v4886_v49, %v1974_v18  ;;  %v1957_v39 = vadd.f32 %v5048_v21, %v1218_v34  ;;  %v1958_v8 = vadd.f32 %v5050_v33, %v1219_v17 }
 0x2de   :  { %2664 = vmatpush.msra.mxu0 %v2277_v22  ;;  %2704 = vmatpush.msra.mxu2 %v2278_v0  ;;  %v2263_v1 = vadd.f32 %v4883_v4, %v1965_v29  ;;  %v2264_v23 = vadd.f32 %v4886_v49, %v1966_v63  ;;  %v2367_v20 = vmax.f32 %v2271_v27, 0.0  ;;  %v5237_v58 = vadd.f32 %v6259_v32, %v6258_v46  ;;  %v6265_v29 = vld [vmem:[#allocation135_spill] sm:$0xff]  ;;  %v6266_v22 = vld [vmem:[#allocation74_spill] sm:$0xff]  ;;  %v6269_v27 = vld [vmem:[#allocation144_spill] sm:$0xff] }
 0x2df   :  { %v2368_v28 = vmax.f32 %v2272_v7, 0.0  ;;  %2705 = vmatmul.f32.vlgmr.msra.gmra.mxu2 %v2467_v56  ;;  %2665 = vmatmul.f32.vlgmr.msra.gmra.mxu0 %v2467_v56  ;;  %v5241_v13 = vadd.f32 %v6261_v31, %v6260_v6  ;;  %v1953_v21 = vadd.f32 %v5006_v62, %v5172_v59  ;;  %v1954_v33 = vadd.f32 %v5008_v12, %v5176_v15  ;;  %v6267_v0 = vld [vmem:[#allocation143_spill] sm:$0xff] }
 0x2e0   :  { %v2259_v34 = vadd.f32 %v4883_v4, %v1961_v50  ;;  %v2260_v17 = vadd.f32 %v4886_v49, %v1962_v5  ;;  %v2363_v16 = vmax.f32 %v2267_v42, 0.0  ;;  %v2364_v56 = vmax.f32 %v2268_v9, 0.0  ;;  %2597 = vmatpush.msrb.mxu1 %v2367_v20  ;;  %v1789_v50 = vpop.f32.mrf.mxu2  ;;  %v1878_v5 = vpop.f32.mrf.mxu3  ;;  %v6268_v9 = vld [vmem:[#allocation75_spill] sm:$0xff] }
 0x2e1   :  { %2637 = vmatpush.msrb.mxu3 %v2368_v28  ;;  %v1225_v53 = vadd.f32 %v6263_v41, %v6262_v35  ;;  %v1228_v63 = vadd.f32 %v6265_v29, %v6264_v24  ;;  %v1949_v62 = vadd.f32 %v4958_v47, %v5148_v40  ;;  %v1950_v12 = vadd.f32 %v4960_v60, %v5156_v11  ;;  %v2792_v40 = vld [vmem:[%s5922_s3 + $0x1f8] sm:$0xff]  ;;  %v2790_v41 = vld [vmem:[%s5922_s3 + $0x1e8] sm:$0xff] }
 0x2e2   :  { %v2255_v59 = vadd.f32 %v4883_v4, %v1957_v39  ;;  %v2256_v15 = vadd.f32 %v4886_v49, %v1958_v8  ;;  %v2359_v57 = vmax.f32 %v2263_v1, 0.0  ;;  %v2360_v18 = vmax.f32 %v2264_v23, 0.0  ;;  %2598 = vmatpush.msrb.mxu1 %v2363_v16  ;;  %v6270_v8 = vld [vmem:[#allocation70_spill] sm:$0xff]  ;;  %v6271_v1 = vld [vmem:[#allocation139_spill] sm:$0xff]  ;;  %2853 = vmatpush.msrb.mxu2 %v2792_v40 }
 0x2e3   :  { %2638 = vmatpush.msrb.mxu3 %v2364_v56  ;;  %v1236_v42 = vadd.f32 %v6267_v0, %v6266_v22  ;;  %v1237_v7 = vadd.f32 %v6269_v27, %v6268_v9  ;;  %v1945_v47 = vadd.f32 %v4920_v52, %v5134_v51  ;;  %v1946_v60 = vadd.f32 %v4922_v38, %v5144_v19  ;;  %v6272_v20 = vld [vmem:[#allocation71_spill] sm:$0xff]  ;;  %v6273_v52 = vld [vmem:[#allocation140_spill] sm:$0xff]  ;;  %v2791_v19 = vld [vmem:[%s5922_s3 + $0x1f0] sm:$0xff] }
 0x2e4   :  { %v2251_v11 = vadd.f32 %v4883_v4, %v1953_v21  ;;  %v2252_v26 = vadd.f32 %v4886_v49, %v1954_v33  ;;  %v2355_v14 = vmax.f32 %v2259_v34, 0.0  ;;  %v2356_v39 = vmax.f32 %v2260_v17, 0.0  ;;  %2599 = vmatpush.msrb.mxu1 %v2359_v57  ;;  %v6274_v21 = vld [vmem:[#allocation67_spill] sm:$0xff]  ;;  %v6275_v33 = vld [vmem:[#allocation136_spill] sm:$0xff]  ;;  %2854 = vmatpush.msrb.mxu2 %v2791_v19 }
 0x2e5   :  { %2639 = vmatpush.msrb.mxu3 %v2360_v18  ;;  %v1232_v23 = vadd.f32 %v6271_v1, %v6270_v8  ;;  %v1233_v51 = vadd.f32 %v6273_v52, %v6272_v20  ;;  %v1975_v28 = vadd.f32 %v1789_v50, %v1236_v42  ;;  %v1976_v38 = vadd.f32 %v1878_v5, %v1237_v7  ;;  %v2776_v35 = vld [vmem:[%s5922_s3 + $0x178] sm:$0xff]  ;;  %v2774_v42 = vld [vmem:[%s5922_s3 + $0x168] sm:$0xff]  ;;  %v2773_v1 = vld [vmem:[%s5922_s3 + $0x160] sm:$0xff] }
 0x2e6   :  { %v2247_v46 = vadd.f32 %v4883_v4, %v1949_v62  ;;  %v2248_v32 = vadd.f32 %v4886_v49, %v1950_v12  ;;  %v2351_v6 = vmax.f32 %v2255_v59, 0.0  ;;  %v2352_v31 = vmax.f32 %v2256_v15, 0.0  ;;  %2600 = vmatpush.msrb.mxu1 %v2355_v14  ;;  %2833 = vmatpush.msrb.mxu0 %v2776_v35  ;;  %v2775_v59 = vld [vmem:[%s5922_s3 + $0x170] sm:$0xff]  ;;  %v6276_v15 = vld [vmem:[#allocation59_spill] sm:$0xff] }
 0x2e7   :  { %2640 = vmatpush.msrb.mxu3 %v2356_v39  ;;  %v1229_v34 = vadd.f32 %v6275_v33, %v6274_v21  ;;  %v2243_v17 = vadd.f32 %v4883_v4, %v1945_v47  ;;  %v1971_v16 = vadd.f32 %v5211_v61, %v1232_v23  ;;  %v1972_v56 = vadd.f32 %v5213_v54, %v1233_v51  ;;  %v2788_v9 = vld [vmem:[%s5922_s3 + $0x1d8] sm:$0xff]  ;;  %v6282_v23 = vld [vmem:[#allocation33_spill] sm:$0xff] }
 0x2e8   :  { %v2244_v24 = vadd.f32 %v4886_v49, %v1946_v60  ;;  %v2347_v29 = vmax.f32 %v2251_v11, 0.0  ;;  %v2348_v62 = vmax.f32 %v2252_v26, 0.0  ;;  %v1967_v12 = vadd.f32 %v5164_v44, %v1228_v63  ;;  %2601 = vmatpush.msrb.mxu1 %v2351_v6  ;;  %2855 = vmatpush.msrb.mxu2 %v2790_v41  ;;  %v2789_v49 = vld [vmem:[%s5922_s3 + $0x1e0] sm:$0xff]  ;;  %v5324_v60 = vld [vmem:[%s5923_s4 + $0x8] sm:$0xff]  ;;  %v2772_v19 = vld [vmem:[%s5922_s3 + $0x158] sm:$0xff]  ;;  %s3430_s4 = smov [#allocation5]  }
 0x2e9   :  { %2641 = vmatpush.msrb.mxu3 %v2352_v31  ;;  %v1968_v4 = vadd.f32 %v5166_v36, %v1229_v34  ;;  %v2273_v61 = vadd.f32 %v5031_v25, %v1975_v28  ;;  %v2274_v54 = vadd.f32 %v5034_v43, %v1976_v38  ;;  %v6277_v44 = vld [vmem:[#allocation128_spill] sm:$0xff]  ;;  %v2343_v57 = vmax.f32 %v2247_v46, 0.0  ;;  %2834 = vmatpush.msrb.mxu0 %v2775_v59  ;;  %v6278_v40 = vld [vmem:[#allocation51_spill] sm:$0xff]  ;;  %v2771_v33 = vld [vmem:[%s5922_s3 + $0x150] sm:$0xff]  ;;  %s3244_s20 = sshll.u32 %s3430_s4, 4  ;;  %s3245_s20 = int_to_ptr.vmem [resolvable:$true] %s3244_s20 }
 0x2ea   :  { %v1221_v63 = vadd.f32 %v6277_v44, %v6276_v15  ;;  %v2344_v18 = vmax.f32 %v2248_v32, 0.0  ;;  %v1963_v36 = vadd.f32 %v5108_v45, %v5241_v13  ;;  %2602 = vmatpush.msrb.mxu1 %v2347_v29  ;;  %v2339_v50 = vmax.f32 %v2243_v17, 0.0  ;;  %2856 = vmatpush.msrb.mxu2 %v2789_v49  ;;  %v2786_v46 = vld [vmem:[%s5922_s3 + $0x1c8] sm:$0xff]  ;;  %v2785_v34 = vld [vmem:[%s5922_s3 + $0x1c0] sm:$0xff]  ;;  %v2783_v49 = vld [vmem:[%s5922_s3 + $0x1b0] sm:$0xff] }
 0x2eb   :  { %2642 = vmatpush.msrb.mxu3 %v2348_v62  ;;  %v1964_v5 = vadd.f32 %v5110_v48, %v1225_v53  ;;  %v2269_v22 = vadd.f32 %v5031_v25, %v1971_v16  ;;  %v2270_v0 = vadd.f32 %v5034_v43, %v1972_v56  ;;  %v2340_v45 = vmax.f32 %v2244_v24, 0.0  ;;  %2835 = vmatpush.msrb.mxu0 %v2774_v42  ;;  %v2770_v41 = vld [vmem:[%s5922_s3 + $0x148] sm:$0xff]  ;;  %v2784_v24 = vld [vmem:[%s5922_s3 + $0x1b8] sm:$0xff]  ;;  %v2769_v59 = vld [vmem:[%s5922_s3 + $0x140] sm:$0xff] }
 0x2ec   :  { %v1959_v13 = vadd.f32 %v5068_v10, %v5237_v58  ;;  %v1960_v48 = vadd.f32 %v5070_v3, %v1221_v63  ;;  %v2265_v53 = vadd.f32 %v5031_v25, %v1967_v12  ;;  %2603 = vmatpush.msrb.mxu1 %v2343_v57  ;;  %v2266_v27 = vadd.f32 %v5034_v43, %v1968_v4  ;;  %v6279_v10 = vld [vmem:[#allocation120_spill] sm:$0xff]  ;;  %v2760_v63 = vld [vmem:[%s5922_s3 + $0xf8] sm:$0xff] }
 0x2ed   :  { %2643 = vmatpush.msrb.mxu3 %v2344_v18  ;;  %v2369_v7 = vmax.f32 %v2273_v61, 0.0  ;;  %v2370_v47 = vmax.f32 %v2274_v54, 0.0  ;;  %2857 = vmatpush.msrb.mxu2 %v2788_v9  ;;  %v1213_v58 = vadd.f32 %v6279_v10, %v6278_v40  ;;  %v1955_v3 = vadd.f32 %v5040_v55, %v5186_v2  ;;  %v2787_v55 = vld [vmem:[%s5922_s3 + $0x1d0] sm:$0xff]  ;;  %v6283_v29 = vld [vmem:[#allocation104_spill] sm:$0xff]  ;;  %v2744_v57 = vld [vmem:[%s5922_s3 + $0x78] sm:$0xff] }
 0x2ee   :  { %v1956_v11 = vadd.f32 %v5042_v37, %v5229_v30  ;;  %2604 = vmatpush.msrb.mxu1 %v2339_v50  ;;  %v2261_v26 = vadd.f32 %v5031_v25, %v1963_v36  ;;  %v2262_v14 = vadd.f32 %v5034_v43, %v1964_v5  ;;  %v2365_v39 = vmax.f32 %v2269_v22, 0.0  ;;  %v6280_v2 = vld [vmem:[#allocation101_spill] sm:$0xff]  ;;  %v6281_v37 = vld [vmem:[#allocation100_spill] sm:$0xff]  ;;  %2836 = vmatpush.msrb.mxu0 %v2773_v1  ;;  %v2756_v42 = vld [vmem:[%s5922_s3 + $0xd8] sm:$0xff] }
 0x2ef   :  { %2644 = vmatpush.msrb.mxu3 %v2340_v45  ;;  %v2366_v8 = vmax.f32 %v2270_v0, 0.0  ;;  %v1951_v30 = vadd.f32 %v6281_v37, %v6280_v2  ;;  %v1952_v20 = vadd.f32 %v6282_v23, %v1213_v58  ;;  %3387 = vmatmul.msk.f32.vlgmr.msrb.gmra.mxu1 %vm2565_vm2, %v5324_v60  ;;  %v2257_v52 = vadd.f32 %v5031_v25, %v1959_v13  ;;  %v6284_v12 = vld [vmem:[#allocation32_spill] sm:$0xff]  ;;  %v2759_v18 = vld [vmem:[%s5922_s3 + $0xf0] sm:$0xff]  ;;  %v2740_v9 = vld [vmem:[%s5922_s3 + $0x58] sm:$0xff] }
 0x2f0   :  { %2677 = vmatpush.msra.mxu1 %v2369_v7  ;;  %3388 = vmatmul.msk.f32.vlgmr.msrb.gmra.mxu3 %vm2565_vm2, %v5324_v60  ;;  %v2258_v51 = vadd.f32 %v5034_v43, %v1960_v48  ;;  %v2361_v28 = vmax.f32 %v2265_v53, 0.0  ;;  %v2362_v38 = vmax.f32 %v2266_v27, 0.0  ;;  %v2253_v32 = vadd.f32 %v5031_v25, %v1955_v3  ;;  %v2743_v36 = vld [vmem:[%s5922_s3 + $0x70] sm:$0xff]  ;;  %v2758_v50 = vld [vmem:[%s5922_s3 + $0xe8] sm:$0xff]  ;;  %v2757_v22 = vld [vmem:[%s5922_s3 + $0xe0] sm:$0xff] }
 0x2f1   :  { %2717 = vmatpush.msra.mxu3 %v2370_v47  ;;  %2858 = vmatpush.msrb.mxu2 %v2787_v55  ;;  %v2254_v6 = vadd.f32 %v5034_v43, %v1956_v11  ;;  %v2357_v31 = vmax.f32 %v2261_v26, 0.0  ;;  %v2358_v21 = vmax.f32 %v2262_v14, 0.0  ;;  %v2249_v17 = vadd.f32 %v5031_v25, %v1951_v30  ;;  %v2742_v5 = vld [vmem:[%s5922_s3 + $0x68] sm:$0xff]  ;;  %v2741_v0 = vld [vmem:[%s5922_s3 + $0x60] sm:$0xff]  ;;  %v2755_v45 = vld [vmem:[%s5922_s3 + $0xd0] sm:$0xff] }
 0x2f2   :  { %2678 = vmatpush.msra.mxu1 %v2365_v39  ;;  %2837 = vmatpush.msrb.mxu0 %v2772_v19  ;;  %v2250_v16 = vadd.f32 %v5034_v43, %v1952_v20  ;;  %v2353_v56 = vmax.f32 %v2257_v52, 0.0  ;;  %v2354_v35 = vmax.f32 %v2258_v51, 0.0  ;;  %v2245_v62 = vadd.f32 %v5031_v25, %v6283_v29  ;;  %v2739_v13 = vld [vmem:[%s5922_s3 + $0x50] sm:$0xff]  ;;  %v2754_v48 = vld [vmem:[%s5922_s3 + $0xc8] sm:$0xff]  ;;  %v2753_v27 = vld [vmem:[%s5922_s3 + $0xc0] sm:$0xff] }
 0x2f3   :  { %2718 = vmatpush.msra.mxu3 %v2366_v8  ;;  %2859 = vmatpush.msrb.mxu2 %v2786_v46  ;;  %v2246_v4 = vadd.f32 %v5034_v43, %v6284_v12  ;;  %v2349_v61 = vmax.f32 %v2253_v32, 0.0  ;;  %v2350_v54 = vmax.f32 %v2254_v6, 0.0  ;;  %v2345_v15 = vmax.f32 %v2249_v17, 0.0  ;;  %v2738_v53 = vld [vmem:[%s5922_s3 + $0x48] sm:$0xff]  ;;  %v2737_v7 = vld [vmem:[%s5922_s3 + $0x40] sm:$0xff]  ;;  %v2752_v47 = vld [vmem:[%s5922_s3 + $0xb8] sm:$0xff] }
 0x2f4   :  { %2679 = vmatpush.msra.mxu1 %v2361_v28  ;;  %2838 = vmatpush.msrb.mxu0 %v2771_v33  ;;  %v2346_v44 = vmax.f32 %v2250_v16, 0.0  ;;  %v2341_v25 = vmax.f32 %v2245_v62, 0.0  ;;  %v2751_v40 = vld [vmem:[%s5922_s3 + $0xb0] sm:$0xff]  ;;  %v2750_v10 = vld [vmem:[%s5922_s3 + $0xa8] sm:$0xff]  ;;  %v2749_v58 = vld [vmem:[%s5922_s3 + $0xa0] sm:$0xff] }
 0x2f5   :  { %2719 = vmatpush.msra.mxu3 %v2362_v38  ;;  %2860 = vmatpush.msrb.mxu2 %v2785_v34  ;;  %v2342_v43 = vmax.f32 %v2246_v4, 0.0  ;;  %v2735_v3 = vld [vmem:[%s5922_s3 + $0x30] sm:$0xff]  ;;  %v2748_v11 = vld [vmem:[%s5922_s3 + $0x98] sm:$0xff]  ;;  %v2782_v14 = vld [vmem:[%s5922_s3 + $0x1a8] sm:$0xff] }
 0x2f6   :  { %2680 = vmatpush.msra.mxu1 %v2357_v31  ;;  %2839 = vmatpush.msrb.mxu0 %v2770_v41  ;;  %v2768_v26 = vld [vmem:[%s5922_s3 + $0x138] sm:$0xff]  ;;  %v2734_v39 = vld [vmem:[%s5922_s3 + $0x28] sm:$0xff]  ;;  %v2747_v8 = vld [vmem:[%s5922_s3 + $0x90] sm:$0xff] }
 0x2f7   :  { %2720 = vmatpush.msra.mxu3 %v2358_v21  ;;  %2861 = vmatpush.msrb.mxu2 %v2784_v24  ;;  %v2767_v1 = vld [vmem:[%s5922_s3 + $0x130] sm:$0xff]  ;;  %v2781_v55 = vld [vmem:[%s5922_s3 + $0x1a0] sm:$0xff]  ;;  %v2746_v37 = vld [vmem:[%s5922_s3 + $0x88] sm:$0xff] }
 0x2f8   :  { %2681 = vmatpush.msra.mxu1 %v2353_v56  ;;  %2840 = vmatpush.msrb.mxu0 %v2769_v59  ;;  %v2733_v2 = vld [vmem:[%s5922_s3 + $0x20] sm:$0xff]  ;;  %v2766_v30 = vld [vmem:[%s5922_s3 + $0x128] sm:$0xff]  ;;  %v2780_v23 = vld [vmem:[%s5922_s3 + $0x198] sm:$0xff] }
 0x2f9   :  { %2721 = vmatpush.msra.mxu3 %v2354_v35  ;;  %2862 = vmatpush.msrb.mxu2 %v2783_v49  ;;  %v2732_v20 = vld [vmem:[%s5922_s3 + $0x18] sm:$0xff]  ;;  %v2745_v52 = vld [vmem:[%s5922_s3 + $0x80] sm:$0xff]  ;;  %v2779_v28 = vld [vmem:[%s5922_s3 + $0x190] sm:$0xff] }
 0x2fa   :  { %2682 = vmatpush.msra.mxu1 %v2349_v61  ;;  %2841 = vmatpush.msrb.mxu0 %v2768_v26  ;;  %v2765_v51 = vld [vmem:[%s5922_s3 + $0x120] sm:$0xff]  ;;  %v2731_v38 = vld [vmem:[%s5922_s3 + $0x10] sm:$0xff]  ;;  %v2764_v19 = vld [vmem:[%s5922_s3 + $0x118] sm:$0xff] }
 0x2fb   :  { %2722 = vmatpush.msra.mxu3 %v2350_v54  ;;  %2863 = vmatpush.msrb.mxu2 %v2782_v14  ;;  %v2730_v46 = vld [vmem:[%s5922_s3 + $0x8] sm:$0xff]  ;;  %v2763_v32 = vld [vmem:[%s5922_s3 + $0x110] sm:$0xff]  ;;  %v2729_v6 = vld [vmem:[%s5922_s3] sm:$0xff] }
 0x2fc   :  { %2683 = vmatpush.msra.mxu1 %v2345_v15  ;;  %2842 = vmatpush.msrb.mxu0 %v2767_v1  ;;  %v2762_v31 = vld [vmem:[%s5922_s3 + $0x108] sm:$0xff]  ;;  %v2761_v33 = vld [vmem:[%s5922_s3 + $0x100] sm:$0xff]  ;;  %v2912_v17 = vld [vmem:[%s5924_s5 + $0xf8] sm:$0xff] }
 0x2fd   :  { %2723 = vmatpush.msra.mxu3 %v2346_v44  ;;  %2864 = vmatpush.msrb.mxu2 %v2781_v55  ;;  %v2778_v21 = vld [vmem:[%s5922_s3 + $0x188] sm:$0xff]  ;;  %v2777_v34 = vld [vmem:[%s5922_s3 + $0x180] sm:$0xff]  ;;  %v2911_v56 = vld [vmem:[%s5924_s5 + $0xf0] sm:$0xff] }
 0x2fe   :  { %2684 = vmatpush.msra.mxu1 %v2341_v25  ;;  %2843 = vmatpush.msrb.mxu0 %v2766_v30  ;;  %v2910_v16 = vld [vmem:[%s5924_s5 + $0xe8] sm:$0xff]  ;;  %v2908_v35 = vld [vmem:[%s5924_s5 + $0xd8] sm:$0xff]  ;;  %v2909_v41 = vld [vmem:[%s5924_s5 + $0xe0] sm:$0xff] }
 0x2ff   :  { %2724 = vmatpush.msra.mxu3 %v2342_v43  ;;  %3389 = vmatmul.msk.f32.vlgmr.msra.gmra.mxu1 %vm2565_vm2, %v5324_v60  ;;  %v2907_v24 = vld [vmem:[%s5924_s5 + $0xd0] sm:$0xff]  ;;  %v2906_v29 = vld [vmem:[%s5924_s5 + $0xc8] sm:$0xff]  ;;  %v2905_v62 = vld [vmem:[%s5924_s5 + $0xc0] sm:$0xff] }
 0x300   :  { %3390 = vmatmul.msk.f32.vlgmr.msra.gmra.mxu3 %vm2565_vm2, %v5324_v60  ;;  %2793 = vmatpush.msrb.mxu1 %v2744_v57  ;;  %v2736_v60 = vld [vmem:[%s5922_s3 + $0x38] sm:$0xff]  ;;  %v2903_v4 = vld [vmem:[%s5924_s5 + $0xb0] sm:$0xff]  ;;  %v2902_v61 = vld [vmem:[%s5924_s5 + $0xa8] sm:$0xff] }
 0x301   :  { %2813 = vmatpush.msrb.mxu3 %v2760_v63  ;;  %2865 = vmatpush.msrb.mxu2 %v2780_v23  ;;  %v2904_v12 = vld [vmem:[%s5924_s5 + $0xb8] sm:$0xff]  ;;  %v2901_v44 = vld [vmem:[%s5924_s5 + $0xa0] sm:$0xff]  ;;  %v2898_v25 = vld [vmem:[%s5924_s5 + $0x88] sm:$0xff] }
 0x302   :  { %2794 = vmatpush.msrb.mxu1 %v2743_v36  ;;  %2844 = vmatpush.msrb.mxu0 %v2765_v51  ;;  %v2900_v15 = vld [vmem:[%s5924_s5 + $0x98] sm:$0xff]  ;;  %v2899_v43 = vld [vmem:[%s5924_s5 + $0x90] sm:$0xff]  ;;  %v2882_v14 = vld [vmem:[%s5924_s5 + $0x8] sm:$0xff] }
 0x303   :  { %2814 = vmatpush.msrb.mxu3 %v2759_v18  ;;  %2866 = vmatpush.msrb.mxu2 %v2779_v28  ;;  %v2896_v57 = vld [vmem:[%s5924_s5 + $0x78] sm:$0xff]  ;;  %v2883_v26 = vld [vmem:[%s5924_s5 + $0x10] sm:$0xff]  ;;  %v2974_v30 = vld [vmem:[%s5926_s7 + $0x68] sm:$0xff] }
 0x304   :  { %2795 = vmatpush.msrb.mxu1 %v2742_v5  ;;  %2845 = vmatpush.msrb.mxu0 %v2764_v19  ;;  %v2892_v5 = vld [vmem:[%s5924_s5 + $0x58] sm:$0xff]  ;;  %v2991_v1 = vld [vmem:[%s5926_s7 + $0xf0] sm:$0xff]  ;;  %v2989_v23 = vld [vmem:[%s5926_s7 + $0xe0] sm:$0xff] }
 0x305   :  { %2815 = vmatpush.msrb.mxu3 %v2758_v50  ;;  %2867 = vmatpush.msrb.mxu2 %v2778_v21  ;;  %v2894_v50 = vld [vmem:[%s5924_s5 + $0x68] sm:$0xff]  ;;  %v2976_v55 = vld [vmem:[%s5926_s7 + $0x78] sm:$0xff]  ;;  %v2987_v28 = vld [vmem:[%s5926_s7 + $0xd0] sm:$0xff] }
 0x306   :  { %2796 = vmatpush.msrb.mxu1 %v2741_v0  ;;  %2846 = vmatpush.msrb.mxu0 %v2763_v32  ;;  %v2972_v51 = vld [vmem:[%s5926_s7 + $0x58] sm:$0xff]  ;;  %v2986_v19 = vld [vmem:[%s5926_s7 + $0xc8] sm:$0xff]  ;;  %v2985_v32 = vld [vmem:[%s5926_s7 + $0xc0] sm:$0xff] }
 0x307   :  { %2816 = vmatpush.msrb.mxu3 %v2757_v22  ;;  %2868 = vmatpush.msrb.mxu2 %v2777_v34  ;;  %v2890_v22 = vld [vmem:[%s5924_s5 + $0x48] sm:$0xff]  ;;  %v2968_v21 = vld [vmem:[%s5926_s7 + $0x38] sm:$0xff]  ;;  %v2967_v34 = vld [vmem:[%s5926_s7 + $0x30] sm:$0xff] }
 0x308   :  { %2797 = vmatpush.msrb.mxu1 %v2740_v9  ;;  %2847 = vmatpush.msrb.mxu0 %v2762_v31  ;;  %v2984_v31 = vld [vmem:[%s5926_s7 + $0xb8] sm:$0xff] }
 0x309   :  { %2817 = vmatpush.msrb.mxu3 %v2756_v42 }
 0x30a   :  { %2798 = vmatpush.msrb.mxu1 %v2739_v13  ;;  %2848 = vmatpush.msrb.mxu0 %v2761_v33  ;;  %v2983_v33 = vld [vmem:[%s5926_s7 + $0xb0] sm:$0xff] }
 0x30b   :  { %2818 = vmatpush.msrb.mxu3 %v2755_v45 }
 0x30c   :  { %2799 = vmatpush.msrb.mxu1 %v2738_v53  ;;  %v2897_v53 = vld [vmem:[%s5924_s5 + $0x80] sm:$0xff]  ;;  %2997 = vmatpush.msra.mxu0 %v2976_v55 }
 0x30d   :  { %2819 = vmatpush.msrb.mxu3 %v2754_v48 }
 0x30e   :  { %2800 = vmatpush.msrb.mxu1 %v2737_v7  ;;  %v2895_v7 = vld [vmem:[%s5924_s5 + $0x70] sm:$0xff] }
 0x30f   :  { %2820 = vmatpush.msrb.mxu3 %v2753_v27  ;;  %v2888_v27 = vld [vmem:[%s5924_s5 + $0x38] sm:$0xff] }
 0x310   :  { %2801 = vmatpush.msrb.mxu1 %v2736_v60  ;;  %v2893_v60 = vld [vmem:[%s5924_s5 + $0x60] sm:$0xff] }
 0x311   :  { %2821 = vmatpush.msrb.mxu3 %v2752_v47  ;;  %v2886_v47 = vld [vmem:[%s5924_s5 + $0x28] sm:$0xff] }
 0x312   :  { %2802 = vmatpush.msrb.mxu1 %v2735_v3  ;;  %v2885_v3 = vld [vmem:[%s5924_s5 + $0x20] sm:$0xff] }
 0x313   :  { %2822 = vmatpush.msrb.mxu3 %v2751_v40  ;;  %v2891_v40 = vld [vmem:[%s5924_s5 + $0x50] sm:$0xff] }
 0x314   :  { %2803 = vmatpush.msrb.mxu1 %v2734_v39  ;;  %v2881_v39 = vld [vmem:[%s5924_s5] sm:$0xff] }
 0x315   :  { %2823 = vmatpush.msrb.mxu3 %v2750_v10  ;;  %v2889_v10 = vld [vmem:[%s5924_s5 + $0x40] sm:$0xff] }
 0x316   :  { %2804 = vmatpush.msrb.mxu1 %v2733_v2  ;;  %v2975_v2 = vld [vmem:[%s5926_s7 + $0x70] sm:$0xff] }
 0x317   :  { %2824 = vmatpush.msrb.mxu3 %v2749_v58  ;;  %v2887_v58 = vld [vmem:[%s5924_s5 + $0x30] sm:$0xff]  ;;  %2998 = vmatpush.msra.mxu0 %v2975_v2 }
 0x318   :  { %2805 = vmatpush.msrb.mxu1 %v2732_v20  ;;  %v2973_v20 = vld [vmem:[%s5926_s7 + $0x60] sm:$0xff] }
 0x319   :  { %2825 = vmatpush.msrb.mxu3 %v2748_v11  ;;  %v2884_v11 = vld [vmem:[%s5924_s5 + $0x18] sm:$0xff]  ;;  %2999 = vmatpush.msra.mxu0 %v2974_v30 }
 0x31a   :  { %2806 = vmatpush.msrb.mxu1 %v2731_v38  ;;  %v2971_v38 = vld [vmem:[%s5926_s7 + $0x50] sm:$0xff] }
 0x31b   :  { %2826 = vmatpush.msrb.mxu3 %v2747_v8  ;;  %v2992_v8 = vld [vmem:[%s5926_s7 + $0xf8] sm:$0xff]  ;;  %3000 = vmatpush.msra.mxu0 %v2973_v20 }
 0x31c   :  { %2807 = vmatpush.msrb.mxu1 %v2730_v46  ;;  %3017 = vmatpush.msra.mxu2 %v2992_v8  ;;  %v2970_v46 = vld [vmem:[%s5926_s7 + $0x48] sm:$0xff]  ;;  %v3395_v8 = vld [vmem:[%s5927_s8] ss:$0 sm:$0xff] }
 0x31d   :  { %2827 = vmatpush.msrb.mxu3 %v2746_v37  ;;  %v2990_v37 = vld [vmem:[%s5926_s7 + $0xe8] sm:$0xff]  ;;  %3001 = vmatpush.msra.mxu0 %v2972_v51 }
 0x31e   :  { %2808 = vmatpush.msrb.mxu1 %v2729_v6  ;;  %3018 = vmatpush.msra.mxu2 %v2991_v1  ;;  %v2969_v6 = vld [vmem:[%s5926_s7 + $0x40] sm:$0xff] }
 0x31f   :  { %2828 = vmatpush.msrb.mxu3 %v2745_v52  ;;  %v2988_v52 = vld [vmem:[%s5926_s7 + $0xd8] sm:$0xff]  ;;  %3002 = vmatpush.msra.mxu0 %v2971_v38 }
 0x320   :  { %2919 = vmatpush.msra.mxu1 %v2911_v56  ;;  %3019 = vmatpush.msra.mxu2 %v2990_v37  ;;  %v2981_v56 = vld [vmem:[%s5926_s7 + $0xa0] sm:$0xff] }
 0x321   :  { %2939 = vmatpush.msra.mxu3 %v2912_v17  ;;  %3003 = vmatpush.msra.mxu0 %v2970_v46  ;;  %v2982_v17 = vld [vmem:[%s5926_s7 + $0xa8] sm:$0xff]  ;;  %v3429_v46 = vmov 0  }
 0x322   :  { %2920 = vmatpush.msra.mxu1 %v2909_v41  ;;  %3020 = vmatpush.msra.mxu2 %v2989_v23  ;;  %v3396_v23 = vld [vmem:[#allocation4] ss:$0 sm:$0xff] }
 0x323   :  { %2940 = vmatpush.msra.mxu3 %v2910_v16  ;;  %3004 = vmatpush.msra.mxu0 %v2969_v6  ;;  %v2966_v16 = vld [vmem:[%s5926_s7 + $0x28] sm:$0xff] }
 0x324   :  { %2921 = vmatpush.msra.mxu1 %v2907_v24  ;;  %3021 = vmatpush.msra.mxu2 %v2988_v52  ;;  %v2980_v24 = vld [vmem:[%s5926_s7 + $0x98] sm:$0xff] }
 0x325   :  { %2941 = vmatpush.msra.mxu3 %v2908_v35  ;;  %3005 = vmatpush.msra.mxu0 %v2968_v21 }
 0x326   :  { %2922 = vmatpush.msra.mxu1 %v2905_v62  ;;  %3022 = vmatpush.msra.mxu2 %v2987_v28 }
 0x327   :  { %2942 = vmatpush.msra.mxu3 %v2906_v29  ;;  %3006 = vmatpush.msra.mxu0 %v2967_v34 }
 0x328   :  { %2923 = vmatpush.msra.mxu1 %v2903_v4  ;;  %3023 = vmatpush.msra.mxu2 %v2986_v19 }
 0x329   :  { %2943 = vmatpush.msra.mxu3 %v2904_v12  ;;  %3007 = vmatpush.msra.mxu0 %v2966_v16  ;;  %v3145_v16 = vld [vmem:[%s5930_s11 + $0x78] sm:$0xff] }
 0x32a   :  { %2924 = vmatpush.msra.mxu1 %v2901_v44  ;;  %3024 = vmatpush.msra.mxu2 %v2985_v32  ;;  %v2961_v44 = vld [vmem:[%s5926_s7] sm:$0xff] }
 0x32b   :  { %2944 = vmatpush.msra.mxu3 %v2902_v61  ;;  %3394 = vset.pattern.permute.xlu0 %v3429_v46 }
 0x32c   :  { %2925 = vmatpush.msra.mxu1 %v2899_v43  ;;  %3025 = vmatpush.msra.mxu2 %v2984_v31  ;;  %v2978_v43 = vld [vmem:[%s5926_s7 + $0x88] sm:$0xff] }
 0x32d   :  { %2945 = vmatpush.msra.mxu3 %v2900_v15  ;;  %v2962_v15 = vld [vmem:[%s5926_s7 + $0x8] sm:$0xff] }
 0x32e   :  { %2926 = vmatpush.msra.mxu1 %v2897_v53  ;;  %3026 = vmatpush.msra.mxu2 %v2983_v33 }
 0x32f   :  { %2946 = vmatpush.msra.mxu3 %v2898_v25  ;;  %v2979_v25 = vld [vmem:[%s5926_s7 + $0x90] sm:$0xff] }
 0x330   :  { %2927 = vmatpush.msra.mxu1 %v2895_v7  ;;  %3027 = vmatpush.msra.mxu2 %v2982_v17 }
 0x331   :  { %2947 = vmatpush.msra.mxu3 %v2896_v57  ;;  %v3053_v57 = vld [vmem:[%s5928_s9 + $0x78] sm:$0xff] }
 0x332   :  { %2928 = vmatpush.msra.mxu1 %v2893_v60  ;;  %3028 = vmatpush.msra.mxu2 %v2981_v56  ;;  %v3161_v56 = vld [vmem:[%s5930_s11 + $0xf8] sm:$0xff] }
 0x333   :  { %2948 = vmatpush.msra.mxu3 %v2894_v50  ;;  %v3050_v50 = vld [vmem:[%s5928_s9 + $0x60] sm:$0xff] }
 0x334   :  { %2929 = vmatpush.msra.mxu1 %v2891_v40  ;;  %3029 = vmatpush.msra.mxu2 %v2980_v24  ;;  %v3160_v24 = vld [vmem:[%s5930_s11 + $0xf0] sm:$0xff] }
 0x335   :  { %2949 = vmatpush.msra.mxu3 %v2892_v5  ;;  %v3049_v5 = vld [vmem:[%s5928_s9 + $0x58] sm:$0xff] }
 0x336   :  { %2930 = vmatpush.msra.mxu1 %v2889_v10  ;;  %3030 = vmatpush.msra.mxu2 %v2979_v25  ;;  %v3156_v25 = vld [vmem:[%s5930_s11 + $0xd0] sm:$0xff] }
 0x337   :  { %2950 = vmatpush.msra.mxu3 %v2890_v22  ;;  %v3048_v22 = vld [vmem:[%s5928_s9 + $0x50] sm:$0xff] }
 0x338   :  { %2931 = vmatpush.msra.mxu1 %v2887_v58  ;;  %3031 = vmatpush.msra.mxu2 %v2978_v43  ;;  %v3043_v58 = vld [vmem:[%s5928_s9 + $0x28] sm:$0xff] }
 0x339   :  { %2951 = vmatpush.msra.mxu3 %v2888_v27 }
 0x33a   :  { %2932 = vmatpush.msra.mxu1 %v2885_v3  ;;  %v3042_v3 = vld [vmem:[%s5928_s9 + $0x20] sm:$0xff] }
 0x33b   :  { %2952 = vmatpush.msra.mxu3 %v2886_v47 }
 0x33c   :  { %2933 = vmatpush.msra.mxu1 %v2883_v26  ;;  %v3040_v26 = vld [vmem:[%s5928_s9 + $0x10] sm:$0xff] }
 0x33d   :  { %2953 = vmatpush.msra.mxu3 %v2884_v11  ;;  %v3041_v11 = vld [vmem:[%s5928_s9 + $0x18] sm:$0xff] }
 0x33e   :  { %2934 = vmatpush.msra.mxu1 %v2881_v39  ;;  %v3038_v39 = vld [vmem:[%s5928_s9] sm:$0xff] }
 0x33f   :  { %2954 = vmatpush.msra.mxu3 %v2882_v14  ;;  %v3039_v14 = vld [vmem:[%s5928_s9 + $0x8] sm:$0xff] }
 0x350   :  { %v2586_v54 = vpop.f32.mrf.mxu0 }
 0x356   :  { %v2626_v63 = vpop.f32.mrf.mxu2 }
 0x35c   :  { %v2666_v0 = vpop.f32.mrf.mxu0 }
 0x362   :  { %v2706_v45 = vpop.f32.mrf.mxu2 }
 0x36c   :  { %v2606_v59 = vpop.f32.mrf.mxu1 }
 0x36d   :  { %v2607_v49 = vadd.f32 %v2606_v59, %v2586_v54  ;;  %v2965_v54 = vld [vmem:[%s5926_s7 + $0x20] sm:$0xff]  ;;  %v2964_v59 = vld [vmem:[%s5926_s7 + $0x18] sm:$0xff] }
 0x36e   :  { %3008 = vmatpush.msra.mxu0 %v2965_v54 }
 0x36f   :  { %2809 = vmatmul.f32.vlgmr.msrb.gmra.mxu1 %v2607_v49  ;;  %v2963_v49 = vld [vmem:[%s5926_s7 + $0x10] sm:$0xff] }
 0x370   :  { %3009 = vmatpush.msra.mxu0 %v2964_v59  ;;  %3058 = vmatpush.msrb.mxu1 %v3053_v57  ;;  %v3141_v59 = vld [vmem:[%s5930_s11 + $0x58] sm:$0xff]  ;;  %v3155_v57 = vld [vmem:[%s5930_s11 + $0xc8] sm:$0xff] }
 0x372   :  { %3010 = vmatpush.msra.mxu0 %v2963_v49  ;;  %v3157_v49 = vld [vmem:[%s5930_s11 + $0xd8] sm:$0xff] }
 0x373   :  { %v2646_v18 = vpop.f32.mrf.mxu3 }
 0x374   :  { %v2647_v36 = vadd.f32 %v2646_v18, %v2626_v63  ;;  %3011 = vmatpush.msra.mxu0 %v2962_v15  ;;  %v2977_v63 = vld [vmem:[%s5926_s7 + $0x80] sm:$0xff]  ;;  %v3052_v18 = vld [vmem:[%s5928_s9 + $0x70] sm:$0xff] }
 0x375   :  { %3032 = vmatpush.msra.mxu2 %v2977_v63  ;;  %3059 = vmatpush.msrb.mxu1 %v3052_v18  ;;  %v3139_v63 = vld [vmem:[%s5930_s11 + $0x48] sm:$0xff] }
 0x376   :  { %2829 = vmatmul.f32.vlgmr.msrb.gmra.mxu3 %v2647_v36  ;;  %3012 = vmatpush.msra.mxu0 %v2961_v44  ;;  %v3051_v36 = vld [vmem:[%s5928_s9 + $0x68] sm:$0xff]  ;;  %v3140_v44 = vld [vmem:[%s5930_s11 + $0x50] sm:$0xff] }
 0x377   :  { %3060 = vmatpush.msrb.mxu1 %v3051_v36  ;;  %3163 = vmatpush.msrb.mxu3 %v3145_v16  ;;  %v3138_v36 = vld [vmem:[%s5930_s11 + $0x40] sm:$0xff] }
 0x379   :  { %3061 = vmatpush.msrb.mxu1 %v3050_v50  ;;  %v3154_v50 = vld [vmem:[%s5930_s11 + $0xc0] sm:$0xff] }
 0x37b   :  { %3062 = vmatpush.msrb.mxu1 %v3049_v5  ;;  %v3137_v5 = vld [vmem:[%s5930_s11 + $0x38] sm:$0xff] }
 0x37c   :  { %v2686_v42 = vpop.f32.mrf.mxu1 }
 0x37d   :  { %v2687_v9 = vadd.f32 %v2686_v42, %v2666_v0  ;;  %v3047_v0 = vld [vmem:[%s5928_s9 + $0x48] sm:$0xff]  ;;  %3063 = vmatpush.msrb.mxu1 %v3048_v22  ;;  %v3046_v42 = vld [vmem:[%s5928_s9 + $0x40] sm:$0xff]  ;;  %v3153_v22 = vld [vmem:[%s5930_s11 + $0xb8] sm:$0xff] }
 0x37f   :  { %2849 = vmatmul.f32.vlgmr.msrb.gmra.mxu0 %v2687_v9  ;;  %3064 = vmatpush.msrb.mxu1 %v3047_v0  ;;  %v3045_v9 = vld [vmem:[%s5928_s9 + $0x38] sm:$0xff] }
 0x380   :  { %3183 = vmatpush.msrb.mxu0 %v3161_v56 }
 0x381   :  { %3065 = vmatpush.msrb.mxu1 %v3046_v42 }
 0x382   :  { %3184 = vmatpush.msrb.mxu0 %v3160_v24 }
 0x383   :  { %v2726_v13 = vpop.f32.mrf.mxu3  ;;  %3066 = vmatpush.msrb.mxu1 %v3045_v9 }
 0x384   :  { %v2727_v48 = vadd.f32 %v2726_v13, %v2706_v45  ;;  %v2913_v45 = vld [vmem:[%s5925_s6] sm:$0x3]  ;;  %v3044_v13 = vld [vmem:[%s5928_s9 + $0x30] sm:$0xff]  ;;  %s3246_s6 = sshll.u32 %s5934_s15, 4  ;;  %s3247_s6 = int_to_ptr.hbm [resolvable:$true] %s3246_s6 }
 0x385   :  { %3067 = vmatpush.msrb.mxu1 %v3044_v13  ;;  %v2916_v7 = vperm.slane %v2913_v45, 1 }
 0x386   :  { %2869 = vmatmul.f32.vlgmr.msrb.gmra.mxu2 %v2727_v48  ;;  %v2915_v48 = vperm.slane %v2913_v45, 0 }
 0x387   :  { %3068 = vmatpush.msrb.mxu1 %v3043_v58 }
 0x389   :  { %3069 = vmatpush.msrb.mxu1 %v3042_v3 }
 0x38b   :  { %3070 = vmatpush.msrb.mxu1 %v3041_v11  ;;  %v3136_v11 = vld [vmem:[%s5930_s11 + $0x30] sm:$0xff] }
 0x38d   :  { %3071 = vmatpush.msrb.mxu1 %v3040_v26  ;;  %v3152_v26 = vld [vmem:[%s5930_s11 + $0xb0] sm:$0xff] }
 0x38f   :  { %3072 = vmatpush.msrb.mxu1 %v3039_v14  ;;  %v3135_v14 = vld [vmem:[%s5930_s11 + $0x28] sm:$0xff] }
 0x391   :  { %3073 = vmatpush.msrb.mxu1 %v3038_v39  ;;  %v3151_v39 = vld [vmem:[%s5930_s11 + $0xa8] sm:$0xff] }
 0x3ec   :  { %v2810_v35 = vpop.f32.mrf.mxu1 }
 0x3f9   :  { %v2830_v41 = vpop.f32.mrf.mxu3 }
 0x3fa   :  { %v2831_v29 = vadd.f32 %v2830_v41, %v2810_v35  ;;  %v3144_v35 = vld [vmem:[%s5930_s11 + $0x70] sm:$0xff] }
 0x3fb   :  { %3164 = vmatpush.msrb.mxu3 %v3144_v35 }
 0x3fc   :  { %v2850_v62 = vpop.f32.mrf.mxu0 }
 0x3fd   :  { %v2851_v12 = vadd.f32 %v2850_v62, %v2831_v29  ;;  %v3143_v29 = vld [vmem:[%s5930_s11 + $0x68] sm:$0xff] }
 0x3fe   :  { %v3159_v62 = vld [vmem:[%s5930_s11 + $0xe8] sm:$0xff]  ;;  %3165 = vmatpush.msrb.mxu3 %v3143_v29  ;;  %v3206_v29 = vld [vmem:[%s5932_s13 + $0x10] sm:$0xff] }
 0x3ff   :  { %3185 = vmatpush.msrb.mxu0 %v3159_v62  ;;  %v3205_v62 = vld [vmem:[%s5932_s13 + $0x8] sm:$0xff] }
 0x409   :  { %v2870_v4 = vpop.f32.mrf.mxu2 }
 0x40a   :  { %v2871_v61 = vadd.f32 %v2870_v4, %v2851_v12  ;;  %v3142_v4 = vld [vmem:[%s5930_s11 + $0x60] sm:$0xff] }
 0x40b   :  { %3166 = vmatpush.msrb.mxu3 %v3142_v4  ;;  %v3162_v4 = vld [vmem:[%s5931_s12] sm:$0x1] }
 0x40c   :  { %2955 = vmatmul.f32.vlgmr.msra.gmra.mxu3 %v2871_v61  ;;  %2935 = vmatmul.f32.vlgmr.msra.gmra.mxu1 %v2871_v61  ;;  %v3158_v61 = vld [vmem:[%s5930_s11 + $0xe0] sm:$0xff] }
 0x40d   :  { %3186 = vmatpush.msrb.mxu0 %v3158_v61  ;;  %3167 = vmatpush.msrb.mxu3 %v3141_v59 }
 0x40f   :  { %3187 = vmatpush.msrb.mxu0 %v3157_v49  ;;  %3168 = vmatpush.msrb.mxu3 %v3140_v44  ;;  %v3212_v44 = vld [vmem:[%s5933_s14] sm:$0x1] }
 0x411   :  { %3188 = vmatpush.msrb.mxu0 %v3156_v25  ;;  %3169 = vmatpush.msrb.mxu3 %v3139_v63 }
 0x413   :  { %3189 = vmatpush.msrb.mxu0 %v3155_v57  ;;  %3170 = vmatpush.msrb.mxu3 %v3138_v36 }
 0x415   :  { %3190 = vmatpush.msrb.mxu0 %v3154_v50  ;;  %3171 = vmatpush.msrb.mxu3 %v3137_v5 }
 0x417   :  { %3191 = vmatpush.msrb.mxu0 %v3153_v22  ;;  %3172 = vmatpush.msrb.mxu3 %v3136_v11 }
 0x419   :  { %3192 = vmatpush.msrb.mxu0 %v3152_v26  ;;  %3173 = vmatpush.msrb.mxu3 %v3135_v14 }
 0x41b   :  { %3193 = vmatpush.msrb.mxu0 %v3151_v39 }
 0x489   :  { %v2936_v53 = vpop.f32.mrf.mxu1 }
 0x48a   :  { %v5748_v27 = vadd.f32 %v2936_v53, %v2915_v48 }
 0x48c   :  { %v2959_v47 = vmax.f32 %v5748_v27, 0.0  ;;  %v3210_v27 = vld [vmem:[%s5932_s13 + $0x30] sm:$0xff] }
 0x48e   :  { %3013 = vmatmul.f32.vlgmr.msra.gmra.mxu0 %v2959_v47 }
 0x48f   :  { %v2956_v60 = vpop.f32.mrf.mxu3 }
 0x490   :  { %v5753_v40 = vadd.f32 %v2956_v60, %v2916_v7 }
 0x492   :  { %v2960_v10 = vmax.f32 %v5753_v40, 0.0  ;;  %v3208_v40 = vld [vmem:[%s5932_s13 + $0x20] sm:$0xff] }
 0x494   :  { %3033 = vmatmul.f32.vlgmr.msra.gmra.mxu2 %v2960_v10 }
 0x50b   :  { %v3014_v1 = vpop.f32.mrf.mxu0 }
 0x50c   :  { %v3015_v55 = vadd.f32 %v3395_v8, %v3014_v1  ;;  %v3134_v8 = vld [vmem:[%s5930_s11 + $0x20] sm:$0xff] }
 0x50d   :  { %v3150_v1 = vld [vmem:[%s5930_s11 + $0xa0] sm:$0xff]  ;;  %3174 = vmatpush.msrb.mxu3 %v3134_v8 }
 0x50e   :  { %3194 = vmatpush.msrb.mxu0 %v3150_v1 }
 0x517   :  { %v3034_v2 = vpop.f32.mrf.mxu2 }
 0x518   :  { %v3035_v37 = vadd.f32 %v3034_v2, %v3015_v55  ;;  %v3133_v55 = vld [vmem:[%s5930_s11 + $0x18] sm:$0xff] }
 0x519   :  { %v3149_v2 = vld [vmem:[%s5930_s11 + $0x98] sm:$0xff]  ;;  %3175 = vmatpush.msrb.mxu3 %v3133_v55 }
 0x51a   :  { %3397 = vtanh.f32 %v3035_v37  ;;  %3195 = vmatpush.msrb.mxu0 %v3149_v2  ;;  %v3132_v37 = vld [vmem:[%s5930_s11 + $0x10] sm:$0xff] }
 0x51b   :  { %3176 = vmatpush.msrb.mxu3 %v3132_v37 }
 0x520   :  { %v3398_v30 = vpop.eup %3397 }
 0x521   :  { %3074 = vmatmul.f32.vlgmr.msrb.gmra.mxu1 %v3398_v30  ;;  %v3148_v30 = vld [vmem:[%s5930_s11 + $0x90] sm:$0xff] }
 0x522   :  { %3196 = vmatpush.msrb.mxu0 %v3148_v30 }
 0x59e   :  { %v3075_v20 = vpop.f32.mrf.mxu1 }
 0x59f   :  { %v3076_v52 = vadd.f32 %v3396_v23, %v3075_v20  ;;  %v3131_v23 = vld [vmem:[%s5930_s11 + $0x8] sm:$0xff] }
 0x5a0   :  { %v3147_v20 = vld [vmem:[%s5930_s11 + $0x88] sm:$0xff]  ;;  %3177 = vmatpush.msrb.mxu3 %v3131_v23 }
 0x5a1   :  { %v3079_v51 = vsel %vm3078_vm3, %v3076_v52, -inf  ;;  %3197 = vmatpush.msrb.mxu0 %v3147_v20 }
 0x5a2   :  { %v3080_v28 = vrot.slane %v3079_v51, 4 }
 0x5a4   :  { %v3081_v38 = vmax.f32 %v3079_v51, %v3080_v28  ;;  %v3146_v51 = vld [vmem:[%s5930_s11 + $0x80] sm:$0xff]  ;;  %v3211_v28 = vld [vmem:[%s5932_s13 + $0x38] sm:$0xff] }
 0x5a5   :  { %3198 = vmatpush.msrb.mxu0 %v3146_v51  ;;  %3224 = vmatpush.msrb.mxu2 %v3211_v28 }
 0x5a6   :  { %v3082_v19 = vrot.slane %v3081_v38, 2 }
 0x5a7   :  { %3225 = vmatpush.msrb.mxu2 %v3210_v27 }
 0x5a8   :  { %v3083_v32 = vmax.f32 %v3081_v38, %v3082_v19 }
 0x5aa   :  { %v3084_v6 = vrot.slane %v3083_v32, 1 }
 0x5ac   :  { %v3085_v31 = vmax.f32 %v3083_v32, %v3084_v6 }
 0x5ae   :  { %v3086_v21 = vsub.f32 %v3076_v52, %v3085_v31  ;;  %v3130_v52 = vld [vmem:[%s5930_s11] sm:$0xff] }
 0x5af   :  { %3178 = vmatpush.msrb.mxu3 %v3130_v52 }
 0x5b0   :  { %v3087_v33 = vmul.f32 1.442695, %v3086_v21 }
 0x5b2   :  { %3399 = vpow2.f32 %v3087_v33 }
 0x5b8   :  { %v3400_v34 = vpop.eup %3399 }
 0x5b9   :  { %v3089_v17 = vsel %vm3078_vm3, %v3400_v34, 0.0 }
 0x5ba   :  { %v3090_v41 = vrot.slane %v3089_v17, 4 }
 0x5bc   :  { %v3091_v12 = vadd.f32 %v3090_v41, %v3089_v17 }
 0x5be   :  { %v3092_v54 = vrot.slane %v3091_v12, 2 }
 0x5c0   :  { %v3093_v15 = vadd.f32 %v3092_v54, %v3091_v12  ;;  %v3204_v12 = vld [vmem:[%s5932_s13] sm:$0xff] }
 0x5c2   :  { %v3094_v43 = vrot.slane %v3093_v15, 1 }
 0x5c4   :  { %v3095_v18 = vadd.f32 %v3094_v43, %v3093_v15 }
 0x5c6   :  { %3401 = vrcp.f32 %v3095_v18  ;;  %v3107_v45 = vand.u32 2147483648, %v3095_v18  ;;  %v3105_v48 = vand.u32 2147483647, %v3095_v18  ;;  %vm3101_vm5 = vweird.f32 %v3095_v18 }
 0x5c8   :  { %v3108_v7 = vor.u32 1.1754944e-38, %v3107_v45  ;;  %vm3106_vm7 = vcmp.eq.f32.partialorder %v3105_v48, 8.507059e+37 }
 0x5cc   :  { %v3402_v0 = vpop.eup %3401 }
 0x5cd   :  { %v3097_v42 = vmul.f32 %v3402_v0, %v3095_v18  ;;  %vm3102_vm4 = vweird.f32 %v3402_v0 }
 0x5ce   :  { %vm3103_vm6 = vmor %vm3101_vm5, %vm3102_vm4 }
 0x5cf   :  { %v3098_v9 = vsub.f32 1.0, %v3097_v42 }
 0x5d1   :  { %v3099_v13 = vmul.f32 %v3402_v0, %v3098_v9 }
 0x5d3   :  { %v3100_v53 = vadd.f32 %v3402_v0, %v3099_v13 }
 0x5d5   :  { %v3104_v60 = vsel %vm3103_vm6, %v3402_v0, %v3100_v53 }
 0x5d6   :  { %v3109_v58 = vsel %vm3106_vm7, %v3108_v7, %v3104_v60 }
 0x5d7   :  { %v3110_v3 = vmul.f32 %v3400_v34, %v3109_v58 }
 0x5d9   :  { %3113 = vperm.xlu0 %3394, %v3110_v3   ;;  %3238 = vst.msk [vmem:[%s5935_s16] sm:$0xff] %vm3078_vm3, %v3110_v3 }
 0x64b   :  { %v3114_v38 = vpop.permute.xlu0 %3113 }
 0x64c   :  { %v3116_v19 = vmul.f32 %v3114_v38, %v2959_v47  ;;  %v3117_v46 = vmul.f32 %v3114_v38, %v2960_v10  ;;  %v3209_v47 = vld [vmem:[%s5932_s13 + $0x28] sm:$0xff]  ;;  %v3207_v10 = vld [vmem:[%s5932_s13 + $0x18] sm:$0xff] }
 0x64d   :  { %3226 = vmatpush.msrb.mxu2 %v3209_v47 }
 0x64e   :  { %v3118_v32 = vrot.slane %v3116_v19, 4  ;;  %v3124_v6 = vrot.slane %v3117_v46, 4 }
 0x64f   :  { %3227 = vmatpush.msrb.mxu2 %v3208_v40 }
 0x650   :  { %v3119_v31 = vadd.f32 %v3118_v32, %v3116_v19  ;;  %v3125_v21 = vadd.f32 %v3124_v6, %v3117_v46 }
 0x651   :  { %3228 = vmatpush.msrb.mxu2 %v3207_v10 }
 0x652   :  { %v3120_v33 = vrot.slane %v3119_v31, 2  ;;  %v3126_v34 = vrot.slane %v3125_v21, 2 }
 0x653   :  { %3229 = vmatpush.msrb.mxu2 %v3206_v29 }
 0x654   :  { %v3121_v17 = vadd.f32 %v3120_v33, %v3119_v31  ;;  %v3127_v16 = vadd.f32 %v3126_v34, %v3125_v21 }
 0x655   :  { %3230 = vmatpush.msrb.mxu2 %v3205_v62 }
 0x656   :  { %v3122_v56 = vrot.slane %v3121_v17, 1  ;;  %v3128_v35 = vrot.slane %v3127_v16, 1 }
 0x657   :  { %3231 = vmatpush.msrb.mxu2 %v3204_v12 }
 0x658   :  { %v3123_v41 = vadd.f32 %v3122_v56, %v3121_v17  ;;  %v3129_v24 = vadd.f32 %v3128_v35, %v3127_v16 }
 0x65a   :  { %3179 = vmatmul.f32.vlgmr.msrb.gmra.mxu3 %v3123_v41  ;;  %3199 = vmatmul.f32.vlgmr.msrb.gmra.mxu0 %v3129_v24 }
 0x6d7   :  { %v3200_v59 = vpop.f32.mrf.mxu0 }
 0x6dd   :  { %v3180_v61 = vpop.f32.mrf.mxu3 }
 0x6de   :  { %v3181_v54 = vadd.f32 %v3180_v61, %v3162_v4 }
 0x6e0   :  { %v3201_v49 = vadd.f32 %v3200_v59, %v3181_v54 }
 0x6e2   :  { %v3203_v15 = vmax.f32 %v3201_v49, 0.0 }
 0x6e4   :  { %3391 = vmatmul.msk.f32.vlgmr.msrb.gmra.mxu2 %vm2565_vm2, %v3203_v15 }
 0x767   :  { %v3233_v25 = vpop.f32.mrf.mxu2 }
 0x768   :  { %v3234_v43 = vadd.f32 %v3233_v25, %v3212_v44 }
 0x76a   :  { %3237 = vst.msk [vmem:[#allocation5] sm:$0x1] %vm3236_vm8, %v3234_v43 }
 0x76b   :  { %3249 = dma.vmem_to_hbm [thread:$0]  %s3245_s20, 16, %s3247_s6, [#allocation6]  }
 0x76c   :  { %3427 = dma.done.wait [#allocation6], 16  }
 0x76d   :  { %3428 = vsyncadd [#allocation6], 4294967280 }
 0x76e   :  { %3258 = vsyncpa [#allocation6], 1 }

</bundles_post_ra>
